<compile_context>
chip_gen: v7x
topology: tpu7x:2x2x1
jax: 0.10.0
libtpu: 0.0.40
codegen_flags: <defaults>
</compile_context>

<pallas_src>
import functools

import jax
import jax.numpy as jnp
from jax import lax
from jax.experimental import pallas as pl
from jax.experimental.pallas import tpu as pltpu


def _cdiv(a, b):
    return (a + b - 1) // b


# ---------------------------------------------------------------------------
# Kernel 1: streaming un-normalized scores + running top-k over N tiles
# ---------------------------------------------------------------------------
def _score_topk_kernel(feats_ref, masks_ref, w_ref, norm_ref,
                       idx_ref, scale_ref, vals_ref, idxs_ref,
                       *, n_rows, num_selects, tile_n):
    t = pl.program_id(0)
    k = num_selects
    neg_inf = jnp.float32(-jnp.inf)
    idx_sentinel = jnp.int32(0x7FFFFFFF)          # > any valid row index

    # --- per-tile UN-normalized scores, lane dense (1, tile_n) -------------
    # Ranking is invariant to the positive 1/||w|| factor, so normalization is
    # deferred to the K selected values in the epilogue (no per-tile cross-lane
    # reduction / sqrt / divide on the streaming hot loop).
    feats_t = feats_ref[...]                      # (tile_n, F), input dtype
    s8 = lax.dot_general(                         # (8, F) @ (tile_n, F)^T
        w_ref[...], feats_t,                      # w already in feats dtype
        dimension_numbers=(((1,), (1,)), ((), ())),
        preferred_element_type=jnp.float32,
    )                                             # (8, tile_n) f32
    s = s8[0:1, :]                                # row 0 = the weight row

    lane = lax.broadcasted_iota(jnp.int32, (1, tile_n), 1)
    gidx = t * tile_n + lane                      # global row indices
    valid = (masks_ref[...] > 0.0) & (gidx < n_rows)
    s = jnp.where(valid, s, neg_inf)

    # --- init running per-lane-position top-k on the first tile ------------
    @pl.when(t == 0)
    def _():
        vals_ref[...] = jnp.full((k, tile_n), -jnp.inf, dtype=jnp.float32)
        idxs_ref[...] = jnp.zeros((k, tile_n), dtype=jnp.int32)

    # --- merge this tile: one packed load, SSA insertion, one packed store -
    vals = vals_ref[...]                          # (k, tile_n)
    idxs = idxs_ref[...]
    cand_v, cand_i = s, gidx
    new_v, new_i = [], []
    for j in range(k):
        cur_v = vals[j:j + 1, :]
        cur_i = idxs[j:j + 1, :]
        take = cand_v > cur_v        # strict '>' keeps earlier index on ties
        new_v.append(jnp.where(take, cand_v, cur_v))
        new_i.append(jnp.where(take, cand_i, cur_i))
        cand_v = jnp.where(take, cur_v, cand_v)   # displaced entry moves down
        cand_i = jnp.where(take, cur_i, cand_i)
    all_v = jnp.concatenate(new_v, axis=0)        # (k, tile_n)
    all_i = jnp.concatenate(new_i, axis=0)
    vals_ref[...] = all_v
    idxs_ref[...] = all_i

    # --- last tile: merge positions, normalize, -inf filter / pad semantics
    @pl.when(t == pl.num_programs(0) - 1)
    def _():
        norm = norm_ref[...]                      # (1, 1) f32 = ||w||
        work = all_v
        sel_idx, sel_val = [], []
        for _ in range(k):
            m = jnp.max(work)
            # lowest global index among the maxima (stable tie-break)
            chosen = jnp.min(jnp.where(work == m, all_i, idx_sentinel))
            sel_idx.append(chosen)
            sel_val.append(m)
            work = jnp.where(all_i == chosen, neg_inf, work)

        # topk_indices[topk_scores > -inf]; pad with last valid index/score.
        last_idx, last_val = sel_idx[0], sel_val[0]
        iota_k = lax.broadcasted_iota(jnp.int32, (k, 1), 0)
        idx_col = jnp.zeros((k, 1), jnp.int32)
        scl_col = jnp.zeros((k, 1), jnp.float32)
        for j in range(k):
            is_valid = sel_val[j] > neg_inf
            last_idx = jnp.where(is_valid, sel_idx[j], last_idx)
            last_val = jnp.where(is_valid, sel_val[j], last_val)
            idx_col = jnp.where(iota_k == j, last_idx, idx_col)
            scl_col = jnp.where(iota_k == j,
                                jnp.tanh(last_val / norm), scl_col)

        idx_ref[...] = idx_col
        scale_ref[...] = scl_col


def _score_topk(feats, masks, weight, num_selects, *, tile_n, num_tiles,
                vmem_limit_bytes):
    n, f = feats.shape
    masks_row = jnp.reshape(masks, (1, n)).astype(jnp.float32)   # lane dense
    # Stage the weight once, already in feats' dtype (no per-tile casts).
    w_row8 = jnp.zeros((8, f), dtype=feats.dtype).at[0, :].set(
        weight[:, 0].astype(feats.dtype))
    norm = jnp.reshape(
        jnp.sqrt(jnp.sum(jnp.square(weight.astype(jnp.float32)))), (1, 1))

    kernel = functools.partial(_score_topk_kernel, n_rows=n,
                               num_selects=num_selects, tile_n=tile_n)
    grid_spec = pltpu.PrefetchScalarGridSpec(
        num_scalar_prefetch=0,
        grid=(num_tiles,),
        in_specs=[
            pl.BlockSpec((tile_n, f), lambda t: (t, 0)),   # feats (pipelined)
            pl.BlockSpec((1, tile_n), lambda t: (0, t)),   # masks (lane dense)
            pl.BlockSpec((8, f), lambda t: (0, 0)),        # weight (resident)
            pl.BlockSpec((1, 1), lambda t: (0, 0)),        # ||w|| (resident)
        ],
        out_specs=[
            pl.BlockSpec((num_selects, 1), lambda t: (0, 0)),  # indices
            pl.BlockSpec((num_selects, 1), lambda t: (0, 0)),  # tanh scales
        ],
        scratch_shapes=[
            pltpu.VMEM((num_selects, tile_n), jnp.float32),    # running vals
            pltpu.VMEM((num_selects, tile_n), jnp.int32),      # running idxs
        ],
    )
    return pl.pallas_call(
        kernel,
        out_shape=(jax.ShapeDtypeStruct((num_selects, 1), jnp.int32),
                   jax.ShapeDtypeStruct((num_selects, 1), jnp.float32)),
        grid_spec=grid_spec,
        compiler_params=pltpu.CompilerParams(
            dimension_semantics=("arbitrary",),       # N axis carries state
            vmem_limit_bytes=vmem_limit_bytes,
        ),
    )(feats, masks_row, w_row8, norm)


# ---------------------------------------------------------------------------
# Kernel 2: gather the K selected rows straight from HBM into out, scale them
# ---------------------------------------------------------------------------
def _gather_scale_kernel(idx_ref, scale_ref, feats_hbm, out_ref, sems):
    k = out_ref.shape[0]
    n_rows = feats_hbm.shape[0]
    copies = []
    for i in range(k):
        r = jnp.minimum(jnp.maximum(idx_ref[i], 0), n_rows - 1)  # clamp
        cp = pltpu.make_async_copy(feats_hbm.at[pl.ds(r, 1)],
                                   out_ref.at[pl.ds(i, 1)],      # DMA -> out
                                   sems.at[i])
        cp.start()
        copies.append(cp)
    for cp in copies:
        cp.wait()
    out_ref[...] = (out_ref[...].astype(jnp.float32)
                    * scale_ref[...]).astype(out_ref.dtype)


def _gather_scale(feats, idx, scale_col, num_selects):
    n, f = feats.shape
    grid_spec = pltpu.PrefetchScalarGridSpec(
        num_scalar_prefetch=1,                        # idx -> SMEM
        grid=(1,),
        in_specs=[
            pl.BlockSpec((num_selects, 1), lambda i, idx_ref: (0, 0)),
            pl.BlockSpec(memory_space=pl.ANY),        # feats stays in HBM
        ],
        out_specs=pl.BlockSpec((num_selects, f), lambda i, idx_ref: (0, 0)),
        scratch_shapes=[pltpu.SemaphoreType.DMA((num_selects,))],
    )
    return pl.pallas_call(
        _gather_scale_kernel,
        out_shape=jax.ShapeDtypeStruct((num_selects, f), feats.dtype),
        grid_spec=grid_spec,
        compiler_params=pltpu.CompilerParams(
            dimension_semantics=("arbitrary",)),
    )(idx, scale_col, feats)


# ---------------------------------------------------------------------------
# Public wrapper (TopKSummary.forward)
# ---------------------------------------------------------------------------
def topk_summary(feats, masks, weight, num_selects, *,
                 target_tile_bytes=4 * 1024 * 1024, max_tile_n=8192):
    """Pallas TPU implementation of TopKSummary.forward."""
    n, f = feats.shape
    itemsize = jnp.dtype(feats.dtype).itemsize
    # F-adaptive tile: ~target_tile_bytes of feats per grid step, 128-aligned.
    rows = max(int(target_tile_bytes) // max(f * itemsize, 1), 128)
    tile_n = max(128, min(int(max_tile_n), (rows // 128) * 128))
    # v7x-safe budget for the double-buffered feats tile (64 MiB physical).
    while tile_n > 128 and 2 * tile_n * f * itemsize > 24 * 1024 * 1024:
        tile_n = max(128, ((tile_n // 2) // 128) * 128)
    if n <= tile_n:
        tile_n = n                         # single full block for small graphs
    num_tiles = _cdiv(n, tile_n)

    idx_col, scale_col = _score_topk(
        feats, masks, weight, num_selects,
        tile_n=tile_n, num_tiles=num_tiles,
        vmem_limit_bytes=32 * 1024 * 1024)
    idx = idx_col.reshape(num_selects)
    return _gather_scale(feats, idx, scale_col, num_selects)


def topk_summary_ref(feats, masks, weight, num_selects):
    """Pure-JAX reference matching the PyTorch semantics (for verification)."""
    w32 = weight.astype(jnp.float32)
    scores = jnp.dot(feats.astype(jnp.float32), w32,
                     precision=lax.Precision.HIGHEST)[:, 0]
    scores = scores / jnp.linalg.norm(w32)
    scores = jnp.where(masks.reshape(-1) <= 0, -jnp.inf, scores)
    k = min(feats.shape[0], num_selects)
    vals, idxs = lax.top_k(scores, k)
    num_valid = jnp.sum(vals > -jnp.inf)
    last = idxs[num_valid - 1]
    idxs = jnp.where(jnp.arange(k) < num_valid, idxs, last)
    if k < num_selects:
        idxs = jnp.concatenate(
            [idxs, jnp.full((num_selects - k,), last, idxs.dtype)])
    sel = feats[idxs].astype(jnp.float32) * jnp.tanh(scores[idxs])[:, None]
    return sel.astype(feats.dtype)


if __name__ == "__main__":
    root = jax.random.PRNGKey(0)

    def run_case(case_key, n, f, k, num_valid_masks=None, keep_prob=0.7, **kw):
        k1, k2, k3 = jax.random.split(case_key, 3)
        feats = jax.random.normal(k1, (n, f), dtype=jnp.float32)
        if num_valid_masks is not None:
            sel = jax.random.choice(k2, n, (num_valid_masks,), replace=False)
            masks = jnp.zeros((n,), jnp.float32).at[sel].set(1.0)
        else:
            masks = jax.random.bernoulli(k2, keep_prob, (n,)).astype(jnp.float32)
        # Glorot-uniform init matching TopKSummary.reset(): a = sqrt(6/(2*F)).
        a = (6.0 / (f + f)) ** 0.5
        weight = jax.random.uniform(k3, (f, 1), dtype=jnp.float32,
                                    minval=-a, maxval=a)

        out = jax.block_until_ready(topk_summary(feats, masks, weight, k, **kw))
        ref = topk_summary_ref(feats, masks, weight, k)
        assert out.shape == (k, f), (out.shape, (k, f))
        assert jnp.allclose(out, ref, atol=1e-4, rtol=1e-4), (n, f, k)

    key_a, key_b, key_c = jax.random.split(root, 3)
    # Single adaptive-tile path (whole N fits one block).
    run_case(key_a, n=1024, f=128, k=8)
    # Multi-tile streaming path with a partial last tile (forced small tiles).
    run_case(key_b, n=1000, f=128, k=8, max_tile_n=256)
    # Tiny graph with only 2 valid rows (exercises the -inf padding path).
    run_case(key_c, n=16, f=32, k=4, num_valid_masks=2)

    print("KERNEL_OK")
</pallas_src>

<mosaic_0001>
module attributes {stable_mosaic.version = 11 : i64} {
  func.func @_score_topk_kernel(%arg0: i32, %arg1: memref<1024x128xf32, #tpu.memory_space<vmem>>, %arg2: memref<1x1024xf32, #tpu.memory_space<vmem>>, %arg3: memref<8x128xf32, #tpu.memory_space<vmem>>, %arg4: memref<1x1xf32, #tpu.memory_space<vmem>>, %arg5: memref<8x1xi32, #tpu.memory_space<vmem>>, %arg6: memref<8x1xf32, #tpu.memory_space<vmem>>, %arg7: memref<8x1024xf32, #tpu.memory_space<vmem>>, %arg8: memref<8x1024xi32, #tpu.memory_space<vmem>>) attributes {dimension_semantics = [#tpu.dimension_semantics<arbitrary>], iteration_bounds = array<i64: 1>, scalar_prefetch = 0 : i64, scratch_operands = 2 : i64, tpu.core_type = #tpu.core_type<tc>, window_params = [{transform_indices = @transform_0, window_bounds = array<i64: 1024, 128>}, {transform_indices = @transform_1, window_bounds = array<i64: 1, 1024>}, {pipeline_mode = #tpu.pipeline_mode<synchronous>, transform_indices = @transform_2, window_bounds = array<i64: 8, 128>}, {pipeline_mode = #tpu.pipeline_mode<synchronous>, transform_indices = @transform_3, window_bounds = array<i64: 1, 1>}, {pipeline_mode = #tpu.pipeline_mode<synchronous>, transform_indices = @transform_4, window_bounds = array<i64: 8, 1>}, {pipeline_mode = #tpu.pipeline_mode<synchronous>, transform_indices = @transform_5, window_bounds = array<i64: 8, 1>}]} {
    %c0 = arith.constant 0 : index
    %c0_0 = arith.constant 0 : index
    %0 = vector.load %arg1[%c0, %c0_0] : memref<1024x128xf32, #tpu.memory_space<vmem>>, vector<1024x128xf32>
    %c0_1 = arith.constant 0 : index
    %c0_2 = arith.constant 0 : index
    %1 = vector.load %arg3[%c0_1, %c0_2] : memref<8x128xf32, #tpu.memory_space<vmem>>, vector<8x128xf32>
    %cst = arith.constant dense<0.000000e+00> : vector<8x1024xf32>
    %2 = tpu.matmul %1, %0, %cst {dimension_numbers = #tpu.dot_dimension_numbers<[1], [1], [0], [0], [0, 0, 1, 0], [], []>} : vector<8x128xf32>, vector<1024x128xf32>, vector<8x1024xf32> -> vector<8x1024xf32>
    %3 = vector.extract_strided_slice %2 {offsets = [0, 0], sizes = [1, 1024], strides = [1, 1]} : vector<8x1024xf32> to vector<1x1024xf32>
    %4 = tpu.iota {dimensions = array<i32: 1>} : vector<1x1024xi32>
    %c1024_i32 = arith.constant 1024 : i32
    %5 = arith.muli %arg0, %c1024_i32 : i32
    %6 = vector.broadcast %5 : i32 to vector<1x1024xi32>
    %7 = arith.addi %6, %4 : vector<1x1024xi32>
    %c0_3 = arith.constant 0 : index
    %c0_4 = arith.constant 0 : index
    %8 = vector.load %arg2[%c0_3, %c0_4] : memref<1x1024xf32, #tpu.memory_space<vmem>>, vector<1x1024xf32>
    %cst_5 = arith.constant 0.000000e+00 : f32
    %9 = vector.broadcast %cst_5 : f32 to vector<1x1024xf32>
    %10 = arith.cmpf ogt, %8, %9 : vector<1x1024xf32>
    %c1024_i32_6 = arith.constant 1024 : i32
    %11 = vector.broadcast %c1024_i32_6 : i32 to vector<1x1024xi32>
    %12 = arith.cmpi slt, %7, %11 : vector<1x1024xi32>
    %13 = arith.andi %10, %12 : vector<1x1024xi1>
    %cst_7 = arith.constant 0xFF800000 : f32
    %14 = vector.broadcast %cst_7 : f32 to vector<1x1024xf32>
    %15 = arith.select %13, %3, %14 : vector<1x1024xi1>, vector<1x1024xf32>
    %c0_i32 = arith.constant 0 : i32
    %16 = arith.cmpi eq, %arg0, %c0_i32 : i32
    %17 = arith.extui %16 : i1 to i32
    %c0_i32_8 = arith.constant 0 : i32
    %18 = arith.cmpi ne, %17, %c0_i32_8 : i32
    scf.if %18 {
      %cst_20 = arith.constant 0xFF800000 : f32
      %82 = vector.broadcast %cst_20 : f32 to vector<8x1024xf32>
      %c0_21 = arith.constant 0 : index
      %c0_22 = arith.constant 0 : index
      %83 = vector.load %arg7[%c0_21, %c0_22] : memref<8x1024xf32, #tpu.memory_space<vmem>>, vector<8x1024xf32>
      tpu.vector_store %arg7[%c0_21, %c0_22], %82 {strides = array<i32>} : memref<8x1024xf32, #tpu.memory_space<vmem>>, vector<8x1024xf32>,
      %c0_i32_23 = arith.constant 0 : i32
      %84 = vector.broadcast %c0_i32_23 : i32 to vector<8x1024xi32>
      %c0_24 = arith.constant 0 : index
      %c0_25 = arith.constant 0 : index
      %85 = vector.load %arg8[%c0_24, %c0_25] : memref<8x1024xi32, #tpu.memory_space<vmem>>, vector<8x1024xi32>
      tpu.vector_store %arg8[%c0_24, %c0_25], %84 {strides = array<i32>} : memref<8x1024xi32, #tpu.memory_space<vmem>>, vector<8x1024xi32>,
    } else {
    }
    %c0_9 = arith.constant 0 : index
    %c0_10 = arith.constant 0 : index
    %19 = vector.load %arg7[%c0_9, %c0_10] : memref<8x1024xf32, #tpu.memory_space<vmem>>, vector<8x1024xf32>
    %c0_11 = arith.constant 0 : index
    %c0_12 = arith.constant 0 : index
    %20 = vector.load %arg8[%c0_11, %c0_12] : memref<8x1024xi32, #tpu.memory_space<vmem>>, vector<8x1024xi32>
    %21 = vector.extract_strided_slice %19 {offsets = [0, 0], sizes = [1, 1024], strides = [1, 1]} : vector<8x1024xf32> to vector<1x1024xf32>
    %22 = vector.extract_strided_slice %20 {offsets = [0, 0], sizes = [1, 1024], strides = [1, 1]} : vector<8x1024xi32> to vector<1x1024xi32>
    %23 = arith.cmpf ogt, %15, %21 : vector<1x1024xf32>
    %24 = arith.select %23, %15, %21 : vector<1x1024xi1>, vector<1x1024xf32>
    %25 = arith.select %23, %7, %22 : vector<1x1024xi1>, vector<1x1024xi32>
    %26 = arith.select %23, %21, %15 : vector<1x1024xi1>, vector<1x1024xf32>
    %27 = arith.select %23, %22, %7 : vector<1x1024xi1>, vector<1x1024xi32>
    %28 = vector.extract_strided_slice %19 {offsets = [1, 0], sizes = [1, 1024], strides = [1, 1]} : vector<8x1024xf32> to vector<1x1024xf32>
    %29 = vector.extract_strided_slice %20 {offsets = [1, 0], sizes = [1, 1024], strides = [1, 1]} : vector<8x1024xi32> to vector<1x1024xi32>
    %30 = arith.cmpf ogt, %26, %28 : vector<1x1024xf32>
    %31 = arith.select %30, %26, %28 : vector<1x1024xi1>, vector<1x1024xf32>
    %32 = arith.select %30, %27, %29 : vector<1x1024xi1>, vector<1x1024xi32>
    %33 = arith.select %30, %28, %26 : vector<1x1024xi1>, vector<1x1024xf32>
    %34 = arith.select %30, %29, %27 : vector<1x1024xi1>, vector<1x1024xi32>
    %35 = vector.extract_strided_slice %19 {offsets = [2, 0], sizes = [1, 1024], strides = [1, 1]} : vector<8x1024xf32> to vector<1x1024xf32>
    %36 = vector.extract_strided_slice %20 {offsets = [2, 0], sizes = [1, 1024], strides = [1, 1]} : vector<8x1024xi32> to vector<1x1024xi32>
    %37 = arith.cmpf ogt, %33, %35 : vector<1x1024xf32>
    %38 = arith.select %37, %33, %35 : vector<1x1024xi1>, vector<1x1024xf32>
    %39 = arith.select %37, %34, %36 : vector<1x1024xi1>, vector<1x1024xi32>
    %40 = arith.select %37, %35, %33 : vector<1x1024xi1>, vector<1x1024xf32>
    %41 = arith.select %37, %36, %34 : vector<1x1024xi1>, vector<1x1024xi32>
    %42 = vector.extract_strided_slice %19 {offsets = [3, 0], sizes = [1, 1024], strides = [1, 1]} : vector<8x1024xf32> to vector<1x1024xf32>
    %43 = vector.extract_strided_slice %20 {offsets = [3, 0], sizes = [1, 1024], strides = [1, 1]} : vector<8x1024xi32> to vector<1x1024xi32>
    %44 = arith.cmpf ogt, %40, %42 : vector<1x1024xf32>
    %45 = arith.select %44, %40, %42 : vector<1x1024xi1>, vector<1x1024xf32>
    %46 = arith.select %44, %41, %43 : vector<1x1024xi1>, vector<1x1024xi32>
    %47 = arith.select %44, %42, %40 : vector<1x1024xi1>, vector<1x1024xf32>
    %48 = arith.select %44, %43, %41 : vector<1x1024xi1>, vector<1x1024xi32>
    %49 = vector.extract_strided_slice %19 {offsets = [4, 0], sizes = [1, 1024], strides = [1, 1]} : vector<8x1024xf32> to vector<1x1024xf32>
    %50 = vector.extract_strided_slice %20 {offsets = [4, 0], sizes = [1, 1024], strides = [1, 1]} : vector<8x1024xi32> to vector<1x1024xi32>
    %51 = arith.cmpf ogt, %47, %49 : vector<1x1024xf32>
    %52 = arith.select %51, %47, %49 : vector<1x1024xi1>, vector<1x1024xf32>
    %53 = arith.select %51, %48, %50 : vector<1x1024xi1>, vector<1x1024xi32>
    %54 = arith.select %51, %49, %47 : vector<1x1024xi1>, vector<1x1024xf32>
    %55 = arith.select %51, %50, %48 : vector<1x1024xi1>, vector<1x1024xi32>
    %56 = vector.extract_strided_slice %19 {offsets = [5, 0], sizes = [1, 1024], strides = [1, 1]} : vector<8x1024xf32> to vector<1x1024xf32>
    %57 = vector.extract_strided_slice %20 {offsets = [5, 0], sizes = [1, 1024], strides = [1, 1]} : vector<8x1024xi32> to vector<1x1024xi32>
    %58 = arith.cmpf ogt, %54, %56 : vector<1x1024xf32>
    %59 = arith.select %58, %54, %56 : vector<1x1024xi1>, vector<1x1024xf32>
    %60 = arith.select %58, %55, %57 : vector<1x1024xi1>, vector<1x1024xi32>
    %61 = arith.select %58, %56, %54 : vector<1x1024xi1>, vector<1x1024xf32>
    %62 = arith.select %58, %57, %55 : vector<1x1024xi1>, vector<1x1024xi32>
    %63 = vector.extract_strided_slice %19 {offsets = [6, 0], sizes = [1, 1024], strides = [1, 1]} : vector<8x1024xf32> to vector<1x1024xf32>
    %64 = vector.extract_strided_slice %20 {offsets = [6, 0], sizes = [1, 1024], strides = [1, 1]} : vector<8x1024xi32> to vector<1x1024xi32>
    %65 = arith.cmpf ogt, %61, %63 : vector<1x1024xf32>
    %66 = arith.select %65, %61, %63 : vector<1x1024xi1>, vector<1x1024xf32>
    %67 = arith.select %65, %62, %64 : vector<1x1024xi1>, vector<1x1024xi32>
    %68 = arith.select %65, %63, %61 : vector<1x1024xi1>, vector<1x1024xf32>
    %69 = arith.select %65, %64, %62 : vector<1x1024xi1>, vector<1x1024xi32>
    %70 = vector.extract_strided_slice %19 {offsets = [7, 0], sizes = [1, 1024], strides = [1, 1]} : vector<8x1024xf32> to vector<1x1024xf32>
    %71 = vector.extract_strided_slice %20 {offsets = [7, 0], sizes = [1, 1024], strides = [1, 1]} : vector<8x1024xi32> to vector<1x1024xi32>
    %72 = arith.cmpf ogt, %68, %70 : vector<1x1024xf32>
    %73 = arith.select %72, %68, %70 : vector<1x1024xi1>, vector<1x1024xf32>
    %74 = arith.select %72, %69, %71 : vector<1x1024xi1>, vector<1x1024xi32>
    %75 = tpu.concatenate %24, %31, %38, %45, %52, %59, %66, %73 in 0 : vector<1x1024xf32>, vector<1x1024xf32>, vector<1x1024xf32>, vector<1x1024xf32>, vector<1x1024xf32>, vector<1x1024xf32>, vector<1x1024xf32>, vector<1x1024xf32> -> vector<8x1024xf32>
    %76 = tpu.concatenate %25, %32, %39, %46, %53, %60, %67, %74 in 0 : vector<1x1024xi32>, vector<1x1024xi32>, vector<1x1024xi32>, vector<1x1024xi32>, vector<1x1024xi32>, vector<1x1024xi32>, vector<1x1024xi32>, vector<1x1024xi32> -> vector<8x1024xi32>
    %c0_13 = arith.constant 0 : index
    %c0_14 = arith.constant 0 : index
    %77 = vector.load %arg7[%c0_13, %c0_14] : memref<8x1024xf32, #tpu.memory_space<vmem>>, vector<8x1024xf32>
    tpu.vector_store %arg7[%c0_13, %c0_14], %75 {strides = array<i32>} : memref<8x1024xf32, #tpu.memory_space<vmem>>, vector<8x1024xf32>,
    %c0_15 = arith.constant 0 : index
    %c0_16 = arith.constant 0 : index
    %78 = vector.load %arg8[%c0_15, %c0_16] : memref<8x1024xi32, #tpu.memory_space<vmem>>, vector<8x1024xi32>
    tpu.vector_store %arg8[%c0_15, %c0_16], %76 {strides = array<i32>} : memref<8x1024xi32, #tpu.memory_space<vmem>>, vector<8x1024xi32>,
    %c0_i32_17 = arith.constant 0 : i32
    %79 = arith.cmpi eq, %arg0, %c0_i32_17 : i32
    %80 = arith.extui %79 : i1 to i32
    %c2147483647_i32 = arith.constant 2147483647 : i32
    %cst_18 = arith.constant 0xFF800000 : f32
    %c0_i32_19 = arith.constant 0 : i32
    %81 = arith.cmpi ne, %80, %c0_i32_19 : i32
    scf.if %81 {
      %c0_20 = arith.constant 0 : index
      %c0_21 = arith.constant 0 : index
      %82 = vector.load %arg4[%c0_20, %c0_21] : memref<1x1xf32, #tpu.memory_space<vmem>>, vector<1x1xf32>
      %83 = vector.shape_cast %75 : vector<8x1024xf32> to vector<1x8x1024xf32>
      %cst_22 = arith.constant dense<0xFF800000> : vector<1xf32>
      %84 = vector.multi_reduction <maximumf>, %83, %cst_22 [1, 2] : vector<1x8x1024xf32> to vector<1xf32>
      %85 = vector.shape_cast %84 : vector<1xf32> to vector<1x1x1xf32>
      %86 = vector.extract %85[0, 0, 0] : f32 from vector<1x1x1xf32>
      %87 = vector.broadcast %86 : f32 to vector<8x1024xf32>
      %88 = arith.cmpf oeq, %75, %87 : vector<8x1024xf32>
      %89 = vector.broadcast %c2147483647_i32 : i32 to vector<8x1024xi32>
      %90 = arith.select %88, %76, %89 : vector<8x1024xi1>, vector<8x1024xi32>
      %91 = vector.shape_cast %90 : vector<8x1024xi32> to vector<1x8x1024xi32>
      %cst_23 = arith.constant dense<2147483647> : vector<1xi32>
      %92 = vector.multi_reduction <minsi>, %91, %cst_23 [1, 2] : vector<1x8x1024xi32> to vector<1xi32>
      %93 = vector.shape_cast %92 : vector<1xi32> to vector<1x1x1xi32>
      %94 = vector.extract %93[0, 0, 0] : i32 from vector<1x1x1xi32>
      %95 = vector.broadcast %94 : i32 to vector<8x1024xi32>
      %96 = arith.cmpi eq, %76, %95 : vector<8x1024xi32>
      %97 = vector.broadcast %cst_18 : f32 to vector<8x1024xf32>
      %98 = arith.select %96, %97, %75 : vector<8x1024xi1>, vector<8x1024xf32>
      %99 = vector.shape_cast %98 : vector<8x1024xf32> to vector<1x8x1024xf32>
      %cst_24 = arith.constant dense<0xFF800000> : vector<1xf32>
      %100 = vector.multi_reduction <maximumf>, %99, %cst_24 [1, 2] : vector<1x8x1024xf32> to vector<1xf32>
      %101 = vector.shape_cast %100 : vector<1xf32> to vector<1x1x1xf32>
      %102 = vector.extract %101[0, 0, 0] : f32 from vector<1x1x1xf32>
      %103 = vector.broadcast %102 : f32 to vector<8x1024xf32>
      %104 = arith.cmpf oeq, %98, %103 : vector<8x1024xf32>
      %105 = vector.broadcast %c2147483647_i32 : i32 to vector<8x1024xi32>
      %106 = arith.select %104, %76, %105 : vector<8x1024xi1>, vector<8x1024xi32>
      %107 = vector.shape_cast %106 : vector<8x1024xi32> to vector<1x8x1024xi32>
      %cst_25 = arith.constant dense<2147483647> : vector<1xi32>
      %108 = vector.multi_reduction <minsi>, %107, %cst_25 [1, 2] : vector<1x8x1024xi32> to vector<1xi32>
      %109 = vector.shape_cast %108 : vector<1xi32> to vector<1x1x1xi32>
      %110 = vector.extract %109[0, 0, 0] : i32 from vector<1x1x1xi32>
      %111 = vector.broadcast %110 : i32 to vector<8x1024xi32>
      %112 = arith.cmpi eq, %76, %111 : vector<8x1024xi32>
      %113 = vector.broadcast %cst_18 : f32 to vector<8x1024xf32>
      %114 = arith.select %112, %113, %98 : vector<8x1024xi1>, vector<8x1024xf32>
      %115 = vector.shape_cast %114 : vector<8x1024xf32> to vector<1x8x1024xf32>
      %cst_26 = arith.constant dense<0xFF800000> : vector<1xf32>
      %116 = vector.multi_reduction <maximumf>, %115, %cst_26 [1, 2] : vector<1x8x1024xf32> to vector<1xf32>
      %117 = vector.shape_cast %116 : vector<1xf32> to vector<1x1x1xf32>
      %118 = vector.extract %117[0, 0, 0] : f32 from vector<1x1x1xf32>
      %119 = vector.broadcast %118 : f32 to vector<8x1024xf32>
      %120 = arith.cmpf oeq, %114, %119 : vector<8x1024xf32>
      %121 = vector.broadcast %c2147483647_i32 : i32 to vector<8x1024xi32>
      %122 = arith.select %120, %76, %121 : vector<8x1024xi1>, vector<8x1024xi32>
      %123 = vector.shape_cast %122 : vector<8x1024xi32> to vector<1x8x1024xi32>
      %cst_27 = arith.constant dense<2147483647> : vector<1xi32>
      %124 = vector.multi_reduction <minsi>, %123, %cst_27 [1, 2] : vector<1x8x1024xi32> to vector<1xi32>
      %125 = vector.shape_cast %124 : vector<1xi32> to vector<1x1x1xi32>
      %126 = vector.extract %125[0, 0, 0] : i32 from vector<1x1x1xi32>
      %127 = vector.broadcast %126 : i32 to vector<8x1024xi32>
      %128 = arith.cmpi eq, %76, %127 : vector<8x1024xi32>
      %129 = vector.broadcast %cst_18 : f32 to vector<8x1024xf32>
      %130 = arith.select %128, %129, %114 : vector<8x1024xi1>, vector<8x1024xf32>
      %131 = vector.shape_cast %130 : vector<8x1024xf32> to vector<1x8x1024xf32>
      %cst_28 = arith.constant dense<0xFF800000> : vector<1xf32>
      %132 = vector.multi_reduction <maximumf>, %131, %cst_28 [1, 2] : vector<1x8x1024xf32> to vector<1xf32>
      %133 = vector.shape_cast %132 : vector<1xf32> to vector<1x1x1xf32>
      %134 = vector.extract %133[0, 0, 0] : f32 from vector<1x1x1xf32>
      %135 = vector.broadcast %134 : f32 to vector<8x1024xf32>
      %136 = arith.cmpf oeq, %130, %135 : vector<8x1024xf32>
      %137 = vector.broadcast %c2147483647_i32 : i32 to vector<8x1024xi32>
      %138 = arith.select %136, %76, %137 : vector<8x1024xi1>, vector<8x1024xi32>
      %139 = vector.shape_cast %138 : vector<8x1024xi32> to vector<1x8x1024xi32>
      %cst_29 = arith.constant dense<2147483647> : vector<1xi32>
      %140 = vector.multi_reduction <minsi>, %139, %cst_29 [1, 2] : vector<1x8x1024xi32> to vector<1xi32>
      %141 = vector.shape_cast %140 : vector<1xi32> to vector<1x1x1xi32>
      %142 = vector.extract %141[0, 0, 0] : i32 from vector<1x1x1xi32>
      %143 = vector.broadcast %142 : i32 to vector<8x1024xi32>
      %144 = arith.cmpi eq, %76, %143 : vector<8x1024xi32>
      %145 = vector.broadcast %cst_18 : f32 to vector<8x1024xf32>
      %146 = arith.select %144, %145, %130 : vector<8x1024xi1>, vector<8x1024xf32>
      %147 = vector.shape_cast %146 : vector<8x1024xf32> to vector<1x8x1024xf32>
      %cst_30 = arith.constant dense<0xFF800000> : vector<1xf32>
      %148 = vector.multi_reduction <maximumf>, %147, %cst_30 [1, 2] : vector<1x8x1024xf32> to vector<1xf32>
      %149 = vector.shape_cast %148 : vector<1xf32> to vector<1x1x1xf32>
      %150 = vector.extract %149[0, 0, 0] : f32 from vector<1x1x1xf32>
      %151 = vector.broadcast %150 : f32 to vector<8x1024xf32>
      %152 = arith.cmpf oeq, %146, %151 : vector<8x1024xf32>
      %153 = vector.broadcast %c2147483647_i32 : i32 to vector<8x1024xi32>
      %154 = arith.select %152, %76, %153 : vector<8x1024xi1>, vector<8x1024xi32>
      %155 = vector.shape_cast %154 : vector<8x1024xi32> to vector<1x8x1024xi32>
      %cst_31 = arith.constant dense<2147483647> : vector<1xi32>
      %156 = vector.multi_reduction <minsi>, %155, %cst_31 [1, 2] : vector<1x8x1024xi32> to vector<1xi32>
      %157 = vector.shape_cast %156 : vector<1xi32> to vector<1x1x1xi32>
      %158 = vector.extract %157[0, 0, 0] : i32 from vector<1x1x1xi32>
      %159 = vector.broadcast %158 : i32 to vector<8x1024xi32>
      %160 = arith.cmpi eq, %76, %159 : vector<8x1024xi32>
      %161 = vector.broadcast %cst_18 : f32 to vector<8x1024xf32>
      %162 = arith.select %160, %161, %146 : vector<8x1024xi1>, vector<8x1024xf32>
      %163 = vector.shape_cast %162 : vector<8x1024xf32> to vector<1x8x1024xf32>
      %cst_32 = arith.constant dense<0xFF800000> : vector<1xf32>
      %164 = vector.multi_reduction <maximumf>, %163, %cst_32 [1, 2] : vector<1x8x1024xf32> to vector<1xf32>
      %165 = vector.shape_cast %164 : vector<1xf32> to vector<1x1x1xf32>
      %166 = vector.extract %165[0, 0, 0] : f32 from vector<1x1x1xf32>
      %167 = vector.broadcast %166 : f32 to vector<8x1024xf32>
      %168 = arith.cmpf oeq, %162, %167 : vector<8x1024xf32>
      %169 = vector.broadcast %c2147483647_i32 : i32 to vector<8x1024xi32>
      %170 = arith.select %168, %76, %169 : vector<8x1024xi1>, vector<8x1024xi32>
      %171 = vector.shape_cast %170 : vector<8x1024xi32> to vector<1x8x1024xi32>
      %cst_33 = arith.constant dense<2147483647> : vector<1xi32>
      %172 = vector.multi_reduction <minsi>, %171, %cst_33 [1, 2] : vector<1x8x1024xi32> to vector<1xi32>
      %173 = vector.shape_cast %172 : vector<1xi32> to vector<1x1x1xi32>
      %174 = vector.extract %173[0, 0, 0] : i32 from vector<1x1x1xi32>
      %175 = vector.broadcast %174 : i32 to vector<8x1024xi32>
      %176 = arith.cmpi eq, %76, %175 : vector<8x1024xi32>
      %177 = vector.broadcast %cst_18 : f32 to vector<8x1024xf32>
      %178 = arith.select %176, %177, %162 : vector<8x1024xi1>, vector<8x1024xf32>
      %179 = vector.shape_cast %178 : vector<8x1024xf32> to vector<1x8x1024xf32>
      %cst_34 = arith.constant dense<0xFF800000> : vector<1xf32>
      %180 = vector.multi_reduction <maximumf>, %179, %cst_34 [1, 2] : vector<1x8x1024xf32> to vector<1xf32>
      %181 = vector.shape_cast %180 : vector<1xf32> to vector<1x1x1xf32>
      %182 = vector.extract %181[0, 0, 0] : f32 from vector<1x1x1xf32>
      %183 = vector.broadcast %182 : f32 to vector<8x1024xf32>
      %184 = arith.cmpf oeq, %178, %183 : vector<8x1024xf32>
      %185 = vector.broadcast %c2147483647_i32 : i32 to vector<8x1024xi32>
      %186 = arith.select %184, %76, %185 : vector<8x1024xi1>, vector<8x1024xi32>
      %187 = vector.shape_cast %186 : vector<8x1024xi32> to vector<1x8x1024xi32>
      %cst_35 = arith.constant dense<2147483647> : vector<1xi32>
      %188 = vector.multi_reduction <minsi>, %187, %cst_35 [1, 2] : vector<1x8x1024xi32> to vector<1xi32>
      %189 = vector.shape_cast %188 : vector<1xi32> to vector<1x1x1xi32>
      %190 = vector.extract %189[0, 0, 0] : i32 from vector<1x1x1xi32>
      %191 = vector.broadcast %190 : i32 to vector<8x1024xi32>
      %192 = arith.cmpi eq, %76, %191 : vector<8x1024xi32>
      %193 = vector.broadcast %cst_18 : f32 to vector<8x1024xf32>
      %194 = arith.select %192, %193, %178 : vector<8x1024xi1>, vector<8x1024xf32>
      %195 = vector.shape_cast %194 : vector<8x1024xf32> to vector<1x8x1024xf32>
      %cst_36 = arith.constant dense<0xFF800000> : vector<1xf32>
      %196 = vector.multi_reduction <maximumf>, %195, %cst_36 [1, 2] : vector<1x8x1024xf32> to vector<1xf32>
      %197 = vector.shape_cast %196 : vector<1xf32> to vector<1x1x1xf32>
      %198 = vector.extract %197[0, 0, 0] : f32 from vector<1x1x1xf32>
      %199 = vector.broadcast %198 : f32 to vector<8x1024xf32>
      %200 = arith.cmpf oeq, %194, %199 : vector<8x1024xf32>
      %201 = vector.broadcast %c2147483647_i32 : i32 to vector<8x1024xi32>
      %202 = arith.select %200, %76, %201 : vector<8x1024xi1>, vector<8x1024xi32>
      %203 = vector.shape_cast %202 : vector<8x1024xi32> to vector<1x8x1024xi32>
      %cst_37 = arith.constant dense<2147483647> : vector<1xi32>
      %204 = vector.multi_reduction <minsi>, %203, %cst_37 [1, 2] : vector<1x8x1024xi32> to vector<1xi32>
      %205 = vector.shape_cast %204 : vector<1xi32> to vector<1x1x1xi32>
      %206 = vector.extract %205[0, 0, 0] : i32 from vector<1x1x1xi32>
      %207 = tpu.iota {dimensions = array<i32: 0>} : vector<8x1xi32>
      %c0_i32_38 = arith.constant 0 : i32
      %208 = vector.broadcast %c0_i32_38 : i32 to vector<8x1xi32>
      %cst_39 = arith.constant 0.000000e+00 : f32
      %209 = vector.broadcast %cst_39 : f32 to vector<8x1xf32>
      %210 = arith.cmpf ogt, %86, %cst_18 : f32
      %211 = arith.select %210, %94, %94 : i32
      %212 = arith.select %210, %86, %86 : f32
      %c0_i32_40 = arith.constant 0 : i32
      %213 = vector.broadcast %c0_i32_40 : i32 to vector<8x1xi32>
      %214 = arith.cmpi eq, %207, %213 : vector<8x1xi32>
      %215 = vector.broadcast %211 : i32 to vector<8x1xi32>
      %216 = arith.select %214, %215, %208 : vector<8x1xi1>, vector<8x1xi32>
      %c0_i32_41 = arith.constant 0 : i32
      %217 = vector.broadcast %c0_i32_41 : i32 to vector<8x1xi32>
      %218 = arith.cmpi eq, %207, %217 : vector<8x1xi32>
      %219 = vector.broadcast %212 : f32 to vector<1x1xf32>
      %220 = arith.divf %219, %82 : vector<1x1xf32>
      %221 = math.tanh %220 : vector<1x1xf32>
      %222 = vector.shape_cast %221 : vector<1x1xf32> to vector<1x1xf32>
      %223 = vector.broadcast %222 : vector<1x1xf32> to vector<8x1xf32>
      %224 = arith.select %218, %223, %209 : vector<8x1xi1>, vector<8x1xf32>
      %225 = arith.cmpf ogt, %102, %cst_18 : f32
      %226 = arith.select %225, %110, %211 : i32
      %227 = arith.select %225, %102, %212 : f32
      %c1_i32 = arith.constant 1 : i32
      %228 = vector.broadcast %c1_i32 : i32 to vector<8x1xi32>
      %229 = arith.cmpi eq, %207, %228 : vector<8x1xi32>
      %230 = vector.broadcast %226 : i32 to vector<8x1xi32>
      %231 = arith.select %229, %230, %216 : vector<8x1xi1>, vector<8x1xi32>
      %c1_i32_42 = arith.constant 1 : i32
      %232 = vector.broadcast %c1_i32_42 : i32 to vector<8x1xi32>
      %233 = arith.cmpi eq, %207, %232 : vector<8x1xi32>
      %234 = vector.broadcast %227 : f32 to vector<1x1xf32>
      %235 = arith.divf %234, %82 : vector<1x1xf32>
      %236 = math.tanh %235 : vector<1x1xf32>
      %237 = vector.shape_cast %236 : vector<1x1xf32> to vector<1x1xf32>
      %238 = vector.broadcast %237 : vector<1x1xf32> to vector<8x1xf32>
      %239 = arith.select %233, %238, %224 : vector<8x1xi1>, vector<8x1xf32>
      %240 = arith.cmpf ogt, %118, %cst_18 : f32
      %241 = arith.select %240, %126, %226 : i32
      %242 = arith.select %240, %118, %227 : f32
      %c2_i32 = arith.constant 2 : i32
      %243 = vector.broadcast %c2_i32 : i32 to vector<8x1xi32>
      %244 = arith.cmpi eq, %207, %243 : vector<8x1xi32>
      %245 = vector.broadcast %241 : i32 to vector<8x1xi32>
      %246 = arith.select %244, %245, %231 : vector<8x1xi1>, vector<8x1xi32>
      %c2_i32_43 = arith.constant 2 : i32
      %247 = vector.broadcast %c2_i32_43 : i32 to vector<8x1xi32>
      %248 = arith.cmpi eq, %207, %247 : vector<8x1xi32>
      %249 = vector.broadcast %242 : f32 to vector<1x1xf32>
      %250 = arith.divf %249, %82 : vector<1x1xf32>
      %251 = math.tanh %250 : vector<1x1xf32>
      %252 = vector.shape_cast %251 : vector<1x1xf32> to vector<1x1xf32>
      %253 = vector.broadcast %252 : vector<1x1xf32> to vector<8x1xf32>
      %254 = arith.select %248, %253, %239 : vector<8x1xi1>, vector<8x1xf32>
      %255 = arith.cmpf ogt, %134, %cst_18 : f32
      %256 = arith.select %255, %142, %241 : i32
      %257 = arith.select %255, %134, %242 : f32
      %c3_i32 = arith.constant 3 : i32
      %258 = vector.broadcast %c3_i32 : i32 to vector<8x1xi32>
      %259 = arith.cmpi eq, %207, %258 : vector<8x1xi32>
      %260 = vector.broadcast %256 : i32 to vector<8x1xi32>
      %261 = arith.select %259, %260, %246 : vector<8x1xi1>, vector<8x1xi32>
      %c3_i32_44 = arith.constant 3 : i32
      %262 = vector.broadcast %c3_i32_44 : i32 to vector<8x1xi32>
      %263 = arith.cmpi eq, %207, %262 : vector<8x1xi32>
      %264 = vector.broadcast %257 : f32 to vector<1x1xf32>
      %265 = arith.divf %264, %82 : vector<1x1xf32>
      %266 = math.tanh %265 : vector<1x1xf32>
      %267 = vector.shape_cast %266 : vector<1x1xf32> to vector<1x1xf32>
      %268 = vector.broadcast %267 : vector<1x1xf32> to vector<8x1xf32>
      %269 = arith.select %263, %268, %254 : vector<8x1xi1>, vector<8x1xf32>
      %270 = arith.cmpf ogt, %150, %cst_18 : f32
      %271 = arith.select %270, %158, %256 : i32
      %272 = arith.select %270, %150, %257 : f32
      %c4_i32 = arith.constant 4 : i32
      %273 = vector.broadcast %c4_i32 : i32 to vector<8x1xi32>
      %274 = arith.cmpi eq, %207, %273 : vector<8x1xi32>
      %275 = vector.broadcast %271 : i32 to vector<8x1xi32>
      %276 = arith.select %274, %275, %261 : vector<8x1xi1>, vector<8x1xi32>
      %c4_i32_45 = arith.constant 4 : i32
      %277 = vector.broadcast %c4_i32_45 : i32 to vector<8x1xi32>
      %278 = arith.cmpi eq, %207, %277 : vector<8x1xi32>
      %279 = vector.broadcast %272 : f32 to vector<1x1xf32>
      %280 = arith.divf %279, %82 : vector<1x1xf32>
      %281 = math.tanh %280 : vector<1x1xf32>
      %282 = vector.shape_cast %281 : vector<1x1xf32> to vector<1x1xf32>
      %283 = vector.broadcast %282 : vector<1x1xf32> to vector<8x1xf32>
      %284 = arith.select %278, %283, %269 : vector<8x1xi1>, vector<8x1xf32>
      %285 = arith.cmpf ogt, %166, %cst_18 : f32
      %286 = arith.select %285, %174, %271 : i32
      %287 = arith.select %285, %166, %272 : f32
      %c5_i32 = arith.constant 5 : i32
      %288 = vector.broadcast %c5_i32 : i32 to vector<8x1xi32>
      %289 = arith.cmpi eq, %207, %288 : vector<8x1xi32>
      %290 = vector.broadcast %286 : i32 to vector<8x1xi32>
      %291 = arith.select %289, %290, %276 : vector<8x1xi1>, vector<8x1xi32>
      %c5_i32_46 = arith.constant 5 : i32
      %292 = vector.broadcast %c5_i32_46 : i32 to vector<8x1xi32>
      %293 = arith.cmpi eq, %207, %292 : vector<8x1xi32>
      %294 = vector.broadcast %287 : f32 to vector<1x1xf32>
      %295 = arith.divf %294, %82 : vector<1x1xf32>
      %296 = math.tanh %295 : vector<1x1xf32>
      %297 = vector.shape_cast %296 : vector<1x1xf32> to vector<1x1xf32>
      %298 = vector.broadcast %297 : vector<1x1xf32> to vector<8x1xf32>
      %299 = arith.select %293, %298, %284 : vector<8x1xi1>, vector<8x1xf32>
      %300 = arith.cmpf ogt, %182, %cst_18 : f32
      %301 = arith.select %300, %190, %286 : i32
      %302 = arith.select %300, %182, %287 : f32
      %c6_i32 = arith.constant 6 : i32
      %303 = vector.broadcast %c6_i32 : i32 to vector<8x1xi32>
      %304 = arith.cmpi eq, %207, %303 : vector<8x1xi32>
      %305 = vector.broadcast %301 : i32 to vector<8x1xi32>
      %306 = arith.select %304, %305, %291 : vector<8x1xi1>, vector<8x1xi32>
      %c6_i32_47 = arith.constant 6 : i32
      %307 = vector.broadcast %c6_i32_47 : i32 to vector<8x1xi32>
      %308 = arith.cmpi eq, %207, %307 : vector<8x1xi32>
      %309 = vector.broadcast %302 : f32 to vector<1x1xf32>
      %310 = arith.divf %309, %82 : vector<1x1xf32>
      %311 = math.tanh %310 : vector<1x1xf32>
      %312 = vector.shape_cast %311 : vector<1x1xf32> to vector<1x1xf32>
      %313 = vector.broadcast %312 : vector<1x1xf32> to vector<8x1xf32>
      %314 = arith.select %308, %313, %299 : vector<8x1xi1>, vector<8x1xf32>
      %315 = arith.cmpf ogt, %198, %cst_18 : f32
      %316 = arith.select %315, %206, %301 : i32
      %317 = arith.select %315, %198, %302 : f32
      %c7_i32 = arith.constant 7 : i32
      %318 = vector.broadcast %c7_i32 : i32 to vector<8x1xi32>
      %319 = arith.cmpi eq, %207, %318 : vector<8x1xi32>
      %320 = vector.broadcast %316 : i32 to vector<8x1xi32>
      %321 = arith.select %319, %320, %306 : vector<8x1xi1>, vector<8x1xi32>
      %c7_i32_48 = arith.constant 7 : i32
      %322 = vector.broadcast %c7_i32_48 : i32 to vector<8x1xi32>
      %323 = arith.cmpi eq, %207, %322 : vector<8x1xi32>
      %324 = vector.broadcast %317 : f32 to vector<1x1xf32>
      %325 = arith.divf %324, %82 : vector<1x1xf32>
      %326 = math.tanh %325 : vector<1x1xf32>
      %327 = vector.shape_cast %326 : vector<1x1xf32> to vector<1x1xf32>
      %328 = vector.broadcast %327 : vector<1x1xf32> to vector<8x1xf32>
      %329 = arith.select %323, %328, %314 : vector<8x1xi1>, vector<8x1xf32>
      %c0_49 = arith.constant 0 : index
      %c0_50 = arith.constant 0 : index
      %330 = vector.load %arg5[%c0_49, %c0_50] : memref<8x1xi32, #tpu.memory_space<vmem>>, vector<8x1xi32>
      tpu.vector_store %arg5[%c0_49, %c0_50], %321 {strides = array<i32>} : memref<8x1xi32, #tpu.memory_space<vmem>>, vector<8x1xi32>,
      %c0_51 = arith.constant 0 : index
      %c0_52 = arith.constant 0 : index
      %331 = vector.load %arg6[%c0_51, %c0_52] : memref<8x1xf32, #tpu.memory_space<vmem>>, vector<8x1xf32>
      tpu.vector_store %arg6[%c0_51, %c0_52], %329 {strides = array<i32>} : memref<8x1xf32, #tpu.memory_space<vmem>>, vector<8x1xf32>,
    } else {
    }
    return
  }
  func.func @transform_0(%arg0: i32) -> (i32, i32) {
    %c0_i32 = arith.constant 0 : i32
    %c0_i32_0 = arith.constant 0 : i32
    return %arg0, %c0_i32 : i32, i32
  }
  func.func @transform_1(%arg0: i32) -> (i32, i32) {
    %c0_i32 = arith.constant 0 : i32
    %c0_i32_0 = arith.constant 0 : i32
    return %c0_i32, %arg0 : i32, i32
  }
  func.func @transform_2(%arg0: i32) -> (i32, i32) {
    %c0_i32 = arith.constant 0 : i32
    %c0_i32_0 = arith.constant 0 : i32
    %c0_i32_1 = arith.constant 0 : i32
    return %c0_i32, %c0_i32_0 : i32, i32
  }
  func.func @transform_3(%arg0: i32) -> (i32, i32) {
    %c0_i32 = arith.constant 0 : i32
    %c0_i32_0 = arith.constant 0 : i32
    %c0_i32_1 = arith.constant 0 : i32
    return %c0_i32, %c0_i32_0 : i32, i32
  }
  func.func @transform_4(%arg0: i32) -> (i32, i32) {
    %c0_i32 = arith.constant 0 : i32
    %c0_i32_0 = arith.constant 0 : i32
    %c0_i32_1 = arith.constant 0 : i32
    return %c0_i32, %c0_i32_0 : i32, i32
  }
  func.func @transform_5(%arg0: i32) -> (i32, i32) {
    %c0_i32 = arith.constant 0 : i32
    %c0_i32_0 = arith.constant 0 : i32
    %c0_i32_1 = arith.constant 0 : i32
    return %c0_i32, %c0_i32_0 : i32, i32
  }
}

</mosaic_0001>

<bundles_post_ra>
// kernel: tpu_custom_call.1
= control target key start
LH: loop header
LB: loop body
LE: loop exit
PB: predicated region body
PF: predicated region fallthrough
CT: control target
= control target key end

     0   :  { %s4235_s0 = inlined_call_operand.hbm [shape: f32[1024,128], index: 0, kind: input, shape index: {}]   ;;  %s4236_s1 = inlined_call_operand.hbm [shape: f32[1,1024], index: 1, kind: input, shape index: {}]   ;;  %s4237_s2 = inlined_call_operand.vmem [shape: f32[8,128], index: 2, kind: input, shape index: {}]   ;;  %s4238_s3 = inlined_call_operand.<no memory space> [shape: f32[1,1], index: 3, kind: input, shape index: {}]   ;;  %s4239_s4 = inlined_call_operand.vmem [shape: s32[8,1], index: 4, kind: output, shape index: {0}]   ;;  %s4240_s5 = inlined_call_operand.vmem [shape: f32[8,1], index: 5, kind: output, shape index: {1}]  }
   0x1   :  { %v11_v0 = vstv %s4238_s3 }
   0x2   :  { %12 = vst [vmem:[#allocation4] sm:$0x1] %v11_v0 }
   0x3   :  { %13 = vsyncpa [#allocation6], 0 }
   0x4   :  { %14 = vsyncpa [#allocation8], 0  ;;  %s2937_s20 = smov [#allocation5]   ;;  %s2889_s24 = scalar_lea.hbm %s4235_s0, 16384 }
   0x5   :  { %s20_s21 = sshll.u32 %s2937_s20, 4  ;;  %p2890_p0 = scmp.ne.s32.totalorder %s4235_s0, %s2889_s24  ;;  %s21_s21 = int_to_ptr.vmem [resolvable:$true] %s20_s21 }
   0x6   :  { %p2893_p1 = scmp.lt.u32.totalorder %s2889_s24, %s4235_s0 }
   0x8   :  { %p2895_p2 = pnand %p2893_p1, %p2890_p0 }
   0xa   :  { %2898 = shalt.err (!%p2895_p2)
}
   0xb   :  { %s2899_s3 = scalar_lea.vmem %s21_s21, 16384  ;;  %p2904_p4 = scmp.lt.s32.totalorder %s21_s21, %s21_s21 }
   0xc   :  { %p2900_p3 = scmp.ne.s32.totalorder %s21_s21, %s2899_s3  ;;  %p2905_p5 = scmp.lt.s32.totalorder %s2899_s3, %s2899_s3 }
   0xe   :  { %p2906_p6 = por %p2905_p5, %p2904_p4 }
  0x10   :  { %p2907_p7 = pnand %p2906_p6, %p2900_p3 }
  0x12   :  { %2910 = shalt.err (!%p2907_p7)
}
  0x13   :  { %s2938_s29 = smov 128   ;;  %s2939_s30 = smov 8  }
  0x14   :  { %26 = dma.hbm_to_vmem [thread:$0]  %s4235_s0, 16384, %s21_s21, [#allocation6], %s2938_s29, %s2938_s29, %s2939_s30  }
  0x15   :  { %s2940_s8 = smov [#allocation7]   ;;  %s2911_s12 = scalar_lea.hbm %s4236_s1, 128 }
  0x16   :  { %s33_s9 = sshll.u32 %s2940_s8, 4  ;;  %p2912_p8 = scmp.ne.s32.totalorder %s4236_s1, %s2911_s12  ;;  %s34_s9 = int_to_ptr.vmem [resolvable:$true] %s33_s9 }
  0x17   :  { %p2915_p9 = scmp.lt.u32.totalorder %s2911_s12, %s4236_s1 }
  0x19   :  { %p2917_p10 = pnand %p2915_p9, %p2912_p8 }
  0x1b   :  { %2920 = shalt.err (!%p2917_p10)
}
  0x1c   :  { %s2921_s17 = scalar_lea.vmem %s34_s9, 128  ;;  %p2926_p12 = scmp.lt.s32.totalorder %s34_s9, %s34_s9 }
  0x1d   :  { %p2922_p11 = scmp.ne.s32.totalorder %s34_s9, %s2921_s17  ;;  %p2927_p13 = scmp.lt.s32.totalorder %s2921_s17, %s2921_s17 }
  0x1f   :  { %p2928_p0 = por %p2927_p13, %p2926_p12 }
  0x21   :  { %p2929_p1 = pnand %p2928_p0, %p2922_p11 }
  0x23   :  { %2932 = shalt.err (!%p2929_p1)
}
  0x24   :  { %36 = dma.hbm_to_vmem [thread:$0]  %s4236_s1, 128, %s34_s9, [#allocation8]  }
  0x25   :  { %2933 = dma.done.wait [#allocation6], 16384  }
  0x26   :  { %2934 = vsyncadd [#allocation6], 4294950912 }
  0x27   :  { %2935 = dma.done.wait [#allocation8], 128  }
  0x28   :  { %2936 = vsyncadd [#allocation8], 4294967168  ;;  %v63_v1 = vld [vmem:[#allocation5 + $0x80] sm:$0xff]  ;;  %v64_v2 = vld [vmem:[#allocation5 + $0x88] sm:$0xff]  ;;  %vm1346_vm11 = vcmask 1040384   ;;  %vm1355_vm12 = vcmask 1041408  }
  0x29   :  { %v95_v3 = vld [vmem:[#allocation5 + $0x180] sm:$0xff]  ;;  %v2703_v4 = vpack.c.bf16 %v64_v2, %v63_v1  ;;  %v96_v5 = vld [vmem:[#allocation5 + $0x188] sm:$0xff]  ;;  %v65_v12 = vld [vmem:[#allocation5 + $0x90] sm:$0xff]  ;;  %vm1364_vm13 = vcmask 1042432   ;;  %vm1373_vm14 = vcmask 1043456   ;;  %vm1382_vm15 = vcmask 1044480  }
  0x2a   :  { %v47_v6 = vld [vmem:[#allocation5] sm:$0xff]  ;;  %v48_v7 = vld [vmem:[#allocation5 + $0x8] sm:$0xff]  ;;  %v2735_v8 = vpack.c.bf16 %v96_v5, %v95_v3  ;;  %v66_v14 = vld [vmem:[#allocation5 + $0x98] sm:$0xff] }
  0x2b   :  { %v2705_v9 = vpack.c.bf16 %v48_v7, %v47_v6  ;;  %v79_v10 = vld [vmem:[#allocation5 + $0x100] sm:$0xff]  ;;  %v80_v11 = vld [vmem:[#allocation5 + $0x108] sm:$0xff]  ;;  %2704 = vmatprep.subr.bf16.mxu0 %v2703_v4  ;;  %v97_v15 = vld [vmem:[#allocation5 + $0x190] sm:$0xff]  ;;  %v2707_v17 = vpack.c.bf16 %v66_v14, %v65_v12 }
  0x2c   :  { %v2737_v13 = vpack.c.bf16 %v80_v11, %v79_v10  ;;  %v98_v16 = vld [vmem:[#allocation5 + $0x198] sm:$0xff]  ;;  %2736 = vmatprep.subr.bf16.mxu1 %v2735_v8  ;;  %v49_v19 = vld [vmem:[#allocation5 + $0x10] sm:$0xff]  ;;  %v67_v23 = vld [vmem:[#allocation5 + $0xa0] sm:$0xff] }
  0x2d   :  { %2706 = vmatpush3.bf16.xpose.msra.mxu0 %v2705_v9  ;;  %v2739_v18 = vpack.c.bf16 %v98_v16, %v97_v15  ;;  %v50_v20 = vld [vmem:[#allocation5 + $0x18] sm:$0xff]  ;;  %v81_v21 = vld [vmem:[#allocation5 + $0x110] sm:$0xff]  ;;  %v68_v24 = vld [vmem:[#allocation5 + $0xa8] sm:$0xff] }
  0x2e   :  { %2738 = vmatpush3.bf16.xpose.msra.mxu1 %v2737_v13  ;;  %2708 = vmatprep.subr.bf16.mxu0 %v2707_v17  ;;  %v82_v22 = vld [vmem:[#allocation5 + $0x118] sm:$0xff]  ;;  %v99_v25 = vld [vmem:[#allocation5 + $0x1a0] sm:$0xff]  ;;  %v100_v26 = vld [vmem:[#allocation5 + $0x1a8] sm:$0xff]  ;;  %v2709_v27 = vpack.c.bf16 %v50_v20, %v49_v19  ;;  %v2711_v29 = vpack.c.bf16 %v68_v24, %v67_v23 }
  0x2f   :  { %2740 = vmatprep.subr.bf16.mxu1 %v2739_v18  ;;  %v2741_v28 = vpack.c.bf16 %v82_v22, %v81_v21  ;;  %v2743_v30 = vpack.c.bf16 %v100_v26, %v99_v25  ;;  %v51_v31 = vld [vmem:[#allocation5 + $0x20] sm:$0xff]  ;;  %v52_v32 = vld [vmem:[#allocation5 + $0x28] sm:$0xff]  ;;  %v69_v35 = vld [vmem:[#allocation5 + $0xb0] sm:$0xff] }
  0x30   :  { %v83_v33 = vld [vmem:[#allocation5 + $0x120] sm:$0xff]  ;;  %v84_v34 = vld [vmem:[#allocation5 + $0x128] sm:$0xff]  ;;  %v70_v36 = vld [vmem:[#allocation5 + $0xb8] sm:$0xff]  ;;  %v2713_v39 = vpack.c.bf16 %v52_v32, %v51_v31 }
  0x31   :  { %v101_v37 = vld [vmem:[#allocation5 + $0x1b0] sm:$0xff]  ;;  %v102_v38 = vld [vmem:[#allocation5 + $0x1b8] sm:$0xff]  ;;  %v2745_v40 = vpack.c.bf16 %v84_v34, %v83_v33  ;;  %v2715_v41 = vpack.c.bf16 %v70_v36, %v69_v35  ;;  %v71_v48 = vld [vmem:[#allocation5 + $0xc0] sm:$0xff] }
  0x32   :  { %v2747_v42 = vpack.c.bf16 %v102_v38, %v101_v37  ;;  %v53_v43 = vld [vmem:[#allocation5 + $0x30] sm:$0xff]  ;;  %v54_v44 = vld [vmem:[#allocation5 + $0x38] sm:$0xff]  ;;  %v72_v49 = vld [vmem:[#allocation5 + $0xc8] sm:$0xff] }
  0x33   :  { %v85_v45 = vld [vmem:[#allocation5 + $0x130] sm:$0xff]  ;;  %v3005_v46 = vld [vmem:[%s4237_s2] sm:$0xff]  ;;  %v104_v51 = vld [vmem:[#allocation5 + $0x1c8] sm:$0xff]  ;;  %v2717_v52 = vpack.c.bf16 %v54_v44, %v53_v43  ;;  %v2719_v54 = vpack.c.bf16 %v72_v49, %v71_v48 }
  0x34   :  { %v86_v47 = vld [vmem:[#allocation5 + $0x138] sm:$0xff]  ;;  %2599 = vmatprep.mubr.f32.mxu0 %v3005_v46  ;;  %v103_v50 = vld [vmem:[#allocation5 + $0x1c0] sm:$0xff]  ;;  %2633 = vmatprep.mubr.f32.mxu1 %v3005_v46  ;;  %v56_v57 = vld [vmem:[#allocation5 + $0x48] sm:$0xff] }
  0x35   :  { %2710 = vmatpush3.bf16.xpose.msra.mxu0 %v2709_v27  ;;  %v2749_v53 = vpack.c.bf16 %v86_v47, %v85_v45  ;;  %v2751_v55 = vpack.c.bf16 %v104_v51, %v103_v50  ;;  %v55_v56 = vld [vmem:[#allocation5 + $0x40] sm:$0xff]  ;;  %v88_v59 = vld [vmem:[#allocation5 + $0x148] sm:$0xff]  ;;  %v73_v60 = vld [vmem:[#allocation5 + $0xd0] sm:$0xff] }
  0x36   :  { %2742 = vmatpush3.bf16.xpose.msra.mxu1 %v2741_v28  ;;  %2712 = vmatprep.subr.bf16.mxu0 %v2711_v29  ;;  %v87_v58 = vld [vmem:[#allocation5 + $0x140] sm:$0xff]  ;;  %v74_v61 = vld [vmem:[#allocation5 + $0xd8] sm:$0xff]  ;;  %v105_v62 = vld [vmem:[#allocation5 + $0x1d0] sm:$0xff]  ;;  %v2721_v0 = vpack.c.bf16 %v56_v57, %v55_v56 }
  0x37   :  { %2744 = vmatprep.subr.bf16.mxu1 %v2743_v30  ;;  %v106_v63 = vld [vmem:[#allocation5 + $0x1d8] sm:$0xff]  ;;  %v2753_v1 = vpack.c.bf16 %v88_v59, %v87_v58  ;;  %v2723_v2 = vpack.c.bf16 %v74_v61, %v73_v60  ;;  %v57_v4 = vld [vmem:[#allocation5 + $0x50] sm:$0xff]  ;;  %v75_v8 = vld [vmem:[#allocation5 + $0xe0] sm:$0xff] }
  0x38   :  { %v2755_v3 = vpack.c.bf16 %v106_v63, %v105_v62  ;;  %v58_v5 = vld [vmem:[#allocation5 + $0x58] sm:$0xff]  ;;  %v89_v6 = vld [vmem:[#allocation5 + $0x150] sm:$0xff]  ;;  %v76_v9 = vld [vmem:[#allocation5 + $0xe8] sm:$0xff] }
  0x39   :  { %v90_v7 = vld [vmem:[#allocation5 + $0x158] sm:$0xff]  ;;  %v107_v10 = vld [vmem:[#allocation5 + $0x1e0] sm:$0xff]  ;;  %v108_v11 = vld [vmem:[#allocation5 + $0x1e8] sm:$0xff]  ;;  %v2725_v12 = vpack.c.bf16 %v58_v5, %v57_v4  ;;  %v2727_v14 = vpack.c.bf16 %v76_v9, %v75_v8 }
  0x3a   :  { %v2757_v13 = vpack.c.bf16 %v90_v7, %v89_v6  ;;  %v2759_v15 = vpack.c.bf16 %v108_v11, %v107_v10  ;;  %v59_v16 = vld [vmem:[#allocation5 + $0x60] sm:$0xff]  ;;  %v60_v17 = vld [vmem:[#allocation5 + $0x68] sm:$0xff]  ;;  %v77_v20 = vld [vmem:[#allocation5 + $0xf0] sm:$0xff] }
  0x3b   :  { %v91_v18 = vld [vmem:[#allocation5 + $0x160] sm:$0xff]  ;;  %v92_v19 = vld [vmem:[#allocation5 + $0x168] sm:$0xff]  ;;  %v78_v21 = vld [vmem:[#allocation5 + $0xf8] sm:$0xff]  ;;  %v2729_v24 = vpack.c.bf16 %v60_v17, %v59_v16 }
  0x3c   :  { %v109_v22 = vld [vmem:[#allocation5 + $0x1f0] sm:$0xff]  ;;  %v110_v23 = vld [vmem:[#allocation5 + $0x1f8] sm:$0xff]  ;;  %v2761_v25 = vpack.c.bf16 %v92_v19, %v91_v18  ;;  %v2731_v26 = vpack.c.bf16 %v78_v21, %v77_v20  ;;  %v127_v32 = vld [vmem:[#allocation5 + $0x280] sm:$0xff] }
  0x3d   :  { %2714 = vmatpush3.bf16.xpose.msra.mxu0 %v2713_v39  ;;  %v2763_v27 = vpack.c.bf16 %v110_v23, %v109_v22  ;;  %v61_v28 = vld [vmem:[#allocation5 + $0x70] sm:$0xff]  ;;  %v62_v29 = vld [vmem:[#allocation5 + $0x78] sm:$0xff]  ;;  %v128_v33 = vld [vmem:[#allocation5 + $0x288] sm:$0xff] }
  0x3e   :  { %2746 = vmatpush3.bf16.xpose.msra.mxu1 %v2745_v40  ;;  %2716 = vmatprep.subr.bf16.mxu0 %v2715_v41  ;;  %v93_v30 = vld [vmem:[#allocation5 + $0x170] sm:$0xff]  ;;  %v94_v31 = vld [vmem:[#allocation5 + $0x178] sm:$0xff]  ;;  %v159_v34 = vld [vmem:[#allocation5 + $0x380] sm:$0xff]  ;;  %v2733_v36 = vpack.c.bf16 %v62_v29, %v61_v28  ;;  %v2767_v38 = vpack.c.bf16 %v128_v33, %v127_v32 }
  0x3f   :  { %2748 = vmatprep.subr.bf16.mxu1 %v2747_v42  ;;  %v160_v35 = vld [vmem:[#allocation5 + $0x388] sm:$0xff]  ;;  %v2765_v37 = vpack.c.bf16 %v94_v31, %v93_v30  ;;  %v111_v40 = vld [vmem:[#allocation5 + $0x200] sm:$0xff]  ;;  %v129_v44 = vld [vmem:[#allocation5 + $0x290] sm:$0xff] }
  0x40   :  { %v2799_v39 = vpack.c.bf16 %v160_v35, %v159_v34  ;;  %v112_v41 = vld [vmem:[#allocation5 + $0x208] sm:$0xff]  ;;  %v143_v42 = vld [vmem:[#allocation5 + $0x300] sm:$0xff]  ;;  %v130_v45 = vld [vmem:[#allocation5 + $0x298] sm:$0xff] }
  0x41   :  { %v144_v43 = vld [vmem:[#allocation5 + $0x308] sm:$0xff]  ;;  %v161_v47 = vld [vmem:[#allocation5 + $0x390] sm:$0xff]  ;;  %v162_v48 = vld [vmem:[#allocation5 + $0x398] sm:$0xff]  ;;  %v2769_v49 = vpack.c.bf16 %v112_v41, %v111_v40  ;;  %v2771_v51 = vpack.c.bf16 %v130_v45, %v129_v44 }
  0x42   :  { %v2801_v50 = vpack.c.bf16 %v144_v43, %v143_v42  ;;  %v146_v56 = vld [vmem:[#allocation5 + $0x318] sm:$0xff]  ;;  %v131_v57 = vld [vmem:[#allocation5 + $0x2a0] sm:$0xff]  ;;  %v132_v58 = vld [vmem:[#allocation5 + $0x2a8] sm:$0xff] }
  0x43   :  { %v163_v59 = vld [vmem:[#allocation5 + $0x3a0] sm:$0xff]  ;;  %v164_v60 = vld [vmem:[#allocation5 + $0x3a8] sm:$0xff]  ;;  %v2775_v63 = vpack.c.bf16 %v132_v58, %v131_v57  ;;  %v133_v5 = vld [vmem:[#allocation5 + $0x2b0] sm:$0xff] }
  0x44   :  { %v148_v4 = vld [vmem:[#allocation5 + $0x328] sm:$0xff]  ;;  %v134_v6 = vld [vmem:[#allocation5 + $0x2b8] sm:$0xff]  ;;  %v165_v7 = vld [vmem:[#allocation5 + $0x3b0] sm:$0xff] }
  0x45   :  { %2718 = vmatpush3.bf16.xpose.msra.mxu0 %v2717_v52  ;;  %v2803_v52 = vpack.c.bf16 %v162_v48, %v161_v47  ;;  %v166_v8 = vld [vmem:[#allocation5 + $0x3b8] sm:$0xff]  ;;  %v2779_v11 = vpack.c.bf16 %v134_v6, %v133_v5  ;;  %v135_v17 = vld [vmem:[#allocation5 + $0x2c0] sm:$0xff]  ;;  %v136_v18 = vld [vmem:[#allocation5 + $0x2c8] sm:$0xff]  ;;  %v2941_v5 = vmov 1966171168  }
  0x46   :  { %2750 = vmatpush3.bf16.xpose.msra.mxu1 %v2749_v53  ;;  %2720 = vmatprep.subr.bf16.mxu0 %v2719_v54  ;;  %v113_v53 = vld [vmem:[#allocation5 + $0x210] sm:$0xff]  ;;  %v114_v54 = vld [vmem:[#allocation5 + $0x218] sm:$0xff]  ;;  %v167_v19 = vld [vmem:[#allocation5 + $0x3c0] sm:$0xff]  ;;  %v2783_v23 = vpack.c.bf16 %v136_v18, %v135_v17  ;;  %v502_v6 = vunpack.c.l.s4 %v2941_v5 }
  0x47   :  { %2752 = vmatprep.subr.bf16.mxu1 %v2751_v55  ;;  %v145_v55 = vld [vmem:[#allocation5 + $0x310] sm:$0xff]  ;;  %v2773_v61 = vpack.c.bf16 %v114_v54, %v113_v53  ;;  %v150_v16 = vld [vmem:[#allocation5 + $0x338] sm:$0xff]  ;;  %v168_v20 = vld [vmem:[#allocation5 + $0x3c8] sm:$0xff] }
  0x48   :  { %v2805_v62 = vpack.c.bf16 %v146_v56, %v145_v55  ;;  %v152_v28 = vld [vmem:[#allocation5 + $0x348] sm:$0xff]  ;;  %v137_v29 = vld [vmem:[#allocation5 + $0x2d0] sm:$0xff]  ;;  %v138_v30 = vld [vmem:[#allocation5 + $0x2d8] sm:$0xff] }
  0x49   :  { %v169_v31 = vld [vmem:[#allocation5 + $0x3d0] sm:$0xff]  ;;  %v170_v32 = vld [vmem:[#allocation5 + $0x3d8] sm:$0xff]  ;;  %v2787_v35 = vpack.c.bf16 %v138_v30, %v137_v29  ;;  %v139_v41 = vld [vmem:[#allocation5 + $0x2e0] sm:$0xff]  ;;  %v2943_v30 = vmov -inf  }
  0x4a   :  { %v154_v40 = vld [vmem:[#allocation5 + $0x358] sm:$0xff]  ;;  %v140_v42 = vld [vmem:[#allocation5 + $0x2e8] sm:$0xff]  ;;  %v171_v43 = vld [vmem:[#allocation5 + $0x3e0] sm:$0xff] }
  0x4b   :  { %v172_v44 = vld [vmem:[#allocation5 + $0x3e8] sm:$0xff]  ;;  %v2791_v48 = vpack.c.bf16 %v140_v42, %v139_v41  ;;  %v141_v54 = vld [vmem:[#allocation5 + $0x2f0] sm:$0xff]  ;;  %v142_v55 = vld [vmem:[#allocation5 + $0x2f8] sm:$0xff]  ;;  %v2944_v41 = vmov 0  }
  0x4c   :  { %v156_v53 = vld [vmem:[#allocation5 + $0x368] sm:$0xff]  ;;  %v173_v56 = vld [vmem:[#allocation5 + $0x3f0] sm:$0xff]  ;;  %v174_v57 = vld [vmem:[#allocation5 + $0x3f8] sm:$0xff]  ;;  %v752_v42 = vcombine.low %v2944_v41, %v2944_v41 }
  0x4d   :  { %2722 = vmatpush3.bf16.xpose.msra.mxu0 %v2721_v0  ;;  %v2807_v0 = vpack.c.bf16 %v164_v60, %v163_v59  ;;  %v2795_v60 = vpack.c.bf16 %v142_v55, %v141_v54 }
  0x4e   :  { %2754 = vmatpush3.bf16.xpose.msra.mxu1 %v2753_v1  ;;  %2724 = vmatprep.subr.bf16.mxu0 %v2723_v2  ;;  %v115_v1 = vld [vmem:[#allocation5 + $0x220] sm:$0xff]  ;;  %v116_v2 = vld [vmem:[#allocation5 + $0x228] sm:$0xff] }
  0x4f   :  { %2756 = vmatprep.subr.bf16.mxu1 %v2755_v3  ;;  %v147_v3 = vld [vmem:[#allocation5 + $0x320] sm:$0xff]  ;;  %v2777_v9 = vpack.c.bf16 %v116_v2, %v115_v1  ;;  %v158_v1 = vld [vmem:[#allocation5 + $0x378] sm:$0xff] }
  0x50   :  { %v2809_v10 = vpack.c.bf16 %v148_v4, %v147_v3  ;;  %v460_v4 = vlaneseq }
  0x52   :  { %v461_v18 = vand.u32 127, %v460_v4 }
  0x55   :  { %2726 = vmatpush3.bf16.xpose.msra.mxu0 %v2725_v12  ;;  %v2811_v12 = vpack.c.bf16 %v166_v8, %v165_v7  ;;  %v503_v7 = vunpack.c.0.s8 %v502_v6  ;;  %v3015_v8 = vshrl.u32 %v460_v4, 7 }
  0x56   :  { %2758 = vmatpush3.bf16.xpose.msra.mxu1 %v2757_v13  ;;  %2728 = vmatprep.subr.bf16.mxu0 %v2727_v14  ;;  %v117_v13 = vld [vmem:[#allocation5 + $0x230] sm:$0xff]  ;;  %v118_v14 = vld [vmem:[#allocation5 + $0x238] sm:$0xff] }
  0x57   :  { %2760 = vmatprep.subr.bf16.mxu1 %v2759_v15  ;;  %v149_v15 = vld [vmem:[#allocation5 + $0x330] sm:$0xff]  ;;  %v2781_v21 = vpack.c.bf16 %v118_v14, %v117_v13  ;;  %4272 = vst [vmem:[#allocation11_spill] sm:$0xff] %v3015_v8 }
  0x58   :  { %v2813_v22 = vpack.c.bf16 %v150_v16, %v149_v15 }
  0x5d   :  { %2730 = vmatpush3.bf16.xpose.msra.mxu0 %v2729_v24  ;;  %v2815_v24 = vpack.c.bf16 %v168_v20, %v167_v19  ;;  %v462_v19 = vadd.s32 128, %v461_v18  ;;  %v463_v20 = vadd.s32 256, %v461_v18 }
  0x5e   :  { %2762 = vmatpush3.bf16.xpose.msra.mxu1 %v2761_v25  ;;  %2732 = vmatprep.subr.bf16.mxu0 %v2731_v26  ;;  %v119_v25 = vld [vmem:[#allocation5 + $0x240] sm:$0xff]  ;;  %v120_v26 = vld [vmem:[#allocation5 + $0x248] sm:$0xff] }
  0x5f   :  { %2764 = vmatprep.subr.bf16.mxu1 %v2763_v27  ;;  %v151_v27 = vld [vmem:[#allocation5 + $0x340] sm:$0xff]  ;;  %v2785_v33 = vpack.c.bf16 %v120_v26, %v119_v25  ;;  %v466_v25 = vadd.s32 640, %v461_v18  ;;  %v467_v26 = vadd.s32 768, %v461_v18  ;;  %v703_v29 = vcombine.low %v461_v18, %v462_v19 }
  0x60   :  { %v2817_v34 = vpack.c.bf16 %v152_v28, %v151_v27  ;;  %v468_v27 = vadd.s32 896, %v461_v18 }
  0x65   :  { %2734 = vmatpush3.bf16.xpose.msra.mxu0 %v2733_v36  ;;  %v2819_v36 = vpack.c.bf16 %v170_v32, %v169_v31  ;;  %v651_v31 = vcombine.low %v2943_v30, %v2943_v30 }
  0x66   :  { %2766 = vmatpush3.bf16.xpose.msra.mxu1 %v2765_v37  ;;  %2768 = vmatprep.subr.bf16.mxu0 %v2767_v38  ;;  %v121_v37 = vld [vmem:[#allocation5 + $0x250] sm:$0xff]  ;;  %v122_v38 = vld [vmem:[#allocation5 + $0x258] sm:$0xff] }
  0x67   :  { %2800 = vmatprep.subr.bf16.mxu1 %v2799_v39  ;;  %v153_v39 = vld [vmem:[#allocation5 + $0x350] sm:$0xff]  ;;  %v2789_v45 = vpack.c.bf16 %v122_v38, %v121_v37 }
  0x68   :  { %v2821_v47 = vpack.c.bf16 %v154_v40, %v153_v39 }
  0x6c   :  { %2600 = vmatmul.mubr.f32.vlgmr.msra.gmra.mrb[0].mxu0 %v3005_v46 }
  0x6d   :  { %2634 = vmatmul.mubr.f32.vlgmr.msra.gmra.mrb[0].mxu1 %v3005_v46  ;;  %2770 = vmatpush3.bf16.xpose.msra.mxu0 %v2769_v49  ;;  %v2823_v49 = vpack.c.bf16 %v172_v44, %v171_v43  ;;  %v860_v44 = vcombine.high %v2943_v30, %v2943_v30 }
  0x6e   :  { %2802 = vmatpush3.bf16.xpose.msra.mxu1 %v2801_v50  ;;  %2772 = vmatprep.subr.bf16.mxu0 %v2771_v51  ;;  %v123_v50 = vld [vmem:[#allocation5 + $0x260] sm:$0xff]  ;;  %v124_v51 = vld [vmem:[#allocation5 + $0x268] sm:$0xff] }
  0x6f   :  { %2804 = vmatprep.subr.bf16.mxu1 %v2803_v52  ;;  %2667 = vmatprep.mubr.f32.mxu0 %v3005_v46  ;;  %v155_v52 = vld [vmem:[#allocation5 + $0x360] sm:$0xff]  ;;  %v2793_v58 = vpack.c.bf16 %v124_v51, %v123_v50 }
  0x70   :  { %2701 = vmatprep.mubr.f32.mxu1 %v3005_v46  ;;  %v2825_v59 = vpack.c.bf16 %v156_v53, %v155_v52  ;;  %v479_v53 = vld [vmem:[#allocation7] sm:$0xff] }
  0x71   :  { %vm480_vm0 = vcmp.gt.f32.partialorder %v479_v53, 0.0 }
  0x75   :  { %2774 = vmatpush3.bf16.xpose.msra.mxu0 %v2773_v61  ;;  %v2827_v61 = vpack.c.bf16 %v174_v57, %v173_v56 }
  0x76   :  { %2806 = vmatpush3.bf16.xpose.msra.mxu1 %v2805_v62  ;;  %2776 = vmatprep.subr.bf16.mxu0 %v2775_v63  ;;  %v125_v62 = vld [vmem:[#allocation5 + $0x270] sm:$0xff]  ;;  %v126_v63 = vld [vmem:[#allocation5 + $0x278] sm:$0xff] }
  0x77   :  { %2808 = vmatprep.subr.bf16.mxu1 %v2807_v0  ;;  %v157_v0 = vld [vmem:[#allocation5 + $0x370] sm:$0xff]  ;;  %v2797_v2 = vpack.c.bf16 %v126_v63, %v125_v62 }
  0x78   :  { %v2829_v3 = vpack.c.bf16 %v158_v1, %v157_v0 }
  0x7d   :  { %2778 = vmatpush3.bf16.xpose.msra.mxu0 %v2777_v9 }
  0x7e   :  { %2810 = vmatpush3.bf16.xpose.msra.mxu1 %v2809_v10  ;;  %2780 = vmatprep.subr.bf16.mxu0 %v2779_v11  ;;  %v3018_v10 = vsub.s32 %v503_v7, %v3015_v8 }
  0x7f   :  { %2812 = vmatprep.subr.bf16.mxu1 %v2811_v12 }
  0x80   :  { %v661_v37 = vrot.slane %v651_v31, %v3018_v10  ;;  %v762_v50 = vrot.slane %v752_v42, %v3018_v10  ;;  %v870_v55 = vrot.slane %v860_v44, %v3018_v10 }
  0x82   :  { %v804_v51 = vcombine.high %v661_v37, %v661_v37  ;;  %v784_v0 = vcombine.low %v762_v50, %v762_v50  ;;  %v892_v6 = vcombine.low %v870_v55, %v870_v55 }
  0x84   :  { %v812_v1 = vrot.slane %v804_v51, %v3018_v10 }
  0x85   :  { %2782 = vmatpush3.bf16.xpose.msra.mxu0 %v2781_v21  ;;  %v464_v21 = vadd.s32 384, %v461_v18 }
  0x86   :  { %2814 = vmatpush3.bf16.xpose.msra.mxu1 %v2813_v22  ;;  %2784 = vmatprep.subr.bf16.mxu0 %v2783_v23  ;;  %v2942_v22 = vmov 1  }
  0x87   :  { %2816 = vmatprep.subr.bf16.mxu1 %v2815_v24  ;;  %v497_v23 = vcombine.low %v2942_v22, %v2942_v22  ;;  %v465_v24 = vadd.s32 512, %v461_v18  ;;  %v704_v32 = vcombine.low %v463_v20, %v464_v21  ;;  %v820_v18 = vcombine.low %v812_v1, %v812_v1 }
  0x88   :  { %v3051_v22 = vsub.s32 0, %v3015_v8 }
  0x89   :  { %v507_v28 = vrot.slane %v497_v23, %v3018_v10  ;;  %v720_v38 = vrot.slane %v704_v32, %v3018_v10  ;;  %v3054_v23 = vsub.s32 1, %v3015_v8 }
  0x8a   :  { %4275 = vst [vmem:[#allocation12_spill] sm:$0xff] %v3051_v22 }
  0x8b   :  { %4276 = vst [vmem:[#allocation13_spill] sm:$0xff] %v3054_v23 }
  0x8d   :  { %2786 = vmatpush3.bf16.xpose.msra.mxu0 %v2785_v33  ;;  %v705_v33 = vcombine.low %v465_v24, %v466_v25  ;;  %v900_v24 = vrot.slane %v892_v6, %v3018_v10 }
  0x8e   :  { %2818 = vmatpush3.bf16.xpose.msra.mxu1 %v2817_v34  ;;  %2788 = vmatprep.subr.bf16.mxu0 %v2787_v35  ;;  %v706_v34 = vcombine.low %v467_v26, %v468_v27  ;;  %v529_v35 = vcombine.low %v507_v28, %v507_v28  ;;  %v3059_v26 = vsub.s32 2, %v3015_v8  ;;  %v3062_v27 = vsub.s32 3, %v3015_v8 }
  0x8f   :  { %2820 = vmatprep.subr.bf16.mxu1 %v2819_v36  ;;  %v713_v36 = vrot.slane %v703_v29, %v3018_v10  ;;  %v727_v39 = vrot.slane %v705_v33, %v3018_v10 }
  0x90   :  { %v734_v40 = vrot.slane %v706_v34, %v3018_v10  ;;  %v537_v43 = vrot.slane %v529_v35, %v3018_v10  ;;  %4277 = vst [vmem:[#allocation14_spill] sm:$0xff] %v3059_v26  ;;  %4278 = vst [vmem:[#allocation15_spill] sm:$0xff] %v3062_v27  ;;  %v852_v35 = vcombine.high %v812_v1, %v812_v1 }
  0x92   :  { %v545_v54 = vcombine.low %v537_v43, %v537_v43  ;;  %v1004_v43 = vcombine.high %v900_v24, %v900_v24 }
  0x94   :  { %vm3043_vm1 = vcmp.ne.s32.totalorder %v545_v54, 0 }
  0x95   :  { %2790 = vmatpush3.bf16.xpose.msra.mxu0 %v2789_v45  ;;  %v912_v45 = vcombine.high %v2944_v41, %v2944_v41  ;;  %vm547_vm2 = vmand %vm480_vm0, %vm3043_vm1  ;;  %vm1391_vm0 = vcmask 1045504   ;;  %vm1400_vm1 = vcmask 1046528  }
  0x96   :  { %2822 = vmatpush3.bf16.xpose.msra.mxu1 %v2821_v47  ;;  %2792 = vmatprep.subr.bf16.mxu0 %v2791_v48  ;;  %v683_v47 = vcombine.low %v661_v37, %v661_v37  ;;  %v735_v48 = vcombine.low %v713_v36, %v720_v38 }
  0x97   :  { %2824 = vmatprep.subr.bf16.mxu1 %v2823_v49  ;;  %v736_v49 = vcombine.low %v727_v39, %v734_v40  ;;  %v922_v56 = vrot.slane %v912_v45, %v3018_v10  ;;  %v3086_v39 = vsub.s32 7, %v3015_v8 }
  0x99   :  { %v944_v7 = vcombine.low %v922_v56, %v922_v56  ;;  %4282 = vst [vmem:[#allocation19_spill] sm:$0xff] %v3086_v39 }
  0x9b   :  { %v952_v25 = vrot.slane %v944_v7, %v3018_v10 }
  0x9d   :  { %2794 = vmatpush3.bf16.xpose.msra.mxu0 %v2793_v58  ;;  %v960_v38 = vcombine.low %v952_v25, %v952_v25  ;;  %v1008_v44 = vcombine.high %v952_v25, %v952_v25 }
  0x9e   :  { %2826 = vmatpush3.bf16.xpose.msra.mxu1 %v2825_v59  ;;  %2796 = vmatprep.subr.bf16.mxu0 %v2795_v60  ;;  %v691_v59 = vrot.slane %v683_v47, %v3018_v10  ;;  %v743_v60 = vrot.slane %v735_v48, %v3018_v10 }
  0x9f   :  { %2828 = vmatprep.subr.bf16.mxu1 %v2827_v61  ;;  %v750_v61 = vrot.slane %v736_v49, %v3018_v10 }
  0xa0   :  { %v844_v21 = vcombine.high %v691_v59, %v691_v59 }
  0xa5   :  { %2798 = vmatpush3.bf16.xpose.msra.mxu0 %v2797_v2  ;;  %v824_v2 = vcombine.high %v762_v50, %v762_v50 }
  0xa6   :  { %2830 = vmatpush3.bf16.xpose.msra.mxu1 %v2829_v3 }
  0xa7   :  { %v832_v19 = vrot.slane %v824_v2, %v3018_v10 }
  0xa9   :  { %v840_v33 = vcombine.low %v832_v19, %v832_v19  ;;  %v856_v37 = vcombine.high %v832_v19, %v832_v19 }
  0xac   :  { %2668 = vmatmul.mubr.f32.vlgmr.msra.gmra.mrb[2].mxu0 %v3005_v46 }
  0xad   :  { %2702 = vmatmul.mubr.f32.vlgmr.msra.gmra.mrb[2].mxu1 %v3005_v46 }
 0x13f   :  { %v242_v9 = vpop.f32.mrb[0].mxu0 }
 0x140   :  { %v313_v11 = vpop.f32.mrb[0].mxu1  ;;  %v244_v12 = vpop.f32.mrb[1].mxu0 }
 0x141   :  { %v556_v13 = vcombine.low %v242_v9, %v244_v12  ;;  %v315_v14 = vpop.f32.mrb[1].mxu1  ;;  %v964_v12 = vcombine.high %v870_v55, %v870_v55 }
 0x142   :  { %v557_v15 = vcombine.low %v313_v11, %v315_v14  ;;  %v699_v11 = vcombine.low %v691_v59, %v691_v59  ;;  %v751_v14 = vcombine.low %v743_v60, %v750_v61 }
 0x143   :  { %v3021_v16 = vrot.slane %v556_v13, %v3018_v10  ;;  %v984_v13 = vcombine.high %v922_v56, %v922_v56  ;;  %v972_v30 = vrot.slane %v964_v12, %v3018_v10 }
 0x144   :  { %v3024_v46 = vrot.slane %v557_v15, %v3018_v10  ;;  %v792_v15 = vrot.slane %v784_v0, %v3018_v10 }
 0x145   :  { %v3071_v31 = vrot.slane %v984_v13, %v3018_v10  ;;  %v980_v41 = vcombine.low %v972_v30, %v972_v30  ;;  %v3090_v45 = vcombine.high %v972_v30, %v972_v30 }
 0x146   :  { %v588_v17 = vcombine.low %v3021_v16, %v3024_v46  ;;  %v800_v32 = vcombine.low %v792_v15, %v792_v15  ;;  %v848_v34 = vcombine.high %v792_v15, %v792_v15  ;;  %v3077_v16 = vsub.s32 4, %v3015_v8 }
 0x147   :  { %v3080_v46 = vsub.s32 5, %v3015_v8  ;;  %v1000_v42 = vcombine.low %v3071_v31, %v3071_v31  ;;  %4283 = vst [vmem:[#allocation20_spill] sm:$0xff] %v3090_v45  ;;  %v1016_v47 = vcombine.high %v3071_v31, %v3071_v31 }
 0x148   :  { %v596_v28 = vrot.slane %v588_v17, %v3018_v10  ;;  %4279 = vst [vmem:[#allocation16_spill] sm:$0xff] %v3077_v16  ;;  %v908_v17 = vcombine.low %v900_v24, %v900_v24 }
 0x149   :  { %4280 = vst [vmem:[#allocation17_spill] sm:$0xff] %v3080_v46 }
 0x17f   :  { %v384_v52 = vpop.f32.mrb[2].mxu0 }
 0x180   :  { %v455_v57 = vpop.f32.mrb[2].mxu1  ;;  %v386_v58 = vpop.f32.mrb[3].mxu0 }
 0x181   :  { %v558_v62 = vcombine.low %v384_v52, %v386_v58  ;;  %v457_v63 = vpop.f32.mrb[3].mxu1 }
 0x182   :  { %v559_v3 = vcombine.low %v455_v57, %v457_v63 }
 0x183   :  { %v580_v4 = vrot.slane %v558_v62, %v3018_v10 }
 0x184   :  { %v587_v9 = vrot.slane %v559_v3, %v3018_v10 }
 0x186   :  { %v589_v20 = vcombine.low %v580_v4, %v587_v9 }
 0x188   :  { %v603_v29 = vrot.slane %v589_v20, %v3018_v10  ;;  %v3083_v10 = vsub.s32 6, %v3015_v8 }
 0x18a   :  { %v604_v36 = vcombine.low %v596_v28, %v603_v29  ;;  %4281 = vst [vmem:[#allocation18_spill] sm:$0xff] %v3083_v10 }
 0x18c   :  { %v606_v40 = vsel %vm547_vm2, %v604_v36, -inf }
 0x18d   :  { %vm701_vm3 = vcmp.gt.f32.partialorder %v606_v40, %v699_v11 }
 0x18e   :  { %v3094_v48 = vsel %vm701_vm3, %v606_v40, %v699_v11  ;;  %v3096_v49 = vsel %vm701_vm3, %v751_v14, %v800_v32  ;;  %v802_v50 = vsel %vm701_vm3, %v699_v11, %v606_v40  ;;  %v803_v51 = vsel %vm701_vm3, %v800_v32, %v751_v14 }
 0x18f   :  { %4284 = vst [vmem:[#allocation21_spill] sm:$0xff] %v3094_v48  ;;  %vm822_vm4 = vcmp.gt.f32.partialorder %v802_v50, %v820_v18  ;;  %v1412_v52 = vrot.slane %v3096_v49, %v3051_v22  ;;  %v1416_v53 = vrot.slane %v3096_v49, %v3054_v23 }
 0x190   :  { %v3104_v55 = vsel %vm822_vm4, %v802_v50, %v820_v18  ;;  %v3106_v56 = vsel %vm822_vm4, %v803_v51, %v840_v33  ;;  %v842_v57 = vsel %vm822_vm4, %v820_v18, %v802_v50  ;;  %v843_v58 = vsel %vm822_vm4, %v840_v33, %v803_v51 }
 0x191   :  { %4285 = vst [vmem:[#allocation22_spill] sm:$0xff] %v3104_v55  ;;  %vm846_vm5 = vcmp.gt.f32.partialorder %v842_v57, %v844_v21  ;;  %v1444_v4 = vrot.slane %v3106_v56, %v3051_v22  ;;  %v1448_v11 = vrot.slane %v3106_v56, %v3054_v23  ;;  %v4302_v48 = vrot.slane %v3106_v56, %v3086_v39 }
 0x192   :  { %v3114_v62 = vsel %vm846_vm5, %v842_v57, %v844_v21  ;;  %v3116_v63 = vsel %vm846_vm5, %v843_v58, %v848_v34  ;;  %v850_v0 = vsel %vm846_vm5, %v844_v21, %v842_v57  ;;  %v851_v1 = vsel %vm846_vm5, %v848_v34, %v843_v58 }
 0x193   :  { %4286 = vst [vmem:[#allocation23_spill] sm:$0xff] %v3114_v62  ;;  %vm854_vm6 = vcmp.gt.f32.partialorder %v850_v0, %v852_v35  ;;  %v1665_v12 = vsel %vm1346_vm11, %v1412_v52, %v1444_v4  ;;  %v1666_v8 = vsel %vm1346_vm11, %v1416_v53, %v1448_v11  ;;  %v4295_v52 = vrot.slane %v3096_v49, %v3062_v27 }
 0x194   :  { %v3124_v5 = vsel %vm854_vm6, %v850_v0, %v852_v35  ;;  %v3126_v6 = vsel %vm854_vm6, %v851_v1, %v856_v37  ;;  %v858_v7 = vsel %vm854_vm6, %v852_v35, %v850_v0  ;;  %v859_v9 = vsel %vm854_vm6, %v856_v37, %v851_v1 }
 0x195   :  { %4287 = vst [vmem:[#allocation24_spill] sm:$0xff] %v3124_v5  ;;  %vm910_vm7 = vcmp.gt.f32.partialorder %v858_v7, %v908_v17  ;;  %v1524_v58 = vrot.slane %v3126_v6, %v3077_v16  ;;  %v1528_v0 = vrot.slane %v3126_v6, %v3080_v46  ;;  %v1532_v1 = vrot.slane %v3126_v6, %v3083_v10 }
 0x196   :  { %v3134_v14 = vsel %vm910_vm7, %v858_v7, %v908_v17  ;;  %v3136_v15 = vsel %vm910_vm7, %v859_v9, %v960_v38  ;;  %v962_v18 = vsel %vm910_vm7, %v908_v17, %v858_v7  ;;  %v963_v19 = vsel %vm910_vm7, %v960_v38, %v859_v9 }
 0x197   :  { %4288 = vst [vmem:[#allocation25_spill] sm:$0xff] %v3134_v14  ;;  %vm982_vm8 = vcmp.gt.f32.partialorder %v962_v18, %v980_v41  ;;  %v1536_v7 = vrot.slane %v3126_v6, %v3086_v39  ;;  %v1540_v9 = vrot.slane %v3136_v15, %v3051_v22  ;;  %v1564_v57 = vrot.slane %v3136_v15, %v3083_v10 }
 0x198   :  { %v3144_v25 = vsel %vm982_vm8, %v962_v18, %v980_v41  ;;  %v3146_v28 = vsel %vm982_vm8, %v963_v19, %v1000_v42  ;;  %v1002_v29 = vsel %vm982_vm8, %v980_v41, %v962_v18  ;;  %v1003_v30 = vsel %vm982_vm8, %v1000_v42, %v963_v19 }
 0x199   :  { %4289 = vst [vmem:[#allocation26_spill] sm:$0xff] %v3144_v25  ;;  %vm1006_vm9 = vcmp.gt.f32.partialorder %v1002_v29, %v1004_v43  ;;  %v1544_v18 = vrot.slane %v3136_v15, %v3054_v23  ;;  %v1548_v19 = vrot.slane %v3136_v15, %v3059_v26  ;;  %v1572_v51 = vrot.slane %v3146_v28, %v3051_v22 }
 0x19a   :  { %v3154_v34 = vsel %vm1006_vm9, %v1002_v29, %v1004_v43  ;;  %v3156_v35 = vsel %vm1006_vm9, %v1003_v30, %v1008_v44  ;;  %v3158_v36 = vsel %vm1006_vm9, %v1004_v43, %v1002_v29  ;;  %v1011_v37 = vsel %vm1006_vm9, %v1008_v44, %v1003_v30 }
 0x19b   :  { %4290 = vst [vmem:[#allocation27_spill] sm:$0xff] %v3154_v34  ;;  %4291 = vst [vmem:[#allocation28_spill] sm:$0xff] %v3158_v36  ;;  %vm1014_vm10 = vcmp.gt.f32.partialorder %v3158_v36, %v3090_v45  ;;  %v1552_v29 = vrot.slane %v3136_v15, %v3062_v27  ;;  %v1556_v30 = vrot.slane %v3136_v15, %v3077_v16 }
 0x19c   :  { %v3171_v41 = vsel %vm1014_vm10, %v1011_v37, %v1016_v47  ;;  %v1560_v37 = vrot.slane %v3136_v15, %v3080_v46  ;;  %v1568_v47 = vrot.slane %v3136_v15, %v3086_v39  ;;  %v1576_v50 = vrot.slane %v3146_v28, %v3054_v23 }
 0x19d   :  { %v1580_v44 = vrot.slane %v3146_v28, %v3059_v26  ;;  %v1584_v43 = vrot.slane %v3146_v28, %v3062_v27  ;;  %v1588_v42 = vrot.slane %v3146_v28, %v3077_v16  ;;  %v1592_v40 = vrot.slane %v3146_v28, %v3080_v46 }
 0x19e   :  { %v1596_v15 = vrot.slane %v3146_v28, %v3083_v10  ;;  %v1600_v38 = vrot.slane %v3146_v28, %v3086_v39  ;;  %v1604_v17 = vrot.slane %v3156_v35, %v3051_v22  ;;  %v1608_v33 = vrot.slane %v3156_v35, %v3054_v23 }
 0x19f   :  { %v1612_v32 = vrot.slane %v3156_v35, %v3059_v26  ;;  %v1616_v3 = vrot.slane %v3156_v35, %v3062_v27  ;;  %v1620_v31 = vrot.slane %v3156_v35, %v3077_v16  ;;  %v1624_v2 = vrot.slane %v3156_v35, %v3080_v46 }
 0x1a0   :  { %v1628_v28 = vrot.slane %v3156_v35, %v3083_v10  ;;  %v1632_v24 = vrot.slane %v3156_v35, %v3086_v39  ;;  %v1636_v61 = vrot.slane %v3171_v41, %v3051_v22  ;;  %v1640_v21 = vrot.slane %v3171_v41, %v3054_v23 }
 0x1a1   :  { %v1644_v60 = vrot.slane %v3171_v41, %v3059_v26  ;;  %v1648_v20 = vrot.slane %v3171_v41, %v3062_v27  ;;  %v1652_v59 = vrot.slane %v3171_v41, %v3077_v16  ;;  %v1656_v13 = vrot.slane %v3171_v41, %v3080_v46 }
 0x1a2   :  { %v1660_v35 = vrot.slane %v3171_v41, %v3083_v10  ;;  %v1664_v54 = vrot.slane %v3171_v41, %v3086_v39  ;;  %v4292_v34 = vrot.slane %v3106_v56, %v3059_v26  ;;  %v4293_v41 = vrot.slane %v3096_v49, %v3059_v26 }
 0x1a3   :  { %v4294_v14 = vrot.slane %v3106_v56, %v3062_v27  ;;  %v4296_v53 = vrot.slane %v3106_v56, %v3077_v16  ;;  %v4297_v11 = vrot.slane %v3096_v49, %v3077_v16  ;;  %v4304_v36 = vrot.slane %v3116_v63, %v3051_v22 }
 0x1a4   :  { %v1667_v25 = vsel %vm1346_vm11, %v4293_v41, %v4292_v34  ;;  %v4298_v34 = vrot.slane %v3106_v56, %v3080_v46  ;;  %v4299_v41 = vrot.slane %v3096_v49, %v3080_v46 }
 0x1a5   :  { %v1668_v4 = vsel %vm1346_vm11, %v4295_v52, %v4294_v14  ;;  %v1669_v5 = vsel %vm1346_vm11, %v4297_v11, %v4296_v53  ;;  %v4300_v14 = vrot.slane %v3106_v56, %v3083_v10  ;;  %v4301_v52 = vrot.slane %v3096_v49, %v3083_v10 }
 0x1a6   :  { %v1670_v62 = vsel %vm1346_vm11, %v4299_v41, %v4298_v34  ;;  %v4303_v53 = vrot.slane %v3096_v49, %v3086_v39  ;;  %v1673_v34 = vsel %vm1355_vm12, %v1665_v12, %v4304_v36  ;;  %v4305_v41 = vrot.slane %v3116_v63, %v3054_v23 }
 0x1a7   :  { %v1671_v55 = vsel %vm1346_vm11, %v4301_v52, %v4300_v14  ;;  %v4306_v14 = vrot.slane %v3116_v63, %v3059_v26  ;;  %v4307_v49 = vrot.slane %v3116_v63, %v3062_v27  ;;  %v4308_v52 = vrot.slane %v3116_v63, %v3077_v16 }
 0x1a8   :  { %v1672_v11 = vsel %vm1346_vm11, %v4303_v53, %v4302_v48  ;;  %v1674_v45 = vsel %vm1355_vm12, %v1666_v8, %v4305_v41  ;;  %v4309_v36 = vrot.slane %v3116_v63, %v3080_v46  ;;  %v4310_v53 = vrot.slane %v3116_v63, %v3083_v10 }
 0x1a9   :  { %v1675_v56 = vsel %vm1355_vm12, %v1667_v25, %v4306_v14  ;;  %v1676_v48 = vsel %vm1355_vm12, %v1668_v4, %v4307_v49  ;;  %v1677_v12 = vsel %vm1355_vm12, %v1669_v5, %v4308_v52  ;;  %v4311_v41 = vrot.slane %v3116_v63, %v3086_v39 }
 0x1aa   :  { %v1678_v8 = vsel %vm1355_vm12, %v1670_v62, %v4309_v36  ;;  %v1679_v25 = vsel %vm1355_vm12, %v1671_v55, %v4310_v53  ;;  %v4312_v14 = vrot.slane %v3126_v6, %v3051_v22  ;;  %v4313_v49 = vrot.slane %v3126_v6, %v3054_v23 }
 0x1ab   :  { %v1680_v4 = vsel %vm1355_vm12, %v1672_v11, %v4311_v41  ;;  %v4314_v52 = vrot.slane %v3126_v6, %v3059_v26  ;;  %v4315_v63 = vrot.slane %v3126_v6, %v3062_v27  ;;  %v1685_v36 = vsel %vm1364_vm13, %v1677_v12, %v1524_v58 }
 0x1ac   :  { %v1681_v5 = vsel %vm1364_vm13, %v1673_v34, %v4312_v14  ;;  %v1682_v62 = vsel %vm1364_vm13, %v1674_v45, %v4313_v49  ;;  %v1686_v53 = vsel %vm1364_vm13, %v1678_v8, %v1528_v0  ;;  %v1687_v34 = vsel %vm1364_vm13, %v1679_v25, %v1532_v1  ;;  %v4327_v25 = vld [vmem:[#allocation22_spill] sm:$0xff] }
 0x1ad   :  { %v1683_v55 = vsel %vm1364_vm13, %v1675_v56, %v4314_v52  ;;  %v1684_v11 = vsel %vm1364_vm13, %v1676_v48, %v4315_v63  ;;  %v1688_v41 = vsel %vm1364_vm13, %v1680_v4, %v1536_v7  ;;  %v1689_v45 = vsel %vm1373_vm14, %v1681_v5, %v1540_v9 }
 0x1ae   :  { %v1690_v14 = vsel %vm1373_vm14, %v1682_v62, %v1544_v18  ;;  %v1691_v49 = vsel %vm1373_vm14, %v1683_v55, %v1548_v19  ;;  %v1692_v56 = vsel %vm1373_vm14, %v1684_v11, %v1552_v29  ;;  %v1693_v6 = vsel %vm1373_vm14, %v1685_v36, %v1556_v30 }
 0x1af   :  { %v1694_v48 = vsel %vm1373_vm14, %v1686_v53, %v1560_v37  ;;  %v1695_v58 = vsel %vm1373_vm14, %v1687_v34, %v1564_v57  ;;  %v1696_v0 = vsel %vm1373_vm14, %v1688_v41, %v1568_v47  ;;  %v1697_v1 = vsel %vm1382_vm15, %v1689_v45, %v1572_v51  ;;  %v4328_v53 = vld [vmem:[#allocation23_spill] sm:$0xff] }
 0x1b0   :  { %v1698_v7 = vsel %vm1382_vm15, %v1690_v14, %v1576_v50  ;;  %v1699_v9 = vsel %vm1382_vm15, %v1691_v49, %v1580_v44  ;;  %v1700_v18 = vsel %vm1382_vm15, %v1692_v56, %v1584_v43  ;;  %v1701_v19 = vsel %vm1382_vm15, %v1693_v6, %v1588_v42 }
 0x1b1   :  { %v1702_v29 = vsel %vm1382_vm15, %v1694_v48, %v1592_v40  ;;  %v1703_v30 = vsel %vm1382_vm15, %v1695_v58, %v1596_v15  ;;  %v1704_v37 = vsel %vm1382_vm15, %v1696_v0, %v1600_v38  ;;  %v1705_v57 = vsel %vm1391_vm0, %v1697_v1, %v1604_v17  ;;  %v4329_v58 = vld [vmem:[#allocation24_spill] sm:$0xff] }
 0x1b2   :  { %v1706_v47 = vsel %vm1391_vm0, %v1698_v7, %v1608_v33  ;;  %v1707_v51 = vsel %vm1391_vm0, %v1699_v9, %v1612_v32  ;;  %v1708_v50 = vsel %vm1391_vm0, %v1700_v18, %v1616_v3  ;;  %v1709_v44 = vsel %vm1391_vm0, %v1701_v19, %v1620_v31  ;;  %v4325_v31 = vld [vmem:[#allocation28_spill] sm:$0xff] }
 0x1b3   :  { %v1710_v43 = vsel %vm1391_vm0, %v1702_v29, %v1624_v2  ;;  %v1711_v42 = vsel %vm1391_vm0, %v1703_v30, %v1628_v28  ;;  %v1712_v40 = vsel %vm1391_vm0, %v1704_v37, %v1632_v24  ;;  %v3392_v15 = vsel %vm1400_vm1, %v1705_v57, %v1636_v61  ;;  %v4330_v37 = vld [vmem:[#allocation25_spill] sm:$0xff]  ;;  %v4332_v28 = vld [vmem:[#allocation27_spill] sm:$0xff] }
 0x1b4   :  { %4316 = vst [vmem:[#allocation29_spill] sm:$0xff] %v3392_v15  ;;  %v3395_v38 = vsel %vm1400_vm1, %v1706_v47, %v1640_v21  ;;  %v3398_v33 = vsel %vm1400_vm1, %v1707_v51, %v1644_v60  ;;  %v3401_v32 = vsel %vm1400_vm1, %v1708_v50, %v1648_v20  ;;  %v3404_v3 = vsel %vm1400_vm1, %v1709_v44, %v1652_v59  ;;  %v4324_v21 = vld [vmem:[#allocation20_spill] sm:$0xff] }
 0x1b5   :  { %4317 = vst [vmem:[#allocation30_spill] sm:$0xff] %v3395_v38  ;;  %4318 = vst [vmem:[#allocation31_spill] sm:$0xff] %v3398_v33  ;;  %v3407_v2 = vsel %vm1400_vm1, %v1710_v43, %v1656_v13  ;;  %v3410_v24 = vsel %vm1400_vm1, %v1711_v42, %v1660_v35  ;;  %v3413_v61 = vsel %vm1400_vm1, %v1712_v40, %v1664_v54 }
 0x1b6   :  { %4319 = vst [vmem:[#allocation32_spill] sm:$0xff] %v3401_v32  ;;  %4320 = vst [vmem:[#allocation33_spill] sm:$0xff] %v3404_v3  ;;  %v3420_v60 = vsel %vm1014_vm10, %v4325_v31, %v4324_v21  ;;  %v1063_v4 = vrot.slane %v4327_v25, %v3051_v22  ;;  %v1067_v5 = vrot.slane %v4327_v25, %v3054_v23  ;;  %v4331_v21 = vld [vmem:[#allocation26_spill] sm:$0xff] }
 0x1b7   :  { %4321 = vst [vmem:[#allocation34_spill] sm:$0xff] %v3407_v2  ;;  %4322 = vst [vmem:[#allocation35_spill] sm:$0xff] %v3410_v24  ;;  %v1071_v62 = vrot.slane %v4327_v25, %v3059_v26  ;;  %v1075_v52 = vrot.slane %v4327_v25, %v3062_v27  ;;  %v1079_v55 = vrot.slane %v4327_v25, %v3077_v16 }
 0x1b8   :  { %4323 = vst [vmem:[#allocation36_spill] sm:$0xff] %v3413_v61  ;;  %v1083_v63 = vrot.slane %v4327_v25, %v3080_v46  ;;  %v1087_v11 = vrot.slane %v4327_v25, %v3083_v10  ;;  %v1091_v36 = vrot.slane %v4327_v25, %v3086_v39  ;;  %v1104_v34 = vrot.slane %v4328_v53, %v3051_v22 }
 0x1b9   :  { %v1108_v41 = vrot.slane %v4328_v53, %v3054_v23  ;;  %v1112_v45 = vrot.slane %v4328_v53, %v3059_v26  ;;  %v1116_v14 = vrot.slane %v4328_v53, %v3062_v27  ;;  %v1120_v49 = vrot.slane %v4328_v53, %v3077_v16 }
 0x1ba   :  { %v1124_v56 = vrot.slane %v4328_v53, %v3080_v46  ;;  %v1128_v6 = vrot.slane %v4328_v53, %v3083_v10  ;;  %v1132_v48 = vrot.slane %v4328_v53, %v3086_v39  ;;  %v1145_v0 = vrot.slane %v4329_v58, %v3051_v22 }
 0x1bb   :  { %v1149_v1 = vrot.slane %v4329_v58, %v3054_v23  ;;  %v1153_v7 = vrot.slane %v4329_v58, %v3059_v26  ;;  %v1157_v9 = vrot.slane %v4329_v58, %v3062_v27  ;;  %v1161_v18 = vrot.slane %v4329_v58, %v3077_v16 }
 0x1bc   :  { %v1165_v19 = vrot.slane %v4329_v58, %v3080_v46  ;;  %v1169_v29 = vrot.slane %v4329_v58, %v3083_v10  ;;  %v1173_v30 = vrot.slane %v4329_v58, %v3086_v39  ;;  %v1186_v57 = vrot.slane %v4330_v37, %v3051_v22 }
 0x1bd   :  { %v1190_v47 = vrot.slane %v4330_v37, %v3054_v23  ;;  %v1194_v51 = vrot.slane %v4330_v37, %v3059_v26  ;;  %v1198_v50 = vrot.slane %v4330_v37, %v3062_v27  ;;  %v1202_v44 = vrot.slane %v4330_v37, %v3077_v16 }
 0x1be   :  { %v1206_v43 = vrot.slane %v4330_v37, %v3080_v46  ;;  %v1210_v42 = vrot.slane %v4330_v37, %v3083_v10  ;;  %v1214_v40 = vrot.slane %v4330_v37, %v3086_v39  ;;  %v1227_v31 = vrot.slane %v4331_v21, %v3051_v22 }
 0x1bf   :  { %v1231_v25 = vrot.slane %v4331_v21, %v3054_v23  ;;  %v1235_v53 = vrot.slane %v4331_v21, %v3059_v26  ;;  %v1239_v58 = vrot.slane %v4331_v21, %v3062_v27  ;;  %v1243_v8 = vrot.slane %v4331_v21, %v3077_v16 }
 0x1c0   :  { %v1247_v12 = vrot.slane %v4331_v21, %v3080_v46  ;;  %v1251_v37 = vrot.slane %v4331_v21, %v3083_v10  ;;  %v1255_v35 = vrot.slane %v4331_v21, %v3086_v39  ;;  %v1268_v54 = vrot.slane %v4332_v28, %v3051_v22 }
 0x1c1   :  { %v1272_v17 = vrot.slane %v4332_v28, %v3054_v23  ;;  %v1276_v13 = vrot.slane %v4332_v28, %v3059_v26  ;;  %v1280_v59 = vrot.slane %v4332_v28, %v3062_v27  ;;  %v1284_v61 = vrot.slane %v4332_v28, %v3077_v16 }
 0x1c2   :  { %v1288_v24 = vrot.slane %v4332_v28, %v3080_v46  ;;  %v1292_v21 = vrot.slane %v4332_v28, %v3083_v10  ;;  %v1296_v2 = vrot.slane %v4332_v28, %v3086_v39  ;;  %v1309_v3 = vrot.slane %v3420_v60, %v3051_v22 }
 0x1c3   :  { %v1313_v32 = vrot.slane %v3420_v60, %v3054_v23  ;;  %v1317_v33 = vrot.slane %v3420_v60, %v3059_v26  ;;  %v1321_v38 = vrot.slane %v3420_v60, %v3062_v27  ;;  %v1325_v15 = vrot.slane %v3420_v60, %v3077_v16  ;;  %v4333_v23 = vld [vmem:[#allocation21_spill] sm:$0xff]  ;;  %v4334_v26 = vld [vmem:[#allocation12_spill] sm:$0xff] }
 0x1c4   :  { %v1329_v20 = vrot.slane %v3420_v60, %v3080_v46  ;;  %v1333_v28 = vrot.slane %v3420_v60, %v3083_v10  ;;  %v1337_v22 = vrot.slane %v3420_v60, %v3086_v39  ;;  %v4335_v27 = vrot.slane %v4333_v23, %v4334_v26  ;;  %v4336_v46 = vld [vmem:[#allocation13_spill] sm:$0xff]  ;;  %v4338_v60 = vld [vmem:[#allocation14_spill] sm:$0xff] }
 0x1c5   :  { %v4337_v10 = vrot.slane %v4333_v23, %v4336_v46  ;;  %v4339_v26 = vrot.slane %v4333_v23, %v4338_v60 }
 0x1c6   :  { %v1347_v16 = vsel %vm1346_vm11, %v4335_v27, %v1063_v4  ;;  %v4340_v27 = vld [vmem:[#allocation15_spill] sm:$0xff] }
 0x1c7   :  { %v1348_v39 = vsel %vm1346_vm11, %v4337_v10, %v1067_v5  ;;  %v1349_v4 = vsel %vm1346_vm11, %v4339_v26, %v1071_v62  ;;  %v4341_v46 = vrot.slane %v4333_v23, %v4340_v27  ;;  %v4342_v10 = vld [vmem:[#allocation16_spill] sm:$0xff]  ;;  %v4344_v62 = vld [vmem:[#allocation17_spill] sm:$0xff] }
 0x1c8   :  { %v4343_v60 = vrot.slane %v4333_v23, %v4342_v10  ;;  %v4345_v27 = vrot.slane %v4333_v23, %v4344_v62 }
 0x1c9   :  { %v1350_v5 = vsel %vm1346_vm11, %v4341_v46, %v1075_v52  ;;  %v4346_v52 = vld [vmem:[#allocation18_spill] sm:$0xff] }
 0x1ca   :  { %v1351_v26 = vsel %vm1346_vm11, %v4343_v60, %v1079_v55  ;;  %v1352_v46 = vsel %vm1346_vm11, %v4345_v27, %v1083_v63  ;;  %v4347_v10 = vrot.slane %v4333_v23, %v4346_v52  ;;  %v4348_v60 = vld [vmem:[#allocation19_spill] sm:$0xff]  ;;  %v1356_v63 = vsel %vm1355_vm12, %v1347_v16, %v1104_v34 }
 0x1cb   :  { %v4349_v62 = vrot.slane %v4333_v23, %v4348_v60  ;;  %v1357_v52 = vsel %vm1355_vm12, %v1348_v39, %v1108_v41  ;;  %v1360_v23 = vsel %vm1355_vm12, %v1351_v26, %v1120_v49  ;;  %v1361_v60 = vsel %vm1355_vm12, %v1352_v46, %v1124_v56 }
 0x1cc   :  { %v1353_v55 = vsel %vm1346_vm11, %v4347_v10, %v1087_v11  ;;  %v1358_v10 = vsel %vm1355_vm12, %v1349_v4, %v1112_v45  ;;  %v1359_v11 = vsel %vm1355_vm12, %v1350_v5, %v1116_v14  ;;  %v1365_v16 = vsel %vm1364_vm13, %v1356_v63, %v1145_v0 }
 0x1cd   :  { %v1354_v27 = vsel %vm1346_vm11, %v4349_v62, %v1091_v36  ;;  %v1362_v36 = vsel %vm1355_vm12, %v1353_v55, %v1128_v6  ;;  %v1366_v34 = vsel %vm1364_vm13, %v1357_v52, %v1149_v1  ;;  %v1367_v39 = vsel %vm1364_vm13, %v1358_v10, %v1153_v7  ;;  %v4351_v52 = vld [vmem:[#allocation30_spill] sm:$0xff] }
 0x1ce   :  { %v1363_v62 = vsel %vm1355_vm12, %v1354_v27, %v1132_v48  ;;  %v1368_v41 = vsel %vm1364_vm13, %v1359_v11, %v1157_v9  ;;  %v1369_v45 = vsel %vm1364_vm13, %v1360_v23, %v1161_v18  ;;  %v1370_v14 = vsel %vm1364_vm13, %v1361_v60, %v1165_v19  ;;  %v4350_v27 = vld [vmem:[#allocation29_spill] sm:$0xff]  ;;  %v4352_v11 = vld [vmem:[#allocation31_spill] sm:$0xff]  ;;  %v4353_v60 = vld [vmem:[#allocation32_spill] sm:$0xff] }
 0x1cf   :  { %v1371_v49 = vsel %vm1364_vm13, %v1362_v36, %v1169_v29  ;;  %v1372_v56 = vsel %vm1364_vm13, %v1363_v62, %v1173_v30  ;;  %v1374_v6 = vsel %vm1373_vm14, %v1365_v16, %v1186_v57  ;;  %v1375_v48 = vsel %vm1373_vm14, %v1366_v34, %v1190_v47  ;;  %v4354_v62 = vld [vmem:[#allocation33_spill] sm:$0xff]  ;;  %v4355_v34 = vld [vmem:[#allocation34_spill] sm:$0xff] }
 0x1d0   :  { %v1376_v0 = vsel %vm1373_vm14, %v1367_v39, %v1194_v51  ;;  %v1377_v1 = vsel %vm1373_vm14, %v1368_v41, %v1198_v50  ;;  %v1378_v7 = vsel %vm1373_vm14, %v1369_v45, %v1202_v44  ;;  %v1379_v9 = vsel %vm1373_vm14, %v1370_v14, %v1206_v43  ;;  %v4356_v41 = vld [vmem:[#allocation35_spill] sm:$0xff]  ;;  %v4357_v14 = vld [vmem:[#allocation36_spill] sm:$0xff] }
 0x1d1   :  { %v1380_v18 = vsel %vm1373_vm14, %v1371_v49, %v1210_v42  ;;  %v1381_v19 = vsel %vm1373_vm14, %v1372_v56, %v1214_v40  ;;  %v1383_v29 = vsel %vm1382_vm15, %v1374_v6, %v1227_v31  ;;  %v1384_v30 = vsel %vm1382_vm15, %v1375_v48, %v1231_v25 }
 0x1d2   :  { %v1385_v57 = vsel %vm1382_vm15, %v1376_v0, %v1235_v53  ;;  %v1386_v47 = vsel %vm1382_vm15, %v1377_v1, %v1239_v58  ;;  %v1387_v51 = vsel %vm1382_vm15, %v1378_v7, %v1243_v8  ;;  %v1388_v50 = vsel %vm1382_vm15, %v1379_v9, %v1247_v12 }
 0x1d3   :  { %v1389_v44 = vsel %vm1382_vm15, %v1380_v18, %v1251_v37  ;;  %v1390_v43 = vsel %vm1382_vm15, %v1381_v19, %v1255_v35  ;;  %v1392_v42 = vsel %vm1391_vm0, %v1383_v29, %v1268_v54  ;;  %v1393_v40 = vsel %vm1391_vm0, %v1384_v30, %v1272_v17 }
 0x1d4   :  { %v1394_v31 = vsel %vm1391_vm0, %v1385_v57, %v1276_v13  ;;  %v1395_v25 = vsel %vm1391_vm0, %v1386_v47, %v1280_v59  ;;  %v1396_v53 = vsel %vm1391_vm0, %v1387_v51, %v1284_v61  ;;  %v1397_v58 = vsel %vm1391_vm0, %v1388_v50, %v1288_v24 }
 0x1d5   :  { %v1398_v8 = vsel %vm1391_vm0, %v1389_v44, %v1292_v21  ;;  %v1399_v12 = vsel %vm1391_vm0, %v1390_v43, %v1296_v2  ;;  %v3623_v37 = vsel %vm1400_vm1, %v1392_v42, %v1309_v3  ;;  %v3626_v35 = vsel %vm1400_vm1, %v1393_v40, %v1313_v32 }
 0x1d6   :  { %v3629_v17 = vsel %vm1400_vm1, %v1394_v31, %v1317_v33  ;;  %v3632_v13 = vsel %vm1400_vm1, %v1395_v25, %v1321_v38  ;;  %v3635_v61 = vsel %vm1400_vm1, %v1396_v53, %v1325_v15  ;;  %v3638_v24 = vsel %vm1400_vm1, %v1397_v58, %v1329_v20 }
 0x1d7   :  { %v3641_v2 = vsel %vm1400_vm1, %v1398_v8, %v1333_v28  ;;  %v3644_v3 = vsel %vm1400_vm1, %v1399_v12, %v1337_v22  ;;  %v1741_v32 = vmax.f32 %v3623_v37, %v3635_v61  ;;  %v1742_v33 = vmax.f32 %v3626_v35, %v3638_v24 }
 0x1d8   :  { %v1743_v38 = vmax.f32 %v3629_v17, %v3641_v2  ;;  %v1744_v15 = vmax.f32 %v3632_v13, %v3644_v3 }
 0x1d9   :  { %v1745_v20 = vmax.f32 %v1741_v32, %v1742_v33 }
 0x1da   :  { %v1746_v59 = vmax.f32 %v1743_v38, %v1744_v15 }
 0x1dc   :  { %v1747_v54 = vmax.f32 %v1745_v20, %v1746_v59 }
 0x1de   :  { %1748 = vmax.xlane.f32.xlu0 %v1747_v54 }
 0x26b   :  { %v1749_v21 = vpop.xlane.xlu0 %1748 }
 0x26c   :  { %v1750_v28 = vrot.slane %v1749_v21, 4 }
 0x26e   :  { %v1751_v22 = vmax.f32 %v1749_v21, %v1750_v28 }
 0x270   :  { %v1752_v4 = vrot.slane %v1751_v22, 2 }
 0x272   :  { %v1753_v5 = vmax.f32 %v1751_v22, %v1752_v4 }
 0x274   :  { %v1754_v26 = vrot.slane %v1753_v5, 1 }
 0x276   :  { %v1755_v46 = vmax.f32 %v1753_v5, %v1754_v26 }
 0x278   :  { %2831 = vpush %v1755_v46 }
 0x2a9   :  { %s3654_s2 = spop %2831 }
 0x2aa   :  { %v3657_v55 = vstv %s3654_s2 }
 0x2ab   :  { %vm1758_vm2 = vcmp.eq.f32.partialorder %v3623_v37, %v3657_v55  ;;  %vm1759_vm3 = vcmp.eq.f32.partialorder %v3626_v35, %v3657_v55  ;;  %vm1760_vm4 = vcmp.eq.f32.partialorder %v3629_v17, %v3657_v55  ;;  %vm1761_vm5 = vcmp.eq.f32.partialorder %v3632_v13, %v3657_v55 }
 0x2ac   :  { %vm1762_vm6 = vcmp.eq.f32.partialorder %v3635_v61, %v3657_v55  ;;  %vm1763_vm7 = vcmp.eq.f32.partialorder %v3638_v24, %v3657_v55  ;;  %vm1764_vm8 = vcmp.eq.f32.partialorder %v3641_v2, %v3657_v55  ;;  %vm1765_vm9 = vcmp.eq.f32.partialorder %v3644_v3, %v3657_v55 }
 0x2ad   :  { %v1766_v63 = vsel %vm1758_vm2, %v4350_v27, 2147483647  ;;  %v1767_v10 = vsel %vm1759_vm3, %v4351_v52, 2147483647  ;;  %v1768_v23 = vsel %vm1760_vm4, %v4352_v11, 2147483647 }
 0x2ae   :  { %v1769_v36 = vsel %vm1761_vm5, %v4353_v60, 2147483647  ;;  %v1770_v16 = vsel %vm1762_vm6, %v4354_v62, 2147483647  ;;  %v1771_v39 = vsel %vm1763_vm7, %v4355_v34, 2147483647 }
 0x2af   :  { %v1772_v45 = vsel %vm1764_vm8, %v4356_v41, 2147483647  ;;  %v1773_v49 = vsel %vm1765_vm9, %v4357_v14, 2147483647  ;;  %vm1774_vm10 = vcmp.lt.s32.totalorder %v1766_v63, %v1770_v16  ;;  %vm1776_vm11 = vcmp.lt.s32.totalorder %v1767_v10, %v1771_v39 }
 0x2b0   :  { %v1775_v56 = vsel %vm1774_vm10, %v1766_v63, %v1770_v16  ;;  %vm1778_vm12 = vcmp.lt.s32.totalorder %v1768_v23, %v1772_v45  ;;  %vm1780_vm13 = vcmp.lt.s32.totalorder %v1769_v36, %v1773_v49  ;;  %v1777_v6 = vsel %vm1776_vm11, %v1767_v10, %v1771_v39 }
 0x2b1   :  { %v1779_v48 = vsel %vm1778_vm12, %v1768_v23, %v1772_v45  ;;  %v1781_v0 = vsel %vm1780_vm13, %v1769_v36, %v1773_v49  ;;  %vm1782_vm14 = vcmp.lt.s32.totalorder %v1775_v56, %v1777_v6 }
 0x2b2   :  { %vm1784_vm15 = vcmp.lt.s32.totalorder %v1779_v48, %v1781_v0  ;;  %v1783_v1 = vsel %vm1782_vm14, %v1775_v56, %v1777_v6 }
 0x2b3   :  { %v1785_v7 = vsel %vm1784_vm15, %v1779_v48, %v1781_v0 }
 0x2b4   :  { %vm1786_vm0 = vcmp.lt.s32.totalorder %v1783_v1, %v1785_v7 }
 0x2b5   :  { %v1787_v9 = vsel %vm1786_vm0, %v1783_v1, %v1785_v7 }
 0x2b6   :  { %v1789_v18 = vshra.s32 %v1787_v9, 16  ;;  %v1788_v29 = vand.u32 65535, %v1787_v9 }
 0x2b8   :  { %v1791_v19 = vcvt.s32.f32 %v1789_v18  ;;  %v1790_v57 = vcvt.s32.f32 %v1788_v29 }
 0x2ba   :  { %1792 = vmin.xlane.f32.xlu0 %v1791_v19 }
 0x347   :  { %v1793_v30 = vpop.xlane.xlu0 %1792 }
 0x348   :  { %vm1794_vm1 = vcmp.eq.f32.partialorder %v1791_v19, %v1793_v30  ;;  %v1799_v51 = vcvt.f32.s32 %v1793_v30 }
 0x349   :  { %v1795_v47 = vsel %vm1794_vm1, %v1790_v57, inf }
 0x34a   :  { %1796 = vmin.xlane.f32.xlu1 %v1795_v47  ;;  %v1800_v44 = vshll.u32 %v1799_v51, 16 }
 0x3d7   :  { %v1797_v50 = vpop.xlane.xlu1 %1796 }
 0x3d8   :  { %v1798_v43 = vcvt.f32.s32 %v1797_v50 }
 0x3da   :  { %v1801_v42 = vadd.s32 %v1800_v44, %v1798_v43 }
 0x3dc   :  { %v1802_v40 = vrot.slane %v1801_v42, 4 }
 0x3de   :  { %vm1803_vm2 = vcmp.lt.s32.totalorder %v1801_v42, %v1802_v40 }
 0x3df   :  { %v1804_v31 = vsel %vm1803_vm2, %v1801_v42, %v1802_v40 }
 0x3e0   :  { %v1805_v25 = vrot.slane %v1804_v31, 2 }
 0x3e2   :  { %vm1806_vm3 = vcmp.lt.s32.totalorder %v1804_v31, %v1805_v25 }
 0x3e3   :  { %v1807_v53 = vsel %vm1806_vm3, %v1804_v31, %v1805_v25 }
 0x3e4   :  { %v1808_v58 = vrot.slane %v1807_v53, 1 }
 0x3e6   :  { %vm1809_vm4 = vcmp.lt.s32.totalorder %v1807_v53, %v1808_v58 }
 0x3e7   :  { %v1810_v8 = vsel %vm1809_vm4, %v1807_v53, %v1808_v58 }
 0x3e8   :  { %2833 = vpush %v1810_v8 }
 0x419   :  { %s3683_s20 = spop %2833 }
 0x41a   :  { %v3686_v12 = vstv %s3683_s20 }
 0x41b   :  { %vm1813_vm5 = vcmp.eq.s32.totalorder %v4350_v27, %v3686_v12  ;;  %vm1814_vm6 = vcmp.eq.s32.totalorder %v4351_v52, %v3686_v12  ;;  %vm1815_vm7 = vcmp.eq.s32.totalorder %v4352_v11, %v3686_v12  ;;  %vm1816_vm8 = vcmp.eq.s32.totalorder %v4353_v60, %v3686_v12 }
 0x41c   :  { %vm1817_vm9 = vcmp.eq.s32.totalorder %v4354_v62, %v3686_v12  ;;  %vm1818_vm10 = vcmp.eq.s32.totalorder %v4355_v34, %v3686_v12  ;;  %vm1819_vm11 = vcmp.eq.s32.totalorder %v4356_v41, %v3686_v12  ;;  %vm1820_vm12 = vcmp.eq.s32.totalorder %v4357_v14, %v3686_v12 }
 0x41d   :  { %v3705_v32 = vsel %vm1813_vm5, -inf, %v3623_v37  ;;  %v3708_v33 = vsel %vm1814_vm6, -inf, %v3626_v35  ;;  %v3711_v38 = vsel %vm1815_vm7, -inf, %v3629_v17  ;;  %v3714_v15 = vsel %vm1816_vm8, -inf, %v3632_v13 }
 0x41e   :  { %v3717_v20 = vsel %vm1817_vm9, -inf, %v3635_v61  ;;  %v3720_v59 = vsel %vm1818_vm10, -inf, %v3638_v24  ;;  %v3723_v54 = vsel %vm1819_vm11, -inf, %v3641_v2  ;;  %v3726_v37 = vsel %vm1820_vm12, -inf, %v3644_v3 }
 0x41f   :  { %v1829_v35 = vmax.f32 %v3705_v32, %v3717_v20  ;;  %v1830_v17 = vmax.f32 %v3708_v33, %v3720_v59  ;;  %v1831_v13 = vmax.f32 %v3711_v38, %v3723_v54  ;;  %v1832_v61 = vmax.f32 %v3714_v15, %v3726_v37 }
 0x421   :  { %v1833_v24 = vmax.f32 %v1829_v35, %v1830_v17  ;;  %v1834_v21 = vmax.f32 %v1831_v13, %v1832_v61 }
 0x423   :  { %v1835_v28 = vmax.f32 %v1833_v24, %v1834_v21 }
 0x425   :  { %1836 = vmax.xlane.f32.xlu1 %v1835_v28 }
 0x4b2   :  { %v1837_v2 = vpop.xlane.xlu1 %1836 }
 0x4b3   :  { %v1838_v22 = vrot.slane %v1837_v2, 4 }
 0x4b5   :  { %v1839_v3 = vmax.f32 %v1837_v2, %v1838_v22 }
 0x4b7   :  { %v1840_v4 = vrot.slane %v1839_v3, 2 }
 0x4b9   :  { %v1841_v5 = vmax.f32 %v1839_v3, %v1840_v4 }
 0x4bb   :  { %v1842_v26 = vrot.slane %v1841_v5, 1 }
 0x4bd   :  { %v1843_v46 = vmax.f32 %v1841_v5, %v1842_v26 }
 0x4bf   :  { %2835 = vpush %v1843_v46 }
 0x4f0   :  { %s3736_s21 = spop %2835 }
 0x4f1   :  { %v1845_v63 = vstv %s3736_s21  ;;  %p2442_p2 = scmp.gt.f32.partialorder %s3736_s21, -inf }
 0x4f2   :  { %vm1846_vm13 = vcmp.eq.f32.partialorder %v3705_v32, %v1845_v63  ;;  %vm1847_vm14 = vcmp.eq.f32.partialorder %v3708_v33, %v1845_v63  ;;  %vm1848_vm15 = vcmp.eq.f32.partialorder %v3711_v38, %v1845_v63  ;;  %vm1849_vm0 = vcmp.eq.f32.partialorder %v3714_v15, %v1845_v63 }
 0x4f3   :  { %vm1850_vm1 = vcmp.eq.f32.partialorder %v3717_v20, %v1845_v63  ;;  %vm1851_vm2 = vcmp.eq.f32.partialorder %v3720_v59, %v1845_v63  ;;  %vm1852_vm3 = vcmp.eq.f32.partialorder %v3723_v54, %v1845_v63  ;;  %vm1853_vm4 = vcmp.eq.f32.partialorder %v3726_v37, %v1845_v63  ;;  %s2444_s7 = scalar_select %p2442_p2, %s3736_s21, %s3654_s2 }
 0x4f4   :  { %v1854_v10 = vsel %vm1846_vm13, %v4350_v27, 2147483647  ;;  %v1855_v23 = vsel %vm1847_vm14, %v4351_v52, 2147483647  ;;  %v1856_v36 = vsel %vm1848_vm15, %v4352_v11, 2147483647 }
 0x4f5   :  { %v1857_v16 = vsel %vm1849_vm0, %v4353_v60, 2147483647  ;;  %v1858_v39 = vsel %vm1850_vm1, %v4354_v62, 2147483647  ;;  %v1859_v45 = vsel %vm1851_vm2, %v4355_v34, 2147483647 }
 0x4f6   :  { %v1860_v49 = vsel %vm1852_vm3, %v4356_v41, 2147483647  ;;  %v1861_v56 = vsel %vm1853_vm4, %v4357_v14, 2147483647  ;;  %vm1862_vm5 = vcmp.lt.s32.totalorder %v1854_v10, %v1858_v39  ;;  %vm1864_vm6 = vcmp.lt.s32.totalorder %v1855_v23, %v1859_v45 }
 0x4f7   :  { %v1863_v6 = vsel %vm1862_vm5, %v1854_v10, %v1858_v39  ;;  %vm1866_vm7 = vcmp.lt.s32.totalorder %v1856_v36, %v1860_v49  ;;  %vm1868_vm8 = vcmp.lt.s32.totalorder %v1857_v16, %v1861_v56  ;;  %v1865_v48 = vsel %vm1864_vm6, %v1855_v23, %v1859_v45 }
 0x4f8   :  { %v1867_v0 = vsel %vm1866_vm7, %v1856_v36, %v1860_v49  ;;  %v1869_v1 = vsel %vm1868_vm8, %v1857_v16, %v1861_v56  ;;  %vm1870_vm9 = vcmp.lt.s32.totalorder %v1863_v6, %v1865_v48 }
 0x4f9   :  { %vm1872_vm10 = vcmp.lt.s32.totalorder %v1867_v0, %v1869_v1  ;;  %v1871_v7 = vsel %vm1870_vm9, %v1863_v6, %v1865_v48 }
 0x4fa   :  { %v1873_v9 = vsel %vm1872_vm10, %v1867_v0, %v1869_v1 }
 0x4fb   :  { %vm1874_vm11 = vcmp.lt.s32.totalorder %v1871_v7, %v1873_v9 }
 0x4fc   :  { %v1875_v18 = vsel %vm1874_vm11, %v1871_v7, %v1873_v9 }
 0x4fd   :  { %v1877_v19 = vshra.s32 %v1875_v18, 16  ;;  %v1876_v30 = vand.u32 65535, %v1875_v18 }
 0x4ff   :  { %v1879_v29 = vcvt.s32.f32 %v1877_v19  ;;  %v1878_v47 = vcvt.s32.f32 %v1876_v30 }
 0x501   :  { %1880 = vmin.xlane.f32.xlu0 %v1879_v29 }
 0x58e   :  { %v1881_v57 = vpop.xlane.xlu0 %1880 }
 0x58f   :  { %vm1882_vm12 = vcmp.eq.f32.partialorder %v1879_v29, %v1881_v57  ;;  %v1887_v50 = vcvt.f32.s32 %v1881_v57 }
 0x590   :  { %v1883_v51 = vsel %vm1882_vm12, %v1878_v47, inf }
 0x591   :  { %1884 = vmin.xlane.f32.xlu1 %v1883_v51  ;;  %v1888_v43 = vshll.u32 %v1887_v50, 16 }
 0x61e   :  { %v1885_v44 = vpop.xlane.xlu1 %1884 }
 0x61f   :  { %v1886_v42 = vcvt.f32.s32 %v1885_v44 }
 0x621   :  { %v1889_v40 = vadd.s32 %v1888_v43, %v1886_v42 }
 0x623   :  { %v1890_v31 = vrot.slane %v1889_v40, 4 }
 0x625   :  { %vm1891_vm13 = vcmp.lt.s32.totalorder %v1889_v40, %v1890_v31 }
 0x626   :  { %v1892_v25 = vsel %vm1891_vm13, %v1889_v40, %v1890_v31 }
 0x627   :  { %v1893_v53 = vrot.slane %v1892_v25, 2 }
 0x629   :  { %vm1894_vm14 = vcmp.lt.s32.totalorder %v1892_v25, %v1893_v53 }
 0x62a   :  { %v1895_v58 = vsel %vm1894_vm14, %v1892_v25, %v1893_v53 }
 0x62b   :  { %v1896_v8 = vrot.slane %v1895_v58, 1 }
 0x62d   :  { %vm1897_vm15 = vcmp.lt.s32.totalorder %v1895_v58, %v1896_v8 }
 0x62e   :  { %v1898_v35 = vsel %vm1897_vm15, %v1895_v58, %v1896_v8 }
 0x62f   :  { %2837 = vpush %v1898_v35 }
 0x660   :  { %s3755_s22 = spop %2837 }
 0x661   :  { %v1900_v17 = vstv %s3755_s22  ;;  %s4361_s22 = smov (!%p2442_p2, %s3755_s22), %s3683_s20 }
 0x662   :  { %vm1901_vm0 = vcmp.eq.s32.totalorder %v4350_v27, %v1900_v17  ;;  %vm1902_vm1 = vcmp.eq.s32.totalorder %v4351_v52, %v1900_v17  ;;  %vm1903_vm2 = vcmp.eq.s32.totalorder %v4352_v11, %v1900_v17  ;;  %vm1904_vm3 = vcmp.eq.s32.totalorder %v4353_v60, %v1900_v17 }
 0x663   :  { %vm1905_vm4 = vcmp.eq.s32.totalorder %v4354_v62, %v1900_v17  ;;  %vm1906_vm5 = vcmp.eq.s32.totalorder %v4355_v34, %v1900_v17  ;;  %vm1907_vm6 = vcmp.eq.s32.totalorder %v4356_v41, %v1900_v17  ;;  %vm1908_vm7 = vcmp.eq.s32.totalorder %v4357_v14, %v1900_v17 }
 0x664   :  { %v3767_v13 = vsel %vm1901_vm0, -inf, %v3705_v32  ;;  %v3770_v61 = vsel %vm1902_vm1, -inf, %v3708_v33  ;;  %v3773_v24 = vsel %vm1903_vm2, -inf, %v3711_v38  ;;  %v3776_v21 = vsel %vm1904_vm3, -inf, %v3714_v15 }
 0x665   :  { %v3779_v28 = vsel %vm1905_vm4, -inf, %v3717_v20  ;;  %v3782_v2 = vsel %vm1906_vm5, -inf, %v3720_v59  ;;  %v3785_v22 = vsel %vm1907_vm6, -inf, %v3723_v54  ;;  %v3788_v32 = vsel %vm1908_vm7, -inf, %v3726_v37 }
 0x666   :  { %v1917_v33 = vmax.f32 %v3767_v13, %v3779_v28  ;;  %v1918_v38 = vmax.f32 %v3770_v61, %v3782_v2  ;;  %v1919_v15 = vmax.f32 %v3773_v24, %v3785_v22  ;;  %v1920_v20 = vmax.f32 %v3776_v21, %v3788_v32 }
 0x668   :  { %v1921_v59 = vmax.f32 %v1917_v33, %v1918_v38  ;;  %v1922_v3 = vmax.f32 %v1919_v15, %v1920_v20 }
 0x66a   :  { %v1923_v4 = vmax.f32 %v1921_v59, %v1922_v3 }
 0x66c   :  { %1924 = vmax.xlane.f32.xlu0 %v1923_v4 }
 0x6f9   :  { %v1925_v54 = vpop.xlane.xlu0 %1924 }
 0x6fa   :  { %v1926_v5 = vrot.slane %v1925_v54, 4 }
 0x6fc   :  { %v1927_v37 = vmax.f32 %v1925_v54, %v1926_v5 }
 0x6fe   :  { %v1928_v26 = vrot.slane %v1927_v37, 2 }
 0x700   :  { %v1929_v46 = vmax.f32 %v1927_v37, %v1928_v26 }
 0x702   :  { %v1930_v63 = vrot.slane %v1929_v46, 1 }
 0x704   :  { %v1931_v10 = vmax.f32 %v1929_v46, %v1930_v63 }
 0x706   :  { %2839 = vpush %v1931_v10 }
 0x737   :  { %s3798_s23 = spop %2839 }
 0x738   :  { %v1933_v23 = vstv %s3798_s23  ;;  %p2458_p3 = scmp.gt.f32.partialorder %s3798_s23, -inf }
 0x739   :  { %vm1934_vm8 = vcmp.eq.f32.partialorder %v3767_v13, %v1933_v23  ;;  %vm1935_vm9 = vcmp.eq.f32.partialorder %v3770_v61, %v1933_v23  ;;  %vm1936_vm10 = vcmp.eq.f32.partialorder %v3773_v24, %v1933_v23  ;;  %vm1937_vm11 = vcmp.eq.f32.partialorder %v3776_v21, %v1933_v23 }
 0x73a   :  { %vm1938_vm12 = vcmp.eq.f32.partialorder %v3779_v28, %v1933_v23  ;;  %vm1939_vm13 = vcmp.eq.f32.partialorder %v3782_v2, %v1933_v23  ;;  %vm1940_vm14 = vcmp.eq.f32.partialorder %v3785_v22, %v1933_v23  ;;  %vm1941_vm15 = vcmp.eq.f32.partialorder %v3788_v32, %v1933_v23  ;;  %s2460_s8 = scalar_select %p2458_p3, %s3798_s23, %s2444_s7 }
 0x73b   :  { %v1942_v36 = vsel %vm1934_vm8, %v4350_v27, 2147483647  ;;  %v1943_v16 = vsel %vm1935_vm9, %v4351_v52, 2147483647  ;;  %v1944_v39 = vsel %vm1936_vm10, %v4352_v11, 2147483647 }
 0x73c   :  { %v1945_v45 = vsel %vm1937_vm11, %v4353_v60, 2147483647  ;;  %v1946_v49 = vsel %vm1938_vm12, %v4354_v62, 2147483647  ;;  %v1947_v56 = vsel %vm1939_vm13, %v4355_v34, 2147483647 }
 0x73d   :  { %v1948_v6 = vsel %vm1940_vm14, %v4356_v41, 2147483647  ;;  %v1949_v48 = vsel %vm1941_vm15, %v4357_v14, 2147483647  ;;  %vm1950_vm0 = vcmp.lt.s32.totalorder %v1942_v36, %v1946_v49  ;;  %vm1952_vm1 = vcmp.lt.s32.totalorder %v1943_v16, %v1947_v56 }
 0x73e   :  { %v1951_v0 = vsel %vm1950_vm0, %v1942_v36, %v1946_v49  ;;  %vm1954_vm2 = vcmp.lt.s32.totalorder %v1944_v39, %v1948_v6  ;;  %vm1956_vm3 = vcmp.lt.s32.totalorder %v1945_v45, %v1949_v48  ;;  %v1953_v1 = vsel %vm1952_vm1, %v1943_v16, %v1947_v56 }
 0x73f   :  { %v1955_v7 = vsel %vm1954_vm2, %v1944_v39, %v1948_v6  ;;  %v1957_v9 = vsel %vm1956_vm3, %v1945_v45, %v1949_v48  ;;  %vm1958_vm4 = vcmp.lt.s32.totalorder %v1951_v0, %v1953_v1 }
 0x740   :  { %vm1960_vm5 = vcmp.lt.s32.totalorder %v1955_v7, %v1957_v9  ;;  %v1959_v18 = vsel %vm1958_vm4, %v1951_v0, %v1953_v1 }
 0x741   :  { %v1961_v19 = vsel %vm1960_vm5, %v1955_v7, %v1957_v9 }
 0x742   :  { %vm1962_vm6 = vcmp.lt.s32.totalorder %v1959_v18, %v1961_v19 }
 0x743   :  { %v1963_v29 = vsel %vm1962_vm6, %v1959_v18, %v1961_v19 }
 0x744   :  { %v1965_v30 = vshra.s32 %v1963_v29, 16  ;;  %v1964_v47 = vand.u32 65535, %v1963_v29 }
 0x746   :  { %v1967_v57 = vcvt.s32.f32 %v1965_v30  ;;  %v1966_v50 = vcvt.s32.f32 %v1964_v47 }
 0x748   :  { %1968 = vmin.xlane.f32.xlu1 %v1967_v57 }
 0x7d5   :  { %v1969_v51 = vpop.xlane.xlu1 %1968 }
 0x7d6   :  { %vm1970_vm7 = vcmp.eq.f32.partialorder %v1967_v57, %v1969_v51  ;;  %v1975_v43 = vcvt.f32.s32 %v1969_v51 }
 0x7d7   :  { %v1971_v44 = vsel %vm1970_vm7, %v1966_v50, inf }
 0x7d8   :  { %1972 = vmin.xlane.f32.xlu0 %v1971_v44  ;;  %v1976_v40 = vshll.u32 %v1975_v43, 16 }
 0x865   :  { %v1973_v42 = vpop.xlane.xlu0 %1972 }
 0x866   :  { %v1974_v31 = vcvt.f32.s32 %v1973_v42 }
 0x868   :  { %v1977_v25 = vadd.s32 %v1976_v40, %v1974_v31 }
 0x86a   :  { %v1978_v53 = vrot.slane %v1977_v25, 4 }
 0x86c   :  { %vm1979_vm8 = vcmp.lt.s32.totalorder %v1977_v25, %v1978_v53 }
 0x86d   :  { %v1980_v58 = vsel %vm1979_vm8, %v1977_v25, %v1978_v53 }
 0x86e   :  { %v1981_v8 = vrot.slane %v1980_v58, 2 }
 0x870   :  { %vm1982_vm9 = vcmp.lt.s32.totalorder %v1980_v58, %v1981_v8 }
 0x871   :  { %v1983_v35 = vsel %vm1982_vm9, %v1980_v58, %v1981_v8 }
 0x872   :  { %v1984_v17 = vrot.slane %v1983_v35, 1 }
 0x874   :  { %vm1985_vm10 = vcmp.lt.s32.totalorder %v1983_v35, %v1984_v17 }
 0x875   :  { %v1986_v33 = vsel %vm1985_vm10, %v1983_v35, %v1984_v17 }
 0x876   :  { %2841 = vpush %v1986_v33 }
 0x8a7   :  { %s3817_s24 = spop %2841 }
 0x8a8   :  { %v1988_v38 = vstv %s3817_s24  ;;  %s4363_s24 = smov (!%p2458_p3, %s3817_s24), %s4361_s22 }
 0x8a9   :  { %vm1989_vm11 = vcmp.eq.s32.totalorder %v4350_v27, %v1988_v38  ;;  %vm1990_vm12 = vcmp.eq.s32.totalorder %v4351_v52, %v1988_v38  ;;  %vm1991_vm13 = vcmp.eq.s32.totalorder %v4352_v11, %v1988_v38  ;;  %vm1992_vm14 = vcmp.eq.s32.totalorder %v4353_v60, %v1988_v38 }
 0x8aa   :  { %vm1993_vm15 = vcmp.eq.s32.totalorder %v4354_v62, %v1988_v38  ;;  %vm1994_vm0 = vcmp.eq.s32.totalorder %v4355_v34, %v1988_v38  ;;  %vm1995_vm1 = vcmp.eq.s32.totalorder %v4356_v41, %v1988_v38  ;;  %vm1996_vm2 = vcmp.eq.s32.totalorder %v4357_v14, %v1988_v38 }
 0x8ab   :  { %v3829_v15 = vsel %vm1989_vm11, -inf, %v3767_v13  ;;  %v3832_v20 = vsel %vm1990_vm12, -inf, %v3770_v61  ;;  %v3835_v59 = vsel %vm1991_vm13, -inf, %v3773_v24  ;;  %v3838_v3 = vsel %vm1992_vm14, -inf, %v3776_v21 }
 0x8ac   :  { %v3841_v4 = vsel %vm1993_vm15, -inf, %v3779_v28  ;;  %v3844_v54 = vsel %vm1994_vm0, -inf, %v3782_v2  ;;  %v3847_v5 = vsel %vm1995_vm1, -inf, %v3785_v22  ;;  %v3850_v13 = vsel %vm1996_vm2, -inf, %v3788_v32 }
 0x8ad   :  { %v2005_v61 = vmax.f32 %v3829_v15, %v3841_v4  ;;  %v2006_v24 = vmax.f32 %v3832_v20, %v3844_v54  ;;  %v2007_v21 = vmax.f32 %v3835_v59, %v3847_v5  ;;  %v2008_v28 = vmax.f32 %v3838_v3, %v3850_v13 }
 0x8af   :  { %v2009_v2 = vmax.f32 %v2005_v61, %v2006_v24  ;;  %v2010_v37 = vmax.f32 %v2007_v21, %v2008_v28 }
 0x8b1   :  { %v2011_v26 = vmax.f32 %v2009_v2, %v2010_v37 }
 0x8b3   :  { %2012 = vmax.xlane.f32.xlu1 %v2011_v26 }
 0x940   :  { %v2013_v22 = vpop.xlane.xlu1 %2012 }
 0x941   :  { %v2014_v46 = vrot.slane %v2013_v22, 4 }
 0x943   :  { %v2015_v32 = vmax.f32 %v2013_v22, %v2014_v46 }
 0x945   :  { %v2016_v63 = vrot.slane %v2015_v32, 2 }
 0x947   :  { %v2017_v10 = vmax.f32 %v2015_v32, %v2016_v63 }
 0x949   :  { %v2018_v23 = vrot.slane %v2017_v10, 1 }
 0x94b   :  { %v2019_v36 = vmax.f32 %v2017_v10, %v2018_v23 }
 0x94d   :  { %2843 = vpush %v2019_v36 }
 0x97e   :  { %s3860_s25 = spop %2843 }
 0x97f   :  { %v2021_v16 = vstv %s3860_s25  ;;  %p2474_p4 = scmp.gt.f32.partialorder %s3860_s25, -inf }
 0x980   :  { %vm2022_vm3 = vcmp.eq.f32.partialorder %v3829_v15, %v2021_v16  ;;  %vm2023_vm4 = vcmp.eq.f32.partialorder %v3832_v20, %v2021_v16  ;;  %vm2024_vm5 = vcmp.eq.f32.partialorder %v3835_v59, %v2021_v16  ;;  %vm2025_vm6 = vcmp.eq.f32.partialorder %v3838_v3, %v2021_v16 }
 0x981   :  { %vm2026_vm7 = vcmp.eq.f32.partialorder %v3841_v4, %v2021_v16  ;;  %vm2027_vm8 = vcmp.eq.f32.partialorder %v3844_v54, %v2021_v16  ;;  %vm2028_vm9 = vcmp.eq.f32.partialorder %v3847_v5, %v2021_v16  ;;  %vm2029_vm10 = vcmp.eq.f32.partialorder %v3850_v13, %v2021_v16  ;;  %s2476_s9 = scalar_select %p2474_p4, %s3860_s25, %s2460_s8 }
 0x982   :  { %v2030_v39 = vsel %vm2022_vm3, %v4350_v27, 2147483647  ;;  %v2031_v45 = vsel %vm2023_vm4, %v4351_v52, 2147483647  ;;  %v2032_v49 = vsel %vm2024_vm5, %v4352_v11, 2147483647 }
 0x983   :  { %v2033_v56 = vsel %vm2025_vm6, %v4353_v60, 2147483647  ;;  %v2034_v6 = vsel %vm2026_vm7, %v4354_v62, 2147483647  ;;  %v2035_v48 = vsel %vm2027_vm8, %v4355_v34, 2147483647 }
 0x984   :  { %v2036_v0 = vsel %vm2028_vm9, %v4356_v41, 2147483647  ;;  %v2037_v1 = vsel %vm2029_vm10, %v4357_v14, 2147483647  ;;  %vm2038_vm11 = vcmp.lt.s32.totalorder %v2030_v39, %v2034_v6  ;;  %vm2040_vm12 = vcmp.lt.s32.totalorder %v2031_v45, %v2035_v48 }
 0x985   :  { %v2039_v7 = vsel %vm2038_vm11, %v2030_v39, %v2034_v6  ;;  %vm2042_vm13 = vcmp.lt.s32.totalorder %v2032_v49, %v2036_v0  ;;  %vm2044_vm14 = vcmp.lt.s32.totalorder %v2033_v56, %v2037_v1  ;;  %v2041_v9 = vsel %vm2040_vm12, %v2031_v45, %v2035_v48 }
 0x986   :  { %v2043_v18 = vsel %vm2042_vm13, %v2032_v49, %v2036_v0  ;;  %v2045_v19 = vsel %vm2044_vm14, %v2033_v56, %v2037_v1  ;;  %vm2046_vm15 = vcmp.lt.s32.totalorder %v2039_v7, %v2041_v9 }
 0x987   :  { %vm2048_vm0 = vcmp.lt.s32.totalorder %v2043_v18, %v2045_v19  ;;  %v2047_v29 = vsel %vm2046_vm15, %v2039_v7, %v2041_v9 }
 0x988   :  { %v2049_v30 = vsel %vm2048_vm0, %v2043_v18, %v2045_v19 }
 0x989   :  { %vm2050_vm1 = vcmp.lt.s32.totalorder %v2047_v29, %v2049_v30 }
 0x98a   :  { %v2051_v57 = vsel %vm2050_vm1, %v2047_v29, %v2049_v30 }
 0x98b   :  { %v2053_v47 = vshra.s32 %v2051_v57, 16  ;;  %v2052_v50 = vand.u32 65535, %v2051_v57 }
 0x98d   :  { %v2055_v51 = vcvt.s32.f32 %v2053_v47  ;;  %v2054_v43 = vcvt.s32.f32 %v2052_v50 }
 0x98f   :  { %2056 = vmin.xlane.f32.xlu0 %v2055_v51 }
 0xa1c   :  { %v2057_v44 = vpop.xlane.xlu0 %2056 }
 0xa1d   :  { %vm2058_vm2 = vcmp.eq.f32.partialorder %v2055_v51, %v2057_v44  ;;  %v2063_v40 = vcvt.f32.s32 %v2057_v44 }
 0xa1e   :  { %v2059_v42 = vsel %vm2058_vm2, %v2054_v43, inf }
 0xa1f   :  { %2060 = vmin.xlane.f32.xlu1 %v2059_v42  ;;  %v2064_v25 = vshll.u32 %v2063_v40, 16 }
 0xaac   :  { %v2061_v31 = vpop.xlane.xlu1 %2060 }
 0xaad   :  { %v2062_v53 = vcvt.f32.s32 %v2061_v31 }
 0xaaf   :  { %v2065_v58 = vadd.s32 %v2064_v25, %v2062_v53 }
 0xab1   :  { %v2066_v8 = vrot.slane %v2065_v58, 4 }
 0xab3   :  { %vm2067_vm3 = vcmp.lt.s32.totalorder %v2065_v58, %v2066_v8 }
 0xab4   :  { %v2068_v35 = vsel %vm2067_vm3, %v2065_v58, %v2066_v8 }
 0xab5   :  { %v2069_v17 = vrot.slane %v2068_v35, 2 }
 0xab7   :  { %vm2070_vm4 = vcmp.lt.s32.totalorder %v2068_v35, %v2069_v17 }
 0xab8   :  { %v2071_v33 = vsel %vm2070_vm4, %v2068_v35, %v2069_v17 }
 0xab9   :  { %v2072_v38 = vrot.slane %v2071_v33, 1 }
 0xabb   :  { %vm2073_vm5 = vcmp.lt.s32.totalorder %v2071_v33, %v2072_v38 }
 0xabc   :  { %v2074_v61 = vsel %vm2073_vm5, %v2071_v33, %v2072_v38 }
 0xabd   :  { %2845 = vpush %v2074_v61 }
 0xaee   :  { %s3879_s26 = spop %2845 }
 0xaef   :  { %v2076_v24 = vstv %s3879_s26  ;;  %s4365_s26 = smov (!%p2474_p4, %s3879_s26), %s4363_s24 }
 0xaf0   :  { %vm2077_vm6 = vcmp.eq.s32.totalorder %v4350_v27, %v2076_v24  ;;  %vm2078_vm7 = vcmp.eq.s32.totalorder %v4351_v52, %v2076_v24  ;;  %vm2079_vm8 = vcmp.eq.s32.totalorder %v4352_v11, %v2076_v24  ;;  %vm2080_vm9 = vcmp.eq.s32.totalorder %v4353_v60, %v2076_v24 }
 0xaf1   :  { %vm2081_vm10 = vcmp.eq.s32.totalorder %v4354_v62, %v2076_v24  ;;  %vm2082_vm11 = vcmp.eq.s32.totalorder %v4355_v34, %v2076_v24  ;;  %vm2083_vm12 = vcmp.eq.s32.totalorder %v4356_v41, %v2076_v24  ;;  %vm2084_vm13 = vcmp.eq.s32.totalorder %v4357_v14, %v2076_v24 }
 0xaf2   :  { %v3891_v21 = vsel %vm2077_vm6, -inf, %v3829_v15  ;;  %v3894_v28 = vsel %vm2078_vm7, -inf, %v3832_v20  ;;  %v3897_v2 = vsel %vm2079_vm8, -inf, %v3835_v59  ;;  %v3900_v37 = vsel %vm2080_vm9, -inf, %v3838_v3 }
 0xaf3   :  { %v3903_v26 = vsel %vm2081_vm10, -inf, %v3841_v4  ;;  %v3906_v22 = vsel %vm2082_vm11, -inf, %v3844_v54  ;;  %v3909_v46 = vsel %vm2083_vm12, -inf, %v3847_v5  ;;  %v3912_v15 = vsel %vm2084_vm13, -inf, %v3850_v13 }
 0xaf4   :  { %v2093_v20 = vmax.f32 %v3891_v21, %v3903_v26  ;;  %v2094_v59 = vmax.f32 %v3894_v28, %v3906_v22  ;;  %v2095_v3 = vmax.f32 %v3897_v2, %v3909_v46  ;;  %v2096_v4 = vmax.f32 %v3900_v37, %v3912_v15 }
 0xaf6   :  { %v2097_v54 = vmax.f32 %v2093_v20, %v2094_v59  ;;  %v2098_v32 = vmax.f32 %v2095_v3, %v2096_v4 }
 0xaf8   :  { %v2099_v63 = vmax.f32 %v2097_v54, %v2098_v32 }
 0xafa   :  { %2100 = vmax.xlane.f32.xlu0 %v2099_v63 }
 0xb87   :  { %v2101_v5 = vpop.xlane.xlu0 %2100 }
 0xb88   :  { %v2102_v10 = vrot.slane %v2101_v5, 4 }
 0xb8a   :  { %v2103_v13 = vmax.f32 %v2101_v5, %v2102_v10 }
 0xb8c   :  { %v2104_v23 = vrot.slane %v2103_v13, 2 }
 0xb8e   :  { %v2105_v36 = vmax.f32 %v2103_v13, %v2104_v23 }
 0xb90   :  { %v2106_v16 = vrot.slane %v2105_v36, 1 }
 0xb92   :  { %v2107_v39 = vmax.f32 %v2105_v36, %v2106_v16 }
 0xb94   :  { %2847 = vpush %v2107_v39 }
 0xbc5   :  { %s3922_s27 = spop %2847 }
 0xbc6   :  { %v2109_v45 = vstv %s3922_s27  ;;  %p2490_p5 = scmp.gt.f32.partialorder %s3922_s27, -inf }
 0xbc7   :  { %vm2110_vm14 = vcmp.eq.f32.partialorder %v3891_v21, %v2109_v45  ;;  %vm2111_vm15 = vcmp.eq.f32.partialorder %v3894_v28, %v2109_v45  ;;  %vm2112_vm0 = vcmp.eq.f32.partialorder %v3897_v2, %v2109_v45  ;;  %vm2113_vm1 = vcmp.eq.f32.partialorder %v3900_v37, %v2109_v45 }
 0xbc8   :  { %vm2114_vm2 = vcmp.eq.f32.partialorder %v3903_v26, %v2109_v45  ;;  %vm2115_vm3 = vcmp.eq.f32.partialorder %v3906_v22, %v2109_v45  ;;  %vm2116_vm4 = vcmp.eq.f32.partialorder %v3909_v46, %v2109_v45  ;;  %vm2117_vm5 = vcmp.eq.f32.partialorder %v3912_v15, %v2109_v45  ;;  %s2492_s10 = scalar_select %p2490_p5, %s3922_s27, %s2476_s9 }
 0xbc9   :  { %v2118_v49 = vsel %vm2110_vm14, %v4350_v27, 2147483647  ;;  %v2119_v56 = vsel %vm2111_vm15, %v4351_v52, 2147483647  ;;  %v2120_v6 = vsel %vm2112_vm0, %v4352_v11, 2147483647 }
 0xbca   :  { %v2121_v48 = vsel %vm2113_vm1, %v4353_v60, 2147483647  ;;  %v2122_v0 = vsel %vm2114_vm2, %v4354_v62, 2147483647  ;;  %v2123_v1 = vsel %vm2115_vm3, %v4355_v34, 2147483647 }
 0xbcb   :  { %v2124_v7 = vsel %vm2116_vm4, %v4356_v41, 2147483647  ;;  %v2125_v9 = vsel %vm2117_vm5, %v4357_v14, 2147483647  ;;  %vm2126_vm6 = vcmp.lt.s32.totalorder %v2118_v49, %v2122_v0  ;;  %vm2128_vm7 = vcmp.lt.s32.totalorder %v2119_v56, %v2123_v1 }
 0xbcc   :  { %v2127_v18 = vsel %vm2126_vm6, %v2118_v49, %v2122_v0  ;;  %vm2130_vm8 = vcmp.lt.s32.totalorder %v2120_v6, %v2124_v7  ;;  %vm2132_vm9 = vcmp.lt.s32.totalorder %v2121_v48, %v2125_v9  ;;  %v2129_v19 = vsel %vm2128_vm7, %v2119_v56, %v2123_v1 }
 0xbcd   :  { %v2131_v29 = vsel %vm2130_vm8, %v2120_v6, %v2124_v7  ;;  %v2133_v30 = vsel %vm2132_vm9, %v2121_v48, %v2125_v9  ;;  %vm2134_vm10 = vcmp.lt.s32.totalorder %v2127_v18, %v2129_v19 }
 0xbce   :  { %vm2136_vm11 = vcmp.lt.s32.totalorder %v2131_v29, %v2133_v30  ;;  %v2135_v57 = vsel %vm2134_vm10, %v2127_v18, %v2129_v19 }
 0xbcf   :  { %v2137_v47 = vsel %vm2136_vm11, %v2131_v29, %v2133_v30 }
 0xbd0   :  { %vm2138_vm12 = vcmp.lt.s32.totalorder %v2135_v57, %v2137_v47 }
 0xbd1   :  { %v2139_v51 = vsel %vm2138_vm12, %v2135_v57, %v2137_v47 }
 0xbd2   :  { %v2141_v50 = vshra.s32 %v2139_v51, 16  ;;  %v2140_v43 = vand.u32 65535, %v2139_v51 }
 0xbd4   :  { %v2143_v44 = vcvt.s32.f32 %v2141_v50  ;;  %v2142_v40 = vcvt.s32.f32 %v2140_v43 }
 0xbd6   :  { %2144 = vmin.xlane.f32.xlu1 %v2143_v44 }
 0xc63   :  { %v2145_v42 = vpop.xlane.xlu1 %2144 }
 0xc64   :  { %vm2146_vm13 = vcmp.eq.f32.partialorder %v2143_v44, %v2145_v42  ;;  %v2151_v25 = vcvt.f32.s32 %v2145_v42 }
 0xc65   :  { %v2147_v31 = vsel %vm2146_vm13, %v2142_v40, inf }
 0xc66   :  { %2148 = vmin.xlane.f32.xlu0 %v2147_v31  ;;  %v2152_v58 = vshll.u32 %v2151_v25, 16 }
 0xcf3   :  { %v2149_v53 = vpop.xlane.xlu0 %2148 }
 0xcf4   :  { %v2150_v8 = vcvt.f32.s32 %v2149_v53 }
 0xcf6   :  { %v2153_v35 = vadd.s32 %v2152_v58, %v2150_v8 }
 0xcf8   :  { %v2154_v17 = vrot.slane %v2153_v35, 4 }
 0xcfa   :  { %vm2155_vm14 = vcmp.lt.s32.totalorder %v2153_v35, %v2154_v17 }
 0xcfb   :  { %v2156_v33 = vsel %vm2155_vm14, %v2153_v35, %v2154_v17 }
 0xcfc   :  { %v2157_v38 = vrot.slane %v2156_v33, 2 }
 0xcfe   :  { %vm2158_vm15 = vcmp.lt.s32.totalorder %v2156_v33, %v2157_v38 }
 0xcff   :  { %v2159_v61 = vsel %vm2158_vm15, %v2156_v33, %v2157_v38 }
 0xd00   :  { %v2160_v24 = vrot.slane %v2159_v61, 1 }
 0xd02   :  { %vm2161_vm0 = vcmp.lt.s32.totalorder %v2159_v61, %v2160_v24 }
 0xd03   :  { %v2162_v20 = vsel %vm2161_vm0, %v2159_v61, %v2160_v24 }
 0xd04   :  { %2849 = vpush %v2162_v20 }
 0xd35   :  { %s3941_s28 = spop %2849 }
 0xd36   :  { %v2164_v59 = vstv %s3941_s28  ;;  %s4367_s28 = smov (!%p2490_p5, %s3941_s28), %s4365_s26 }
 0xd37   :  { %vm2165_vm1 = vcmp.eq.s32.totalorder %v4350_v27, %v2164_v59  ;;  %vm2166_vm2 = vcmp.eq.s32.totalorder %v4351_v52, %v2164_v59  ;;  %vm2167_vm3 = vcmp.eq.s32.totalorder %v4352_v11, %v2164_v59  ;;  %vm2168_vm4 = vcmp.eq.s32.totalorder %v4353_v60, %v2164_v59 }
 0xd38   :  { %vm2169_vm5 = vcmp.eq.s32.totalorder %v4354_v62, %v2164_v59  ;;  %vm2170_vm6 = vcmp.eq.s32.totalorder %v4355_v34, %v2164_v59  ;;  %vm2171_vm7 = vcmp.eq.s32.totalorder %v4356_v41, %v2164_v59  ;;  %vm2172_vm8 = vcmp.eq.s32.totalorder %v4357_v14, %v2164_v59 }
 0xd39   :  { %v3953_v3 = vsel %vm2165_vm1, -inf, %v3891_v21  ;;  %v3956_v4 = vsel %vm2166_vm2, -inf, %v3894_v28  ;;  %v3959_v54 = vsel %vm2167_vm3, -inf, %v3897_v2  ;;  %v3962_v32 = vsel %vm2168_vm4, -inf, %v3900_v37 }
 0xd3a   :  { %v3965_v63 = vsel %vm2169_vm5, -inf, %v3903_v26  ;;  %v3968_v5 = vsel %vm2170_vm6, -inf, %v3906_v22  ;;  %v3971_v10 = vsel %vm2171_vm7, -inf, %v3909_v46  ;;  %v3974_v21 = vsel %vm2172_vm8, -inf, %v3912_v15 }
 0xd3b   :  { %v2181_v28 = vmax.f32 %v3953_v3, %v3965_v63  ;;  %v2182_v2 = vmax.f32 %v3956_v4, %v3968_v5  ;;  %v2183_v37 = vmax.f32 %v3959_v54, %v3971_v10  ;;  %v2184_v26 = vmax.f32 %v3962_v32, %v3974_v21 }
 0xd3d   :  { %v2185_v22 = vmax.f32 %v2181_v28, %v2182_v2  ;;  %v2186_v13 = vmax.f32 %v2183_v37, %v2184_v26 }
 0xd3f   :  { %v2187_v23 = vmax.f32 %v2185_v22, %v2186_v13 }
 0xd41   :  { %2188 = vmax.xlane.f32.xlu1 %v2187_v23 }
 0xdce   :  { %v2189_v46 = vpop.xlane.xlu1 %2188 }
 0xdcf   :  { %v2190_v36 = vrot.slane %v2189_v46, 4 }
 0xdd1   :  { %v2191_v15 = vmax.f32 %v2189_v46, %v2190_v36 }
 0xdd3   :  { %v2192_v16 = vrot.slane %v2191_v15, 2 }
 0xdd5   :  { %v2193_v39 = vmax.f32 %v2191_v15, %v2192_v16 }
 0xdd7   :  { %v2194_v45 = vrot.slane %v2193_v39, 1 }
 0xdd9   :  { %v2195_v49 = vmax.f32 %v2193_v39, %v2194_v45 }
 0xddb   :  { %2851 = vpush %v2195_v49 }
 0xe0c   :  { %s3984_s3 = spop %2851 }
 0xe0d   :  { %v2197_v56 = vstv %s3984_s3  ;;  %p2506_p6 = scmp.gt.f32.partialorder %s3984_s3, -inf }
 0xe0e   :  { %vm2198_vm9 = vcmp.eq.f32.partialorder %v3953_v3, %v2197_v56  ;;  %vm2199_vm10 = vcmp.eq.f32.partialorder %v3956_v4, %v2197_v56  ;;  %vm2200_vm11 = vcmp.eq.f32.partialorder %v3959_v54, %v2197_v56  ;;  %vm2201_vm12 = vcmp.eq.f32.partialorder %v3962_v32, %v2197_v56 }
 0xe0f   :  { %vm2202_vm13 = vcmp.eq.f32.partialorder %v3965_v63, %v2197_v56  ;;  %vm2203_vm14 = vcmp.eq.f32.partialorder %v3968_v5, %v2197_v56  ;;  %vm2204_vm15 = vcmp.eq.f32.partialorder %v3971_v10, %v2197_v56  ;;  %vm2205_vm0 = vcmp.eq.f32.partialorder %v3974_v21, %v2197_v56  ;;  %s2508_s11 = scalar_select %p2506_p6, %s3984_s3, %s2492_s10 }
 0xe10   :  { %v2206_v6 = vsel %vm2198_vm9, %v4350_v27, 2147483647  ;;  %v2207_v48 = vsel %vm2199_vm10, %v4351_v52, 2147483647  ;;  %v2208_v0 = vsel %vm2200_vm11, %v4352_v11, 2147483647 }
 0xe11   :  { %v2209_v1 = vsel %vm2201_vm12, %v4353_v60, 2147483647  ;;  %v2210_v7 = vsel %vm2202_vm13, %v4354_v62, 2147483647  ;;  %v2211_v9 = vsel %vm2203_vm14, %v4355_v34, 2147483647 }
 0xe12   :  { %v2212_v18 = vsel %vm2204_vm15, %v4356_v41, 2147483647  ;;  %v2213_v19 = vsel %vm2205_vm0, %v4357_v14, 2147483647  ;;  %vm2214_vm1 = vcmp.lt.s32.totalorder %v2206_v6, %v2210_v7  ;;  %vm2216_vm2 = vcmp.lt.s32.totalorder %v2207_v48, %v2211_v9 }
 0xe13   :  { %v2215_v29 = vsel %vm2214_vm1, %v2206_v6, %v2210_v7  ;;  %vm2218_vm3 = vcmp.lt.s32.totalorder %v2208_v0, %v2212_v18  ;;  %vm2220_vm4 = vcmp.lt.s32.totalorder %v2209_v1, %v2213_v19  ;;  %v2217_v30 = vsel %vm2216_vm2, %v2207_v48, %v2211_v9 }
 0xe14   :  { %v2219_v57 = vsel %vm2218_vm3, %v2208_v0, %v2212_v18  ;;  %v2221_v47 = vsel %vm2220_vm4, %v2209_v1, %v2213_v19  ;;  %vm2222_vm5 = vcmp.lt.s32.totalorder %v2215_v29, %v2217_v30 }
 0xe15   :  { %vm2224_vm6 = vcmp.lt.s32.totalorder %v2219_v57, %v2221_v47  ;;  %v2223_v51 = vsel %vm2222_vm5, %v2215_v29, %v2217_v30 }
 0xe16   :  { %v2225_v50 = vsel %vm2224_vm6, %v2219_v57, %v2221_v47 }
 0xe17   :  { %vm2226_vm7 = vcmp.lt.s32.totalorder %v2223_v51, %v2225_v50 }
 0xe18   :  { %v2227_v44 = vsel %vm2226_vm7, %v2223_v51, %v2225_v50 }
 0xe19   :  { %v2229_v43 = vshra.s32 %v2227_v44, 16  ;;  %v2228_v40 = vand.u32 65535, %v2227_v44 }
 0xe1b   :  { %v2231_v42 = vcvt.s32.f32 %v2229_v43  ;;  %v2230_v25 = vcvt.s32.f32 %v2228_v40 }
 0xe1d   :  { %2232 = vmin.xlane.f32.xlu0 %v2231_v42 }
 0xeaa   :  { %v2233_v31 = vpop.xlane.xlu0 %2232 }
 0xeab   :  { %vm2234_vm8 = vcmp.eq.f32.partialorder %v2231_v42, %v2233_v31  ;;  %v2239_v58 = vcvt.f32.s32 %v2233_v31 }
 0xeac   :  { %v2235_v53 = vsel %vm2234_vm8, %v2230_v25, inf }
 0xead   :  { %2236 = vmin.xlane.f32.xlu1 %v2235_v53  ;;  %v2240_v35 = vshll.u32 %v2239_v58, 16 }
 0xf3a   :  { %v2237_v8 = vpop.xlane.xlu1 %2236 }
 0xf3b   :  { %v2238_v17 = vcvt.f32.s32 %v2237_v8 }
 0xf3d   :  { %v2241_v33 = vadd.s32 %v2240_v35, %v2238_v17 }
 0xf3f   :  { %v2242_v38 = vrot.slane %v2241_v33, 4 }
 0xf41   :  { %vm2243_vm9 = vcmp.lt.s32.totalorder %v2241_v33, %v2242_v38 }
 0xf42   :  { %v2244_v61 = vsel %vm2243_vm9, %v2241_v33, %v2242_v38 }
 0xf43   :  { %v2245_v24 = vrot.slane %v2244_v61, 2 }
 0xf45   :  { %vm2246_vm10 = vcmp.lt.s32.totalorder %v2244_v61, %v2245_v24 }
 0xf46   :  { %v2247_v20 = vsel %vm2246_vm10, %v2244_v61, %v2245_v24 }
 0xf47   :  { %v2248_v59 = vrot.slane %v2247_v20, 1 }
 0xf49   :  { %vm2249_vm11 = vcmp.lt.s32.totalorder %v2247_v20, %v2248_v59 }
 0xf4a   :  { %v2250_v28 = vsel %vm2249_vm11, %v2247_v20, %v2248_v59 }
 0xf4b   :  { %2853 = vpush %v2250_v28 }
 0xf7c   :  { %s4003_s29 = spop %2853 }
 0xf7d   :  { %v2252_v2 = vstv %s4003_s29  ;;  %s4369_s29 = smov (!%p2506_p6, %s4003_s29), %s4367_s28 }
 0xf7e   :  { %vm2253_vm12 = vcmp.eq.s32.totalorder %v4350_v27, %v2252_v2  ;;  %vm2254_vm13 = vcmp.eq.s32.totalorder %v4351_v52, %v2252_v2  ;;  %vm2255_vm14 = vcmp.eq.s32.totalorder %v4352_v11, %v2252_v2  ;;  %vm2256_vm15 = vcmp.eq.s32.totalorder %v4353_v60, %v2252_v2 }
 0xf7f   :  { %vm2257_vm0 = vcmp.eq.s32.totalorder %v4354_v62, %v2252_v2  ;;  %vm2258_vm1 = vcmp.eq.s32.totalorder %v4355_v34, %v2252_v2  ;;  %vm2259_vm2 = vcmp.eq.s32.totalorder %v4356_v41, %v2252_v2  ;;  %vm2260_vm3 = vcmp.eq.s32.totalorder %v4357_v14, %v2252_v2 }
 0xf80   :  { %v4015_v37 = vsel %vm2253_vm12, -inf, %v3953_v3  ;;  %v4018_v26 = vsel %vm2254_vm13, -inf, %v3956_v4  ;;  %v4021_v22 = vsel %vm2255_vm14, -inf, %v3959_v54  ;;  %v4024_v13 = vsel %vm2256_vm15, -inf, %v3962_v32 }
 0xf81   :  { %v4027_v23 = vsel %vm2257_vm0, -inf, %v3965_v63  ;;  %v4030_v46 = vsel %vm2258_vm1, -inf, %v3968_v5  ;;  %v4033_v36 = vsel %vm2259_vm2, -inf, %v3971_v10  ;;  %v4036_v3 = vsel %vm2260_vm3, -inf, %v3974_v21 }
 0xf82   :  { %v2269_v4 = vmax.f32 %v4015_v37, %v4027_v23  ;;  %v2270_v54 = vmax.f32 %v4018_v26, %v4030_v46  ;;  %v2271_v32 = vmax.f32 %v4021_v22, %v4033_v36  ;;  %v2272_v63 = vmax.f32 %v4024_v13, %v4036_v3 }
 0xf84   :  { %v2273_v5 = vmax.f32 %v2269_v4, %v2270_v54  ;;  %v2274_v15 = vmax.f32 %v2271_v32, %v2272_v63 }
 0xf86   :  { %v2275_v16 = vmax.f32 %v2273_v5, %v2274_v15 }
 0xf88   :  { %2276 = vmax.xlane.f32.xlu0 %v2275_v16 }
0x1015   :  { %v2277_v10 = vpop.xlane.xlu0 %2276 }
0x1016   :  { %v2278_v39 = vrot.slane %v2277_v10, 4 }
0x1018   :  { %v2279_v21 = vmax.f32 %v2277_v10, %v2278_v39 }
0x101a   :  { %v2280_v45 = vrot.slane %v2279_v21, 2 }
0x101c   :  { %v2281_v49 = vmax.f32 %v2279_v21, %v2280_v45 }
0x101e   :  { %v2282_v56 = vrot.slane %v2281_v49, 1 }
0x1020   :  { %v2283_v6 = vmax.f32 %v2281_v49, %v2282_v56 }
0x1022   :  { %2855 = vpush %v2283_v6 }
0x1053   :  { %s4046_s30 = spop %2855 }
0x1054   :  { %v2285_v48 = vstv %s4046_s30  ;;  %p2522_p7 = scmp.gt.f32.partialorder %s4046_s30, -inf }
0x1055   :  { %vm2286_vm4 = vcmp.eq.f32.partialorder %v4015_v37, %v2285_v48  ;;  %vm2287_vm5 = vcmp.eq.f32.partialorder %v4018_v26, %v2285_v48  ;;  %vm2288_vm6 = vcmp.eq.f32.partialorder %v4021_v22, %v2285_v48  ;;  %vm2289_vm7 = vcmp.eq.f32.partialorder %v4024_v13, %v2285_v48 }
0x1056   :  { %vm2290_vm8 = vcmp.eq.f32.partialorder %v4027_v23, %v2285_v48  ;;  %vm2291_vm9 = vcmp.eq.f32.partialorder %v4030_v46, %v2285_v48  ;;  %vm2292_vm10 = vcmp.eq.f32.partialorder %v4033_v36, %v2285_v48  ;;  %vm2293_vm11 = vcmp.eq.f32.partialorder %v4036_v3, %v2285_v48  ;;  %s2524_s12 = scalar_select %p2522_p7, %s4046_s30, %s2508_s11 }
0x1057   :  { %v2294_v0 = vsel %vm2286_vm4, %v4350_v27, 2147483647  ;;  %v2295_v1 = vsel %vm2287_vm5, %v4351_v52, 2147483647  ;;  %v2296_v7 = vsel %vm2288_vm6, %v4352_v11, 2147483647 }
0x1058   :  { %v2297_v9 = vsel %vm2289_vm7, %v4353_v60, 2147483647  ;;  %v2298_v18 = vsel %vm2290_vm8, %v4354_v62, 2147483647  ;;  %v2299_v19 = vsel %vm2291_vm9, %v4355_v34, 2147483647 }
0x1059   :  { %v2300_v29 = vsel %vm2292_vm10, %v4356_v41, 2147483647  ;;  %v2301_v30 = vsel %vm2293_vm11, %v4357_v14, 2147483647  ;;  %vm2302_vm12 = vcmp.lt.s32.totalorder %v2294_v0, %v2298_v18  ;;  %vm2304_vm13 = vcmp.lt.s32.totalorder %v2295_v1, %v2299_v19 }
0x105a   :  { %v2303_v57 = vsel %vm2302_vm12, %v2294_v0, %v2298_v18  ;;  %vm2306_vm14 = vcmp.lt.s32.totalorder %v2296_v7, %v2300_v29  ;;  %vm2308_vm15 = vcmp.lt.s32.totalorder %v2297_v9, %v2301_v30  ;;  %v2305_v47 = vsel %vm2304_vm13, %v2295_v1, %v2299_v19  ;;  %v1740_v1 = vld [vmem:[#allocation4] sm:$0x1] }
0x105b   :  { %v2307_v51 = vsel %vm2306_vm14, %v2296_v7, %v2300_v29  ;;  %v2309_v50 = vsel %vm2308_vm15, %v2297_v9, %v2301_v30  ;;  %vm2310_vm0 = vcmp.lt.s32.totalorder %v2303_v57, %v2305_v47  ;;  %2871 = vrcp.f32 %v1740_v1 }
0x105c   :  { %vm2312_vm1 = vcmp.lt.s32.totalorder %v2307_v51, %v2309_v50  ;;  %v2311_v44 = vsel %vm2310_vm0, %v2303_v57, %v2305_v47  ;;  %v2448_v9 = vstv %s2444_s7  ;;  %v2464_v18 = vstv %s2460_s8 }
0x105d   :  { %v2313_v43 = vsel %vm2312_vm1, %v2307_v51, %v2309_v50  ;;  %v2480_v29 = vstv %s2476_s9  ;;  %v2496_v57 = vstv %s2492_s10  ;;  %v2512_v51 = vstv %s2508_s11 }
0x105e   :  { %vm2314_vm2 = vcmp.lt.s32.totalorder %v2311_v44, %v2313_v43 }
0x105f   :  { %v2315_v42 = vsel %vm2314_vm2, %v2311_v44, %v2313_v43  ;;  %v2528_v44 = vstv %s2524_s12 }
0x1060   :  { %v2317_v40 = vshra.s32 %v2315_v42, 16  ;;  %v2316_v25 = vand.u32 65535, %v2315_v42 }
0x1062   :  { %v2319_v31 = vcvt.s32.f32 %v2317_v40  ;;  %v2318_v58 = vcvt.s32.f32 %v2316_v25 }
0x1064   :  { %2320 = vmin.xlane.f32.xlu1 %v2319_v31 }
0x1065   :  { %v2872_v7 = vpop.eup %2871 }
0x1066   :  { %v2433_v19 = vmul.f32 %v2872_v7, %v3657_v55  ;;  %v2449_v30 = vmul.f32 %v2872_v7, %v2448_v9  ;;  %v2465_v47 = vmul.f32 %v2872_v7, %v2464_v18  ;;  %v2481_v50 = vmul.f32 %v2872_v7, %v2480_v29 }
0x1067   :  { %v2497_v43 = vmul.f32 %v2872_v7, %v2496_v57  ;;  %v2513_v42 = vmul.f32 %v2872_v7, %v2512_v51  ;;  %v2529_v40 = vmul.f32 %v2872_v7, %v2528_v44 }
0x1068   :  { %2873 = vtanh.f32 %v2433_v19 }
0x1069   :  { %2875 = vtanh.f32 %v2449_v30 }
0x106a   :  { %2877 = vtanh.f32 %v2465_v47 }
0x106b   :  { %2879 = vtanh.f32 %v2481_v50 }
0x106c   :  { %2881 = vtanh.f32 %v2497_v43 }
0x106d   :  { %2883 = vtanh.f32 %v2513_v42  ;;  %v2446_v42 = vstv %s4361_s22 }
0x106e   :  { %2885 = vtanh.f32 %v2529_v40  ;;  %v2462_v40 = vstv %s4363_s24 }
0x10f1   :  { %v2321_v53 = vpop.xlane.xlu1 %2320 }
0x10f2   :  { %vm2322_vm3 = vcmp.eq.f32.partialorder %v2319_v31, %v2321_v53  ;;  %v2327_v35 = vcvt.f32.s32 %v2321_v53 }
0x10f3   :  { %v2323_v8 = vsel %vm2322_vm3, %v2318_v58, inf  ;;  %v2874_v58 = vpop.eup %2873 }
0x10f4   :  { %2324 = vmin.xlane.f32.xlu0 %v2323_v8  ;;  %v2328_v33 = vshll.u32 %v2327_v35, 16 }
0x1181   :  { %v2325_v17 = vpop.xlane.xlu0 %2324 }
0x1182   :  { %v2326_v38 = vcvt.f32.s32 %v2325_v17 }
0x1184   :  { %v2329_v61 = vadd.s32 %v2328_v33, %v2326_v38  ;;  %v2876_v38 = vpop.eup %2875 }
0x1186   :  { %v2330_v24 = vrot.slane %v2329_v61, 4 }
0x1188   :  { %vm2331_vm4 = vcmp.lt.s32.totalorder %v2329_v61, %v2330_v24 }
0x1189   :  { %v2332_v20 = vsel %vm2331_vm4, %v2329_v61, %v2330_v24 }
0x118a   :  { %v2333_v59 = vrot.slane %v2332_v20, 2 }
0x118c   :  { %vm2334_vm5 = vcmp.lt.s32.totalorder %v2332_v20, %v2333_v59 }
0x118d   :  { %v2335_v28 = vsel %vm2334_vm5, %v2332_v20, %v2333_v59 }
0x118e   :  { %v2336_v2 = vrot.slane %v2335_v28, 1 }
0x1190   :  { %vm2337_vm6 = vcmp.lt.s32.totalorder %v2335_v28, %v2336_v2 }
0x1191   :  { %v2338_v4 = vsel %vm2337_vm6, %v2335_v28, %v2336_v2  ;;  %v4358_v2 = vld [vmem:[#allocation12_spill] sm:$0xff] }
0x1192   :  { %2857 = vpush %v2338_v4  ;;  %v2439_v4 = vrot.slane %v2874_v58, %v4358_v2 }
0x11c3   :  { %s4065_s6 = spop %2857 }
0x11c4   :  { %v2340_v54 = vstv %s4065_s6  ;;  %s4371_s6 = smov (!%p2522_p7, %s4065_s6), %s4369_s29 }
0x11c5   :  { %vm2341_vm7 = vcmp.eq.s32.totalorder %v4350_v27, %v2340_v54  ;;  %vm2342_vm8 = vcmp.eq.s32.totalorder %v4351_v52, %v2340_v54  ;;  %vm2343_vm9 = vcmp.eq.s32.totalorder %v4352_v11, %v2340_v54  ;;  %vm2344_vm10 = vcmp.eq.s32.totalorder %v4353_v60, %v2340_v54 }
0x11c6   :  { %vm2345_vm11 = vcmp.eq.s32.totalorder %v4354_v62, %v2340_v54  ;;  %vm2346_vm12 = vcmp.eq.s32.totalorder %v4355_v34, %v2340_v54  ;;  %vm2347_vm13 = vcmp.eq.s32.totalorder %v4356_v41, %v2340_v54  ;;  %vm2348_vm14 = vcmp.eq.s32.totalorder %v4357_v14, %v2340_v54 }
0x11c7   :  { %v4077_v32 = vsel %vm2341_vm7, -inf, %v4015_v37  ;;  %v4080_v63 = vsel %vm2342_vm8, -inf, %v4018_v26  ;;  %v4083_v5 = vsel %vm2343_vm9, -inf, %v4021_v22  ;;  %v4086_v15 = vsel %vm2344_vm10, -inf, %v4024_v13 }
0x11c8   :  { %v4089_v16 = vsel %vm2345_vm11, -inf, %v4027_v23  ;;  %v4092_v10 = vsel %vm2346_vm12, -inf, %v4030_v46  ;;  %v4095_v39 = vsel %vm2347_vm13, -inf, %v4033_v36  ;;  %v4098_v37 = vsel %vm2348_vm14, -inf, %v4036_v3 }
0x11c9   :  { %v2357_v26 = vmax.f32 %v4077_v32, %v4089_v16  ;;  %v2358_v22 = vmax.f32 %v4080_v63, %v4092_v10  ;;  %v2359_v13 = vmax.f32 %v4083_v5, %v4095_v39  ;;  %v2360_v23 = vmax.f32 %v4086_v15, %v4098_v37 }
0x11cb   :  { %v2361_v46 = vmax.f32 %v2357_v26, %v2358_v22  ;;  %v2362_v36 = vmax.f32 %v2359_v13, %v2360_v23 }
0x11cd   :  { %v2363_v3 = vmax.f32 %v2361_v46, %v2362_v36 }
0x11cf   :  { %2364 = vmax.xlane.f32.xlu1 %v2363_v3 }
0x125c   :  { %v2365_v21 = vpop.xlane.xlu1 %2364 }
0x125d   :  { %v2366_v45 = vrot.slane %v2365_v21, 4 }
0x125f   :  { %v2367_v49 = vmax.f32 %v2365_v21, %v2366_v45 }
0x1261   :  { %v2368_v56 = vrot.slane %v2367_v49, 2 }
0x1263   :  { %v2369_v6 = vmax.f32 %v2367_v49, %v2368_v56 }
0x1265   :  { %v2370_v48 = vrot.slane %v2369_v6, 1 }
0x1267   :  { %v2371_v0 = vmax.f32 %v2369_v6, %v2370_v48 }
0x1269   :  { %2859 = vpush %v2371_v0 }
0x129a   :  { %s4134_s13 = spop %2859 }
0x129b   :  { %v2373_v55 = vstv %s4134_s13  ;;  %p2538_p8 = scmp.gt.f32.partialorder %s4134_s13, -inf }
0x129c   :  { %vm2374_vm15 = vcmp.eq.f32.partialorder %v4077_v32, %v2373_v55  ;;  %vm2375_vm0 = vcmp.eq.f32.partialorder %v4080_v63, %v2373_v55  ;;  %vm2376_vm1 = vcmp.eq.f32.partialorder %v4083_v5, %v2373_v55  ;;  %vm2377_vm2 = vcmp.eq.f32.partialorder %v4086_v15, %v2373_v55  ;;  %v4359_v32 = vld [vmem:[#allocation11_spill] sm:$0xff] }
0x129d   :  { %s2540_s14 = scalar_select %p2538_p8, %s4134_s13, %s2524_s12  ;;  %vm2378_vm3 = vcmp.eq.f32.partialorder %v4089_v16, %v2373_v55  ;;  %vm2379_vm4 = vcmp.eq.f32.partialorder %v4092_v10, %v2373_v55  ;;  %vm2380_vm5 = vcmp.eq.f32.partialorder %v4095_v39, %v2373_v55  ;;  %vm2381_vm6 = vcmp.eq.f32.partialorder %v4098_v37, %v2373_v55 }
0x129e   :  { %v2382_v31 = vsel %vm2374_vm15, %v4350_v27, 2147483647  ;;  %v2383_v25 = vsel %vm2375_vm0, %v4351_v52, 2147483647  ;;  %v2384_v53 = vsel %vm2376_vm1, %v4352_v11, 2147483647  ;;  %v2878_v27 = vpop.eup %2877  ;;  %v2455_v63 = vrot.slane %v2876_v38, %v4358_v2 }
0x129f   :  { %v2544_v8 = vstv %s2540_s14  ;;  %v2385_v35 = vsel %vm2377_vm2, %v4353_v60, 2147483647  ;;  %v2386_v17 = vsel %vm2378_vm3, %v4354_v62, 2147483647  ;;  %v2387_v33 = vsel %vm2379_vm4, %v4355_v34, 2147483647  ;;  %v2880_v52 = vpop.eup %2879 }
0x12a0   :  { %v2545_v61 = vmul.f32 %v2872_v7, %v2544_v8  ;;  %v2388_v24 = vsel %vm2380_vm5, %v4356_v41, 2147483647  ;;  %v2389_v20 = vsel %vm2381_vm6, %v4357_v14, 2147483647  ;;  %vm2390_vm7 = vcmp.lt.s32.totalorder %v2382_v31, %v2386_v17  ;;  %v2882_v62 = vpop.eup %2881 }
0x12a1   :  { %v2391_v59 = vsel %vm2390_vm7, %v2382_v31, %v2386_v17  ;;  %vm2392_vm8 = vcmp.lt.s32.totalorder %v2383_v25, %v2387_v33  ;;  %vm2394_vm9 = vcmp.lt.s32.totalorder %v2384_v53, %v2388_v24  ;;  %vm2396_vm10 = vcmp.lt.s32.totalorder %v2385_v35, %v2389_v20  ;;  %v2884_v34 = vpop.eup %2883 }
0x12a2   :  { %2887 = vtanh.f32 %v2545_v61  ;;  %v2393_v11 = vsel %vm2392_vm8, %v2383_v25, %v2387_v33  ;;  %v2395_v60 = vsel %vm2394_vm9, %v2384_v53, %v2388_v24  ;;  %v2397_v28 = vsel %vm2396_vm10, %v2385_v35, %v2389_v20  ;;  %v2886_v14 = vpop.eup %2885 }
0x12a3   :  { %vm2398_vm11 = vcmp.lt.s32.totalorder %v2391_v59, %v2393_v11  ;;  %vm2400_vm12 = vcmp.lt.s32.totalorder %v2395_v60, %v2397_v28  ;;  %vm2430_vm13 = vcmp.eq.s32.totalorder %v4359_v32, 0  ;;  %vm2445_vm15 = vcmp.eq.s32.totalorder %v4359_v32, 1 }
0x12a4   :  { %v2399_v41 = vsel %vm2398_vm11, %v2391_v59, %v2393_v11  ;;  %v2401_v54 = vsel %vm2400_vm12, %v2395_v60, %v2397_v28  ;;  %v2471_v5 = vrot.slane %v2878_v27, %v4358_v2  ;;  %vm2461_vm0 = vcmp.eq.s32.totalorder %v4359_v32, 2 }
0x12a5   :  { %vm2402_vm14 = vcmp.lt.s32.totalorder %v2399_v41, %v2401_v54  ;;  %v2487_v16 = vrot.slane %v2880_v52, %v4358_v2  ;;  %v2441_v39 = vsel %vm2430_vm13, %v2439_v4, 0.0  ;;  %vm2477_vm1 = vcmp.eq.s32.totalorder %v4359_v32, 3 }
0x12a6   :  { %v2403_v15 = vsel %vm2402_vm14, %v2399_v41, %v2401_v54  ;;  %v2503_v37 = vrot.slane %v2882_v62, %v4358_v2  ;;  %v2457_v26 = vsel %vm2445_vm15, %v2455_v63, %v2441_v39  ;;  %vm2493_vm2 = vcmp.eq.s32.totalorder %v4359_v32, 4 }
0x12a7   :  { %v2405_v10 = vshra.s32 %v2403_v15, 16  ;;  %v2519_v22 = vrot.slane %v2884_v34, %v4358_v2  ;;  %v2473_v23 = vsel %vm2461_vm0, %v2471_v5, %v2457_v26  ;;  %vm2509_vm3 = vcmp.eq.s32.totalorder %v4359_v32, 5 }
0x12a8   :  { %v2535_v46 = vrot.slane %v2886_v14, %v4358_v2  ;;  %v2489_v36 = vsel %vm2477_vm1, %v2487_v16, %v2473_v23  ;;  %vm2525_vm4 = vcmp.eq.s32.totalorder %v4359_v32, 6  ;;  %vm2541_vm5 = vcmp.eq.s32.totalorder %v4359_v32, 7 }
0x12a9   :  { %v2407_v13 = vcvt.s32.f32 %v2405_v10  ;;  %v2505_v21 = vsel %vm2493_vm2, %v2503_v37, %v2489_v36  ;;  %vm2554_vm6 = vcmask 7168   ;;  %v2404_v48 = vand.u32 65535, %v2403_v15 }
0x12aa   :  { %v2521_v45 = vsel %vm2509_vm3, %v2519_v22, %v2505_v21  ;;  %v2431_v55 = vsel %vm2430_vm13, %v3686_v12, 0  ;;  %v2478_v31 = vstv %s4365_s26  ;;  %v2494_v53 = vstv %s4367_s28 }
0x12ab   :  { %2408 = vmin.xlane.f32.xlu0 %v2407_v13  ;;  %v2537_v56 = vsel %vm2525_vm4, %v2535_v46, %v2521_v45  ;;  %v2406_v1 = vcvt.s32.f32 %v2404_v48  ;;  %v2447_v25 = vsel %vm2445_vm15, %v2446_v42, %v2431_v55  ;;  %v2510_v8 = vstv %s4369_s29 }
0x12ac   :  { %v2888_v3 = vpop.eup %2887  ;;  %v2463_v58 = vsel %vm2461_vm0, %v2462_v40, %v2447_v25  ;;  %v2526_v17 = vstv %s4371_s6 }
0x12ad   :  { %v2551_v49 = vrot.slane %v2888_v3, %v4358_v2  ;;  %v2479_v35 = vsel %vm2477_vm1, %v2478_v31, %v2463_v58 }
0x12ae   :  { %v2495_v33 = vsel %vm2493_vm2, %v2494_v53, %v2479_v35 }
0x12af   :  { %v2553_v6 = vsel %vm2541_vm5, %v2551_v49, %v2537_v56  ;;  %v2511_v12 = vsel %vm2509_vm3, %v2510_v8, %v2495_v33 }
0x12b0   :  { %2556 = vst.msk [vmem:[%s4240_s5] sm:$0xff] %vm2554_vm6, %v2553_v6  ;;  %v2527_v38 = vsel %vm2525_vm4, %v2526_v17, %v2511_v12 }
0x1338   :  { %v2409_v0 = vpop.xlane.xlu0 %2408 }
0x1339   :  { %vm2410_vm7 = vcmp.eq.f32.partialorder %v2407_v13, %v2409_v0  ;;  %v2415_v9 = vcvt.f32.s32 %v2409_v0 }
0x133a   :  { %v2411_v7 = vsel %vm2410_vm7, %v2406_v1, inf }
0x133b   :  { %2412 = vmin.xlane.f32.xlu1 %v2411_v7  ;;  %v2416_v19 = vshll.u32 %v2415_v9, 16 }
0x13c8   :  { %v2413_v18 = vpop.xlane.xlu1 %2412 }
0x13c9   :  { %v2414_v29 = vcvt.f32.s32 %v2413_v18 }
0x13cb   :  { %v2417_v30 = vadd.s32 %v2416_v19, %v2414_v29 }
0x13cd   :  { %v2418_v57 = vrot.slane %v2417_v30, 4 }
0x13cf   :  { %vm2419_vm8 = vcmp.lt.s32.totalorder %v2417_v30, %v2418_v57 }
0x13d0   :  { %v2420_v47 = vsel %vm2419_vm8, %v2417_v30, %v2418_v57 }
0x13d1   :  { %v2421_v51 = vrot.slane %v2420_v47, 2 }
0x13d3   :  { %vm2422_vm9 = vcmp.lt.s32.totalorder %v2420_v47, %v2421_v51 }
0x13d4   :  { %v2423_v50 = vsel %vm2422_vm9, %v2420_v47, %v2421_v51 }
0x13d5   :  { %v2424_v44 = vrot.slane %v2423_v50, 1 }
0x13d7   :  { %vm2425_vm10 = vcmp.lt.s32.totalorder %v2423_v50, %v2424_v44 }
0x13d8   :  { %v2426_v43 = vsel %vm2425_vm10, %v2423_v50, %v2424_v44 }
0x13d9   :  { %2861 = vpush %v2426_v43 }
0x140a   :  { %s2862_s5 = spop %2861 }
0x140b   :  { %s4373_s5 = smov (!%p2538_p8, %s2862_s5), %s4371_s6 }
0x140c   :  { %v2542_v61 = vstv %s4373_s5 }
0x140d   :  { %v2543_v24 = vsel %vm2541_vm5, %v2542_v61, %v2527_v38 }
0x140e   :  { %2555 = vst.msk [vmem:[%s4239_s4] sm:$0xff] %vm2554_vm6, %v2543_v24 }
0x140f   :  { %2565 = vsyncpa [#allocation6], 1 }
0x1410   :  { %2566 = vsyncpa [#allocation8], 1 }

</bundles_post_ra>
